<compile_context>
chip_gen: v7x
topology: tpu7x:2x2x1
jax: 0.10.0
libtpu: 0.0.40
codegen_flags: <defaults>
</compile_context>

<pallas_src>
import functools

import numpy as np
import jax
import jax.numpy as jnp
from jax.experimental import pallas as pl
from jax.experimental.pallas import tpu as pltpu


def _round_up(x: int, m: int) -> int:
    return ((x + m - 1) // m) * m


def _spec_loss_kernel(frames_ref, basis_ref, o_ref, *, mb, fp, gamma, with_complex):
    """One grid step: mb input frames + mb target frames -> two partial loss sums.

    frames_ref: (1, 2*mb, n_fft) bf16 -- rows [0:mb)   = input frames
                                         rows [mb:2mb) = target frames
                (window NOT applied; it is folded into the basis).
    basis_ref:  (n_fft, 2*fp) bf16 -- cols [0:F)      =  win*cos(2*pi*f*n/N)/sqrt(N)
                                      cols [fp:fp+F)  = -win*sin(2*pi*f*n/N)/sqrt(N)
                                      zero columns elsewhere (F padded to fp).
    o_ref:      (8, 128) f32 partial sums: [0,0] = sum((|Y|^g - |S|^g)^2)
                                           [0,1] = sum(|Y_g - S_g|^2) (re+im)
    Zero-padded frames/columns contribute exactly 0 to both sums.
    """
    fr = frames_ref[0]                                     # (2*mb, n_fft)
    # Single fused MXU matmul: input+target, real+imag (bf16 in, f32 accumulate).
    spec = jnp.dot(fr, basis_ref[...], preferred_element_type=jnp.float32)

    yr, yi = spec[:mb, :fp], spec[:mb, fp:]
    sr, si = spec[mb:, :fp], spec[mb:, fp:]

    y2 = yr * yr + yi * yi
    s2 = sr * sr + si * si
    eps2 = 1e-24  # == clamp_min(|.|, 1e-12) squared

    if gamma != 1.0:
        # max(|Y|,1e-12)^gamma == max(|Y|^2,1e-24)^(gamma/2), via EUP exp/log.
        y_g = jnp.exp((0.5 * gamma) * jnp.log(jnp.maximum(y2, eps2)))
        s_g = jnp.exp((0.5 * gamma) * jnp.log(jnp.maximum(s2, eps2)))
    else:
        y_g = jnp.sqrt(y2)
        s_g = jnp.sqrt(s2)

    d = y_g - s_g
    sum_mag = jnp.sum(d * d)

    if with_complex:
        if gamma != 1.0:
            # Y_g * exp(i*angle(Y)) == Y * (Y_g / |Y|)
            ysc = y_g * jax.lax.rsqrt(jnp.maximum(y2, eps2))
            ssc = s_g * jax.lax.rsqrt(jnp.maximum(s2, eps2))
            dr = yr * ysc - sr * ssc
            di = yi * ysc - si * ssc
        else:
            dr = yr - sr
            di = yi - si
        sum_cplx = jnp.sum(dr * dr + di * di)
    else:
        sum_cplx = jnp.float32(0.0)

    rid = jax.lax.broadcasted_iota(jnp.int32, (8, 128), 0)
    cid = jax.lax.broadcasted_iota(jnp.int32, (8, 128), 1)
    o_ref[...] = jnp.where(
        (rid == 0) & (cid == 0), sum_mag,
        jnp.where((rid == 0) & (cid == 1), sum_cplx, jnp.float32(0.0)))


class MultiResSpecLossPallas:
    """Pallas equivalent of the PyTorch MultiResSpecLoss (with Stft) forward."""

    def __init__(self, n_ffts, gamma: float = 1.0, factor: float = 1.0,
                 f_complex=None):
        self.gamma = float(gamma)
        self.f = float(factor)
        self.n_ffts = [int(n) for n in n_ffts]
        if f_complex is None or f_complex == 0:
            self.f_complex = None
        elif isinstance(f_complex, (list, tuple)):
            self.f_complex = [float(v) for v in f_complex]
        else:
            self.f_complex = [float(f_complex)] * len(self.n_ffts)

        self._cfg = []
        for n_fft in self.n_ffts:
            hop = n_fft // 4                       # Stft default hop
            fb = n_fft // 2 + 1                    # one-sided bins
            fp = _round_up(fb, 128)                # lane-aligned padded bins
            n = np.arange(n_fft, dtype=np.float64)
            win = np.sin(np.pi * n / n_fft) ** 2   # torch.hann_window (periodic)
            ang = 2.0 * np.pi * np.outer(n, np.arange(fb, dtype=np.float64)) / n_fft
            scale = 1.0 / np.sqrt(n_fft)           # torch.stft normalized=True
            basis = np.zeros((n_fft, 2 * fp), np.float64)
            basis[:, :fb] = win[:, None] * np.cos(ang) * scale
            basis[:, fp:fp + fb] = -win[:, None] * np.sin(ang) * scale
            self._cfg.append(dict(
                n_fft=n_fft, hop=hop, fb=fb, fp=fp,
                basis=jnp.asarray(basis, jnp.bfloat16)))  # bf16 MXU bases

    def __call__(self, x: jnp.ndarray, y: jnp.ndarray) -> jnp.ndarray:
        assert x.shape == y.shape
        t = x.shape[-1]
        xb = jnp.asarray(x, jnp.float32).reshape(-1, t)
        yb = jnp.asarray(y, jnp.float32).reshape(-1, t)
        batch = xb.shape[0]

        loss = jnp.zeros((), jnp.float32)
        for i, cfg in enumerate(self._cfg):
            n_fft, hop, fb, fp = cfg["n_fft"], cfg["hop"], cfg["fb"], cfg["fp"]

            # torch.stft(center=True, pad_mode='reflect') framing, done in JAX.
            pad = n_fft // 2
            xp = jnp.pad(xb, ((0, 0), (pad, pad)), mode="reflect")
            yp = jnp.pad(yb, ((0, 0), (pad, pad)), mode="reflect")
            n_frames = 1 + t // hop
            idx = (np.arange(n_frames)[:, None] * hop
                   + np.arange(n_fft)[None, :])            # static gather indices
            fx = xp[:, idx].reshape(batch * n_frames, n_fft)
            fy = yp[:, idx].reshape(batch * n_frames, n_fft)

            m = batch * n_frames
            mb = min(256, _round_up(m, 16))     # frames per operand per MXU matmul
            mp = _round_up(m, mb)
            nb = mp // mb
            if mp > m:                          # zero rows contribute 0 to sums
                fx = jnp.pad(fx, ((0, mp - m), (0, 0)))
                fy = jnp.pad(fy, ((0, mp - m), (0, 0)))
            # (nb, 2*mb, n_fft): per block, mb input frames then mb target frames.
            frames = jnp.concatenate(
                [fx.reshape(nb, mb, n_fft), fy.reshape(nb, mb, n_fft)],
                axis=1).astype(jnp.bfloat16)

            kernel = functools.partial(
                _spec_loss_kernel, mb=mb, fp=fp, gamma=self.gamma,
                with_complex=self.f_complex is not None)

            flops = 2 * (2 * mp) * n_fft * (2 * fp)
            bytes_accessed = frames.size * 2 + cfg["basis"].size * 2 + nb * 8 * 128 * 4
            partials = pl.pallas_call(
                kernel,
                out_shape=jax.ShapeDtypeStruct((nb * 8, 128), jnp.float32),
                grid=(nb,),
                in_specs=[
                    pl.BlockSpec((1, 2 * mb, n_fft), lambda b: (b, 0, 0)),  # frames
                    pl.BlockSpec((n_fft, 2 * fp), lambda b: (0, 0)),        # basis
                ],
                out_specs=pl.BlockSpec((8, 128), lambda b: (b, 0)),         # partials
                compiler_params=pltpu.CompilerParams(
                    dimension_semantics=("parallel",)),
                cost_estimate=pl.CostEstimate(
                    flops=int(flops),
                    transcendentals=int(6 * mp * fp),
                    bytes_accessed=int(bytes_accessed)),
            )(frames, cfg["basis"])

            p = partials.reshape(nb, 8, 128)
            n_elem = batch * n_frames * fb          # true (unpadded) element count
            sum_mag = jnp.sum(p[:, 0, 0])
            loss = loss + self.f * (sum_mag / n_elem)
            if self.f_complex is not None:
                sum_cplx = jnp.sum(p[:, 0, 1])      # mse over view_as_real: /(2*N)
                loss = loss + self.f_complex[i] * (sum_cplx / (2 * n_elem))
        return loss


# ----------------------- pure-JAX reference (for the self-check) ------------

def _hann(n_fft: int) -> np.ndarray:
    n = np.arange(n_fft)
    return np.sin(np.pi * n / n_fft) ** 2


def _stft_ref(x, n_fft, hop, win):
    pad = n_fft // 2
    xp = jnp.pad(x, ((0, 0), (pad, pad)), mode="reflect")
    t = x.shape[-1]
    n_frames = 1 + t // hop
    idx = np.arange(n_frames)[:, None] * hop + np.arange(n_fft)[None, :]
    frames = xp[:, idx] * jnp.asarray(win, jnp.float32)[None, None, :]
    return jnp.fft.rfft(frames, axis=-1) / np.sqrt(n_fft)   # normalized=True


def _reference_loss(x, y, n_ffts, gamma, factor, f_complex):
    loss = jnp.zeros((), jnp.float32)
    for i, n_fft in enumerate(n_ffts):
        hop = n_fft // 4
        win = _hann(n_fft)
        Y = _stft_ref(x, n_fft, hop, win)
        S = _stft_ref(y, n_fft, hop, win)
        Y_abs, S_abs = jnp.abs(Y), jnp.abs(S)
        if gamma != 1.0:
            Y_abs = jnp.maximum(Y_abs, 1e-12) ** gamma
            S_abs = jnp.maximum(S_abs, 1e-12) ** gamma
        loss = loss + factor * jnp.mean((Y_abs - S_abs) ** 2)
        if f_complex is not None:
            if gamma != 1.0:
                Yc = Y_abs * jnp.exp(1j * jnp.angle(Y))
                Sc = S_abs * jnp.exp(1j * jnp.angle(S))
            else:
                Yc, Sc = Y, S
            d = Yc - Sc
            loss = loss + f_complex[i] * jnp.mean(d.real ** 2 + d.imag ** 2) / 2.0
    return loss


if __name__ == "__main__":
    key = jax.random.PRNGKey(0)
    B, t = 2, 2048
    k1, k2 = jax.random.split(key)
    target = jax.random.normal(k1, (B, t), dtype=jnp.float32)
    noise = jax.random.normal(k2, (B, t), dtype=jnp.float32)
    inp = 0.5 * target + 1.0 * noise

    n_ffts = (256, 512)
    gamma, factor, f_complex = 0.3, 1.0, 0.1

    mrsl = MultiResSpecLossPallas(n_ffts, gamma=gamma, factor=factor,
                                  f_complex=f_complex)
    loss_fn = jax.jit(lambda a, b: mrsl(a, b))
    loss = loss_fn(inp, target)
    jax.block_until_ready(loss)
    assert loss.shape == ()

    loss_ref = _reference_loss(inp, target, list(n_ffts), gamma, factor,
                               [f_complex] * len(n_ffts))
    # bf16 MXU inputs; the loss is a large mean so quantization errors average out.
    np.testing.assert_allclose(float(loss), float(loss_ref), rtol=2.5e-2, atol=1e-4)

    print("KERNEL_OK")
</pallas_src>

<mosaic_0001>
module attributes {stable_mosaic.version = 11 : i64} {
  func.func @_spec_loss_kernel(%arg0: i32, %arg1: memref<1x160x256xbf16, #tpu.memory_space<vmem>>, %arg2: memref<256x512xbf16, #tpu.memory_space<vmem>>, %arg3: memref<8x128xf32, #tpu.memory_space<vmem>>) attributes {dimension_semantics = [#tpu.dimension_semantics<parallel>], iteration_bounds = array<i64: 1>, scalar_prefetch = 0 : i64, scratch_operands = 0 : i64, tpu.core_type = #tpu.core_type<tc>, window_params = [{transform_indices = @transform_0, window_bounds = array<i64: 1, 160, 256>}, {pipeline_mode = #tpu.pipeline_mode<synchronous>, transform_indices = @transform_1, window_bounds = array<i64: 256, 512>}, {transform_indices = @transform_2, window_bounds = array<i64: 8, 128>}]} {
    %c0 = arith.constant 0 : index
    %c0_0 = arith.constant 0 : index
    %c0_1 = arith.constant 0 : index
    %0 = vector.load %arg1[%c0, %c0_0, %c0_1] : memref<1x160x256xbf16, #tpu.memory_space<vmem>>, vector<1x160x256xbf16>
    %1 = vector.shape_cast %0 : vector<1x160x256xbf16> to vector<160x256xbf16>
    %c0_2 = arith.constant 0 : index
    %c0_3 = arith.constant 0 : index
    %2 = vector.load %arg2[%c0_2, %c0_3] : memref<256x512xbf16, #tpu.memory_space<vmem>>, vector<256x512xbf16>
    %cst = arith.constant dense<0.000000e+00> : vector<160x512xf32>
    %3 = tpu.matmul %1, %2, %cst {dimension_numbers = #tpu.dot_dimension_numbers<[1], [0], [0], [1], [0, 0, 1, 1], [], []>} : vector<160x256xbf16>, vector<256x512xbf16>, vector<160x512xf32> -> vector<160x512xf32>
    %4 = vector.extract_strided_slice %3 {offsets = [0, 0], sizes = [80, 256], strides = [1, 1]} : vector<160x512xf32> to vector<80x256xf32>
    %5 = vector.extract_strided_slice %3 {offsets = [0, 256], sizes = [80, 256], strides = [1, 1]} : vector<160x512xf32> to vector<80x256xf32>
    %6 = vector.extract_strided_slice %3 {offsets = [80, 0], sizes = [80, 256], strides = [1, 1]} : vector<160x512xf32> to vector<80x256xf32>
    %7 = vector.extract_strided_slice %3 {offsets = [80, 256], sizes = [80, 256], strides = [1, 1]} : vector<160x512xf32> to vector<80x256xf32>
    %8 = arith.mulf %4, %4 : vector<80x256xf32>
    %9 = arith.mulf %5, %5 : vector<80x256xf32>
    %10 = arith.addf %8, %9 : vector<80x256xf32>
    %11 = arith.mulf %6, %6 : vector<80x256xf32>
    %12 = arith.mulf %7, %7 : vector<80x256xf32>
    %13 = arith.addf %11, %12 : vector<80x256xf32>
    %cst_4 = arith.constant 1.000000e-24 : f32
    %14 = vector.broadcast %cst_4 : f32 to vector<80x256xf32>
    %15 = arith.maximumf %10, %14 : vector<80x256xf32>
    %16 = math.log %15 : vector<80x256xf32>
    %cst_5 = arith.constant 1.500000e-01 : f32
    %17 = vector.broadcast %cst_5 : f32 to vector<80x256xf32>
    %18 = arith.mulf %17, %16 : vector<80x256xf32>
    %19 = math.exp %18 : vector<80x256xf32>
    %cst_6 = arith.constant 1.000000e-24 : f32
    %20 = vector.broadcast %cst_6 : f32 to vector<80x256xf32>
    %21 = arith.maximumf %13, %20 : vector<80x256xf32>
    %22 = math.log %21 : vector<80x256xf32>
    %cst_7 = arith.constant 1.500000e-01 : f32
    %23 = vector.broadcast %cst_7 : f32 to vector<80x256xf32>
    %24 = arith.mulf %23, %22 : vector<80x256xf32>
    %25 = math.exp %24 : vector<80x256xf32>
    %26 = arith.subf %19, %25 : vector<80x256xf32>
    %27 = arith.mulf %26, %26 : vector<80x256xf32>
    %28 = vector.shape_cast %27 : vector<80x256xf32> to vector<1x80x256xf32>
    %cst_8 = arith.constant dense<0.000000e+00> : vector<1xf32>
    %29 = vector.multi_reduction <add>, %28, %cst_8 [1, 2] : vector<1x80x256xf32> to vector<1xf32>
    %30 = vector.shape_cast %29 : vector<1xf32> to vector<1x1x1xf32>
    %31 = vector.extract %30[0, 0, 0] : f32 from vector<1x1x1xf32>
    %cst_9 = arith.constant 1.000000e-24 : f32
    %32 = vector.broadcast %cst_9 : f32 to vector<80x256xf32>
    %33 = arith.maximumf %10, %32 : vector<80x256xf32>
    %34 = math.rsqrt %33 : vector<80x256xf32>
    %35 = arith.mulf %19, %34 : vector<80x256xf32>
    %cst_10 = arith.constant 1.000000e-24 : f32
    %36 = vector.broadcast %cst_10 : f32 to vector<80x256xf32>
    %37 = arith.maximumf %13, %36 : vector<80x256xf32>
    %38 = math.rsqrt %37 : vector<80x256xf32>
    %39 = arith.mulf %25, %38 : vector<80x256xf32>
    %40 = arith.mulf %4, %35 : vector<80x256xf32>
    %41 = arith.mulf %6, %39 : vector<80x256xf32>
    %42 = arith.subf %40, %41 : vector<80x256xf32>
    %43 = arith.mulf %5, %35 : vector<80x256xf32>
    %44 = arith.mulf %7, %39 : vector<80x256xf32>
    %45 = arith.subf %43, %44 : vector<80x256xf32>
    %46 = arith.mulf %42, %42 : vector<80x256xf32>
    %47 = arith.mulf %45, %45 : vector<80x256xf32>
    %48 = arith.addf %46, %47 : vector<80x256xf32>
    %49 = vector.shape_cast %48 : vector<80x256xf32> to vector<1x80x256xf32>
    %cst_11 = arith.constant dense<0.000000e+00> : vector<1xf32>
    %50 = vector.multi_reduction <add>, %49, %cst_11 [1, 2] : vector<1x80x256xf32> to vector<1xf32>
    %51 = vector.shape_cast %50 : vector<1xf32> to vector<1x1x1xf32>
    %52 = vector.extract %51[0, 0, 0] : f32 from vector<1x1x1xf32>
    %53 = tpu.iota {dimensions = array<i32: 0>} : vector<8x128xi32>
    %54 = tpu.iota {dimensions = array<i32: 1>} : vector<8x128xi32>
    %c0_i32 = arith.constant 0 : i32
    %55 = vector.broadcast %c0_i32 : i32 to vector<8x128xi32>
    %56 = arith.cmpi eq, %53, %55 : vector<8x128xi32>
    %c0_i32_12 = arith.constant 0 : i32
    %57 = vector.broadcast %c0_i32_12 : i32 to vector<8x128xi32>
    %58 = arith.cmpi eq, %54, %57 : vector<8x128xi32>
    %59 = arith.andi %56, %58 : vector<8x128xi1>
    %c0_i32_13 = arith.constant 0 : i32
    %60 = vector.broadcast %c0_i32_13 : i32 to vector<8x128xi32>
    %61 = arith.cmpi eq, %53, %60 : vector<8x128xi32>
    %c1_i32 = arith.constant 1 : i32
    %62 = vector.broadcast %c1_i32 : i32 to vector<8x128xi32>
    %63 = arith.cmpi eq, %54, %62 : vector<8x128xi32>
    %64 = arith.andi %61, %63 : vector<8x128xi1>
    %cst_14 = arith.constant 0.000000e+00 : f32
    %65 = vector.broadcast %52 : f32 to vector<8x128xf32>
    %66 = vector.broadcast %cst_14 : f32 to vector<8x128xf32>
    %67 = arith.select %64, %65, %66 : vector<8x128xi1>, vector<8x128xf32>
    %68 = vector.broadcast %31 : f32 to vector<8x128xf32>
    %69 = arith.select %59, %68, %67 : vector<8x128xi1>, vector<8x128xf32>
    %c0_15 = arith.constant 0 : index
    %c0_16 = arith.constant 0 : index
    %70 = vector.load %arg3[%c0_15, %c0_16] : memref<8x128xf32, #tpu.memory_space<vmem>>, vector<8x128xf32>
    tpu.vector_store %arg3[%c0_15, %c0_16], %69 {strides = array<i32>} : memref<8x128xf32, #tpu.memory_space<vmem>>, vector<8x128xf32>,
    return
  }
  func.func @transform_0(%arg0: i32) -> (i32, i32, i32) {
    %c0_i32 = arith.constant 0 : i32
    %c0_i32_0 = arith.constant 0 : i32
    %c0_i32_1 = arith.constant 0 : i32
    return %arg0, %c0_i32, %c0_i32_0 : i32, i32, i32
  }
  func.func @transform_1(%arg0: i32) -> (i32, i32) {
    %c0_i32 = arith.constant 0 : i32
    %c0_i32_0 = arith.constant 0 : i32
    %c0_i32_1 = arith.constant 0 : i32
    return %c0_i32, %c0_i32_0 : i32, i32
  }
  func.func @transform_2(%arg0: i32) -> (i32, i32) {
    %c0_i32 = arith.constant 0 : i32
    %c0_i32_0 = arith.constant 0 : i32
    return %arg0, %c0_i32 : i32, i32
  }
}

module attributes {stable_mosaic.version = 11 : i64} {
  func.func @_spec_loss_kernel(%arg0: i32, %arg1: memref<1x96x512xbf16, #tpu.memory_space<vmem>>, %arg2: memref<512x768xbf16, #tpu.memory_space<vmem>>, %arg3: memref<8x128xf32, #tpu.memory_space<vmem>>) attributes {dimension_semantics = [#tpu.dimension_semantics<parallel>], iteration_bounds = array<i64: 1>, scalar_prefetch = 0 : i64, scratch_operands = 0 : i64, tpu.core_type = #tpu.core_type<tc>, window_params = [{transform_indices = @transform_0, window_bounds = array<i64: 1, 96, 512>}, {pipeline_mode = #tpu.pipeline_mode<synchronous>, transform_indices = @transform_1, window_bounds = array<i64: 512, 768>}, {transform_indices = @transform_2, window_bounds = array<i64: 8, 128>}]} {
    %c0 = arith.constant 0 : index
    %c0_0 = arith.constant 0 : index
    %c0_1 = arith.constant 0 : index
    %0 = vector.load %arg1[%c0, %c0_0, %c0_1] : memref<1x96x512xbf16, #tpu.memory_space<vmem>>, vector<1x96x512xbf16>
    %1 = vector.shape_cast %0 : vector<1x96x512xbf16> to vector<96x512xbf16>
    %c0_2 = arith.constant 0 : index
    %c0_3 = arith.constant 0 : index
    %2 = vector.load %arg2[%c0_2, %c0_3] : memref<512x768xbf16, #tpu.memory_space<vmem>>, vector<512x768xbf16>
    %cst = arith.constant dense<0.000000e+00> : vector<96x768xf32>
    %3 = tpu.matmul %1, %2, %cst {dimension_numbers = #tpu.dot_dimension_numbers<[1], [0], [0], [1], [0, 0, 1, 1], [], []>} : vector<96x512xbf16>, vector<512x768xbf16>, vector<96x768xf32> -> vector<96x768xf32>
    %4 = vector.extract_strided_slice %3 {offsets = [0, 0], sizes = [48, 384], strides = [1, 1]} : vector<96x768xf32> to vector<48x384xf32>
    %5 = vector.extract_strided_slice %3 {offsets = [0, 384], sizes = [48, 384], strides = [1, 1]} : vector<96x768xf32> to vector<48x384xf32>
    %6 = vector.extract_strided_slice %3 {offsets = [48, 0], sizes = [48, 384], strides = [1, 1]} : vector<96x768xf32> to vector<48x384xf32>
    %7 = vector.extract_strided_slice %3 {offsets = [48, 384], sizes = [48, 384], strides = [1, 1]} : vector<96x768xf32> to vector<48x384xf32>
    %8 = arith.mulf %4, %4 : vector<48x384xf32>
    %9 = arith.mulf %5, %5 : vector<48x384xf32>
    %10 = arith.addf %8, %9 : vector<48x384xf32>
    %11 = arith.mulf %6, %6 : vector<48x384xf32>
    %12 = arith.mulf %7, %7 : vector<48x384xf32>
    %13 = arith.addf %11, %12 : vector<48x384xf32>
    %cst_4 = arith.constant 1.000000e-24 : f32
    %14 = vector.broadcast %cst_4 : f32 to vector<48x384xf32>
    %15 = arith.maximumf %10, %14 : vector<48x384xf32>
    %16 = math.log %15 : vector<48x384xf32>
    %cst_5 = arith.constant 1.500000e-01 : f32
    %17 = vector.broadcast %cst_5 : f32 to vector<48x384xf32>
    %18 = arith.mulf %17, %16 : vector<48x384xf32>
    %19 = math.exp %18 : vector<48x384xf32>
    %cst_6 = arith.constant 1.000000e-24 : f32
    %20 = vector.broadcast %cst_6 : f32 to vector<48x384xf32>
    %21 = arith.maximumf %13, %20 : vector<48x384xf32>
    %22 = math.log %21 : vector<48x384xf32>
    %cst_7 = arith.constant 1.500000e-01 : f32
    %23 = vector.broadcast %cst_7 : f32 to vector<48x384xf32>
    %24 = arith.mulf %23, %22 : vector<48x384xf32>
    %25 = math.exp %24 : vector<48x384xf32>
    %26 = arith.subf %19, %25 : vector<48x384xf32>
    %27 = arith.mulf %26, %26 : vector<48x384xf32>
    %28 = vector.shape_cast %27 : vector<48x384xf32> to vector<1x48x384xf32>
    %cst_8 = arith.constant dense<0.000000e+00> : vector<1xf32>
    %29 = vector.multi_reduction <add>, %28, %cst_8 [1, 2] : vector<1x48x384xf32> to vector<1xf32>
    %30 = vector.shape_cast %29 : vector<1xf32> to vector<1x1x1xf32>
    %31 = vector.extract %30[0, 0, 0] : f32 from vector<1x1x1xf32>
    %cst_9 = arith.constant 1.000000e-24 : f32
    %32 = vector.broadcast %cst_9 : f32 to vector<48x384xf32>
    %33 = arith.maximumf %10, %32 : vector<48x384xf32>
    %34 = math.rsqrt %33 : vector<48x384xf32>
    %35 = arith.mulf %19, %34 : vector<48x384xf32>
    %cst_10 = arith.constant 1.000000e-24 : f32
    %36 = vector.broadcast %cst_10 : f32 to vector<48x384xf32>
    %37 = arith.maximumf %13, %36 : vector<48x384xf32>
    %38 = math.rsqrt %37 : vector<48x384xf32>
    %39 = arith.mulf %25, %38 : vector<48x384xf32>
    %40 = arith.mulf %4, %35 : vector<48x384xf32>
    %41 = arith.mulf %6, %39 : vector<48x384xf32>
    %42 = arith.subf %40, %41 : vector<48x384xf32>
    %43 = arith.mulf %5, %35 : vector<48x384xf32>
    %44 = arith.mulf %7, %39 : vector<48x384xf32>
    %45 = arith.subf %43, %44 : vector<48x384xf32>
    %46 = arith.mulf %42, %42 : vector<48x384xf32>
    %47 = arith.mulf %45, %45 : vector<48x384xf32>
    %48 = arith.addf %46, %47 : vector<48x384xf32>
    %49 = vector.shape_cast %48 : vector<48x384xf32> to vector<1x48x384xf32>
    %cst_11 = arith.constant dense<0.000000e+00> : vector<1xf32>
    %50 = vector.multi_reduction <add>, %49, %cst_11 [1, 2] : vector<1x48x384xf32> to vector<1xf32>
    %51 = vector.shape_cast %50 : vector<1xf32> to vector<1x1x1xf32>
    %52 = vector.extract %51[0, 0, 0] : f32 from vector<1x1x1xf32>
    %53 = tpu.iota {dimensions = array<i32: 0>} : vector<8x128xi32>
    %54 = tpu.iota {dimensions = array<i32: 1>} : vector<8x128xi32>
    %c0_i32 = arith.constant 0 : i32
    %55 = vector.broadcast %c0_i32 : i32 to vector<8x128xi32>
    %56 = arith.cmpi eq, %53, %55 : vector<8x128xi32>
    %c0_i32_12 = arith.constant 0 : i32
    %57 = vector.broadcast %c0_i32_12 : i32 to vector<8x128xi32>
    %58 = arith.cmpi eq, %54, %57 : vector<8x128xi32>
    %59 = arith.andi %56, %58 : vector<8x128xi1>
    %c0_i32_13 = arith.constant 0 : i32
    %60 = vector.broadcast %c0_i32_13 : i32 to vector<8x128xi32>
    %61 = arith.cmpi eq, %53, %60 : vector<8x128xi32>
    %c1_i32 = arith.constant 1 : i32
    %62 = vector.broadcast %c1_i32 : i32 to vector<8x128xi32>
    %63 = arith.cmpi eq, %54, %62 : vector<8x128xi32>
    %64 = arith.andi %61, %63 : vector<8x128xi1>
    %cst_14 = arith.constant 0.000000e+00 : f32
    %65 = vector.broadcast %52 : f32 to vector<8x128xf32>
    %66 = vector.broadcast %cst_14 : f32 to vector<8x128xf32>
    %67 = arith.select %64, %65, %66 : vector<8x128xi1>, vector<8x128xf32>
    %68 = vector.broadcast %31 : f32 to vector<8x128xf32>
    %69 = arith.select %59, %68, %67 : vector<8x128xi1>, vector<8x128xf32>
    %c0_15 = arith.constant 0 : index
    %c0_16 = arith.constant 0 : index
    %70 = vector.load %arg3[%c0_15, %c0_16] : memref<8x128xf32, #tpu.memory_space<vmem>>, vector<8x128xf32>
    tpu.vector_store %arg3[%c0_15, %c0_16], %69 {strides = array<i32>} : memref<8x128xf32, #tpu.memory_space<vmem>>, vector<8x128xf32>,
    return
  }
  func.func @transform_0(%arg0: i32) -> (i32, i32, i32) {
    %c0_i32 = arith.constant 0 : i32
    %c0_i32_0 = arith.constant 0 : i32
    %c0_i32_1 = arith.constant 0 : i32
    return %arg0, %c0_i32, %c0_i32_0 : i32, i32, i32
  }
  func.func @transform_1(%arg0: i32) -> (i32, i32) {
    %c0_i32 = arith.constant 0 : i32
    %c0_i32_0 = arith.constant 0 : i32
    %c0_i32_1 = arith.constant 0 : i32
    return %c0_i32, %c0_i32_0 : i32, i32
  }
  func.func @transform_2(%arg0: i32) -> (i32, i32) {
    %c0_i32 = arith.constant 0 : i32
    %c0_i32_0 = arith.constant 0 : i32
    return %arg0, %c0_i32 : i32, i32
  }
}

</mosaic_0001>

<bundles_post_ra>
// kernel: _lambda_.2
= control target key start
LH: loop header
LB: loop body
LE: loop exit
PB: predicated region body
PF: predicated region fallthrough
CT: control target
= control target key end

     0   :  { %s3031_s1 = inlined_call_operand.vmem [shape: bf16[256,512], index: 1, kind: input, shape index: {}]   ;;  %s3032_s0 = inlined_call_operand.vmem [shape: bf16[1,160,256], index: 0, kind: input, shape index: {}]   ;;  %s3033_s2 = inlined_call_operand.vmem [shape: f32[8,128], index: 2, kind: output, shape index: {}]  }
   0x1   :  { %v1603_v0 = vld [vmem:[%s3031_s1 + $0x4] ss:$16 sps:$4 sm:$0xff]   ;;  %v1605_v1 = vld [vmem:[%s3031_s1 + $0xc] ss:$16 sps:$4 sm:$0xff]   ;;  %v1607_v2 = vld [vmem:[%s3031_s1] ss:$16 sps:$4 sm:$0xff]  }
   0x2   :  { %515 = vmatprep.subr.bf16.mxu0 %v1603_v0  ;;  %v1608_v3 = vld [vmem:[%s3031_s1 + $0x8] ss:$16 sps:$4 sm:$0xff]   ;;  %648 = vmatprep.subr.bf16.mxu1 %v1605_v1  ;;  %v1609_v4 = vld [vmem:[%s3031_s1 + $0x24] ss:$16 sps:$4 sm:$0xff]   ;;  %v1611_v5 = vld [vmem:[%s3031_s1 + $0x2c] ss:$16 sps:$4 sm:$0xff]  }
   0x3   :  { %516 = vmatpush1.bf16.msra.mxu0 %v1607_v2  ;;  %649 = vmatpush1.bf16.msra.mxu1 %v1608_v3  ;;  %v1613_v6 = vld [vmem:[%s3031_s1 + $0x20] ss:$16 sps:$4 sm:$0xff]   ;;  %v1614_v7 = vld [vmem:[%s3031_s1 + $0x28] ss:$16 sps:$4 sm:$0xff]   ;;  %v1615_v8 = vld [vmem:[%s3031_s1 + $0x44] ss:$16 sps:$4 sm:$0xff]  }
   0x4   :  { %517 = vmatprep.subr.bf16.mxu0 %v1609_v4  ;;  %650 = vmatprep.subr.bf16.mxu1 %v1611_v5  ;;  %v1617_v9 = vld [vmem:[%s3031_s1 + $0x4c] ss:$16 sps:$4 sm:$0xff]   ;;  %v1619_v10 = vld [vmem:[%s3031_s1 + $0x40] ss:$16 sps:$4 sm:$0xff]   ;;  %v1620_v11 = vld [vmem:[%s3031_s1 + $0x48] ss:$16 sps:$4 sm:$0xff]  }
   0x5   :  { %v1621_v12 = vld [vmem:[%s3031_s1 + $0x64] ss:$16 sps:$4 sm:$0xff]   ;;  %v1623_v13 = vld [vmem:[%s3031_s1 + $0x6c] ss:$16 sps:$4 sm:$0xff]   ;;  %v1625_v14 = vld [vmem:[%s3031_s1 + $0x60] ss:$16 sps:$4 sm:$0xff]  }
   0x6   :  { %v1626_v15 = vld [vmem:[%s3031_s1 + $0x68] ss:$16 sps:$4 sm:$0xff]   ;;  %v1627_v16 = vld [vmem:[%s3031_s1 + $0x84] ss:$16 sps:$4 sm:$0xff]   ;;  %v1629_v17 = vld [vmem:[%s3031_s1 + $0x8c] ss:$16 sps:$4 sm:$0xff]  }
   0x7   :  { %518 = vmatpush1.bf16.msra.mxu0 %v1613_v6  ;;  %651 = vmatpush1.bf16.msra.mxu1 %v1614_v7  ;;  %v1631_v18 = vld [vmem:[%s3031_s1 + $0x80] ss:$16 sps:$4 sm:$0xff]   ;;  %v1632_v19 = vld [vmem:[%s3031_s1 + $0x88] ss:$16 sps:$4 sm:$0xff]   ;;  %v1633_v20 = vld [vmem:[%s3031_s1 + $0xa4] ss:$16 sps:$4 sm:$0xff]  }
   0x8   :  { %519 = vmatprep.subr.bf16.mxu0 %v1615_v8  ;;  %652 = vmatprep.subr.bf16.mxu1 %v1617_v9  ;;  %v1635_v21 = vld [vmem:[%s3031_s1 + $0xac] ss:$16 sps:$4 sm:$0xff]   ;;  %v1637_v22 = vld [vmem:[%s3031_s1 + $0xa0] ss:$16 sps:$4 sm:$0xff]   ;;  %v1638_v23 = vld [vmem:[%s3031_s1 + $0xa8] ss:$16 sps:$4 sm:$0xff]  }
   0x9   :  { %v1639_v24 = vld [vmem:[%s3031_s1 + $0xc4] ss:$16 sps:$4 sm:$0xff]   ;;  %v1641_v25 = vld [vmem:[%s3031_s1 + $0xcc] ss:$16 sps:$4 sm:$0xff]   ;;  %v1643_v26 = vld [vmem:[%s3031_s1 + $0xc0] ss:$16 sps:$4 sm:$0xff]  }
   0xa   :  { %v1644_v27 = vld [vmem:[%s3031_s1 + $0xc8] ss:$16 sps:$4 sm:$0xff]   ;;  %v1645_v28 = vld [vmem:[%s3031_s1 + $0xe4] ss:$16 sps:$4 sm:$0xff]   ;;  %v1647_v29 = vld [vmem:[%s3031_s1 + $0xec] ss:$16 sps:$4 sm:$0xff]  }
   0xb   :  { %520 = vmatpush1.bf16.msra.mxu0 %v1619_v10  ;;  %653 = vmatpush1.bf16.msra.mxu1 %v1620_v11  ;;  %v1649_v30 = vld [vmem:[%s3031_s1 + $0xe0] ss:$16 sps:$4 sm:$0xff]   ;;  %v1650_v31 = vld [vmem:[%s3031_s1 + $0xe8] ss:$16 sps:$4 sm:$0xff]   ;;  %v1651_v32 = vld [vmem:[%s3031_s1 + $0x104] ss:$16 sps:$4 sm:$0xff]  }
   0xc   :  { %521 = vmatprep.subr.bf16.mxu0 %v1621_v12  ;;  %654 = vmatprep.subr.bf16.mxu1 %v1623_v13  ;;  %v1653_v33 = vld [vmem:[%s3031_s1 + $0x10c] ss:$16 sps:$4 sm:$0xff]   ;;  %v1655_v34 = vld [vmem:[%s3031_s1 + $0x100] ss:$16 sps:$4 sm:$0xff]   ;;  %v1656_v35 = vld [vmem:[%s3031_s1 + $0x108] ss:$16 sps:$4 sm:$0xff]  }
   0xd   :  { %v1657_v36 = vld [vmem:[%s3031_s1 + $0x124] ss:$16 sps:$4 sm:$0xff]   ;;  %v1659_v37 = vld [vmem:[%s3031_s1 + $0x12c] ss:$16 sps:$4 sm:$0xff]   ;;  %v1661_v38 = vld [vmem:[%s3031_s1 + $0x120] ss:$16 sps:$4 sm:$0xff]  }
   0xe   :  { %v1662_v39 = vld [vmem:[%s3031_s1 + $0x128] ss:$16 sps:$4 sm:$0xff]   ;;  %v1663_v40 = vld [vmem:[%s3031_s1 + $0x144] ss:$16 sps:$4 sm:$0xff]   ;;  %v1665_v41 = vld [vmem:[%s3031_s1 + $0x14c] ss:$16 sps:$4 sm:$0xff]  }
   0xf   :  { %522 = vmatpush1.bf16.msra.mxu0 %v1625_v14  ;;  %655 = vmatpush1.bf16.msra.mxu1 %v1626_v15  ;;  %v1667_v42 = vld [vmem:[%s3031_s1 + $0x140] ss:$16 sps:$4 sm:$0xff]   ;;  %v1668_v43 = vld [vmem:[%s3031_s1 + $0x148] ss:$16 sps:$4 sm:$0xff]   ;;  %v1669_v44 = vld [vmem:[%s3031_s1 + $0x164] ss:$16 sps:$4 sm:$0xff]  }
  0x10   :  { %523 = vmatprep.subr.bf16.mxu0 %v1627_v16  ;;  %656 = vmatprep.subr.bf16.mxu1 %v1629_v17  ;;  %v1671_v45 = vld [vmem:[%s3031_s1 + $0x16c] ss:$16 sps:$4 sm:$0xff]   ;;  %v1673_v46 = vld [vmem:[%s3031_s1 + $0x160] ss:$16 sps:$4 sm:$0xff]   ;;  %v1674_v47 = vld [vmem:[%s3031_s1 + $0x168] ss:$16 sps:$4 sm:$0xff]  }
  0x11   :  { %v1701_v48 = vld [vmem:[%s3032_s0 + $0x4] ss:$8 sps:$4 sm:$0xff]   ;;  %v1679_v51 = vld [vmem:[%s3031_s1 + $0x180] ss:$16 sps:$4 sm:$0xff]   ;;  %v1680_v52 = vld [vmem:[%s3031_s1 + $0x188] ss:$16 sps:$4 sm:$0xff]  }
  0x12   :  { %v1675_v49 = vld [vmem:[%s3031_s1 + $0x184] ss:$16 sps:$4 sm:$0xff]   ;;  %v1677_v50 = vld [vmem:[%s3031_s1 + $0x18c] ss:$16 sps:$4 sm:$0xff]   ;;  %547 = vmatprep.mubr.bf16.mxu0 %v1701_v48  ;;  %680 = vmatprep.mubr.bf16.mxu1 %v1701_v48  ;;  %v1685_v55 = vld [vmem:[%s3031_s1 + $0x1a0] ss:$16 sps:$4 sm:$0xff]  }
  0x13   :  { %524 = vmatpush1.bf16.msra.mxu0 %v1631_v18  ;;  %657 = vmatpush1.bf16.msra.mxu1 %v1632_v19  ;;  %v1681_v53 = vld [vmem:[%s3031_s1 + $0x1a4] ss:$16 sps:$4 sm:$0xff]   ;;  %v1683_v54 = vld [vmem:[%s3031_s1 + $0x1ac] ss:$16 sps:$4 sm:$0xff]   ;;  %v1686_v56 = vld [vmem:[%s3031_s1 + $0x1a8] ss:$16 sps:$4 sm:$0xff]  }
  0x14   :  { %525 = vmatprep.subr.bf16.mxu0 %v1633_v20  ;;  %658 = vmatprep.subr.bf16.mxu1 %v1635_v21  ;;  %v1687_v57 = vld [vmem:[%s3031_s1 + $0x1c4] ss:$16 sps:$4 sm:$0xff]   ;;  %v1689_v58 = vld [vmem:[%s3031_s1 + $0x1cc] ss:$16 sps:$4 sm:$0xff]   ;;  %v1691_v59 = vld [vmem:[%s3031_s1 + $0x1c0] ss:$16 sps:$4 sm:$0xff]  }
  0x15   :  { %v1692_v60 = vld [vmem:[%s3031_s1 + $0x1c8] ss:$16 sps:$4 sm:$0xff]   ;;  %v1693_v61 = vld [vmem:[%s3031_s1 + $0x1e4] ss:$16 sps:$4 sm:$0xff]   ;;  %v1695_v62 = vld [vmem:[%s3031_s1 + $0x1ec] ss:$16 sps:$4 sm:$0xff]  }
  0x16   :  { %v1697_v63 = vld [vmem:[%s3031_s1 + $0x1e0] ss:$16 sps:$4 sm:$0xff]   ;;  %v1698_v0 = vld [vmem:[%s3031_s1 + $0x1e8] ss:$16 sps:$4 sm:$0xff]   ;;  %v1702_v2 = vld [vmem:[%s3032_s0 + $0x14] ss:$8 sps:$4 sm:$0xff]  }
  0x17   :  { %526 = vmatpush1.bf16.msra.mxu0 %v1637_v22  ;;  %659 = vmatpush1.bf16.msra.mxu1 %v1638_v23  ;;  %v1699_v1 = vld [vmem:[%s3032_s0] ss:$8 sps:$4 sm:$0xff]   ;;  %v1704_v3 = vld [vmem:[%s3032_s0 + $0x10] ss:$8 sps:$4 sm:$0xff]   ;;  %v1705_v4 = vld [vmem:[%s3032_s0 + $0x24] ss:$8 sps:$4 sm:$0xff]  }
  0x18   :  { %527 = vmatprep.subr.bf16.mxu0 %v1639_v24  ;;  %660 = vmatprep.subr.bf16.mxu1 %v1641_v25  ;;  %v1707_v5 = vld [vmem:[%s3032_s0 + $0x20] ss:$8 sps:$4 sm:$0xff]   ;;  %v1708_v6 = vld [vmem:[%s3032_s0 + $0x34] ss:$8 sps:$4 sm:$0xff]   ;;  %v1710_v7 = vld [vmem:[%s3032_s0 + $0x30] ss:$8 sps:$4 sm:$0xff]  }
  0x19   :  { %v1711_v8 = vld [vmem:[%s3032_s0 + $0x44] ss:$8 sps:$4 sm:$0xff]   ;;  %v1713_v9 = vld [vmem:[%s3032_s0 + $0x40] ss:$8 sps:$4 sm:$0xff]   ;;  %v1714_v10 = vld [vmem:[%s3032_s0 + $0x54] ss:$8 sps:$4 sm:$0xff]  }
  0x1a   :  { %v1716_v11 = vld [vmem:[%s3032_s0 + $0x50] ss:$8 sps:$4 sm:$0xff]   ;;  %v1717_v12 = vld [vmem:[%s3032_s0 + $0x64] ss:$8 sps:$4 sm:$0xff]   ;;  %v1719_v13 = vld [vmem:[%s3032_s0 + $0x60] ss:$8 sps:$4 sm:$0xff]  }
  0x1b   :  { %528 = vmatpush1.bf16.msra.mxu0 %v1643_v26  ;;  %661 = vmatpush1.bf16.msra.mxu1 %v1644_v27  ;;  %v1720_v14 = vld [vmem:[%s3032_s0 + $0x74] ss:$8 sps:$4 sm:$0xff]   ;;  %v1722_v15 = vld [vmem:[%s3032_s0 + $0x70] ss:$8 sps:$4 sm:$0xff]   ;;  %v1723_v16 = vld [vmem:[%s3032_s0 + $0x84] ss:$8 sps:$4 sm:$0xff]  }
  0x1c   :  { %529 = vmatprep.subr.bf16.mxu0 %v1645_v28  ;;  %662 = vmatprep.subr.bf16.mxu1 %v1647_v29  ;;  %v1725_v17 = vld [vmem:[%s3032_s0 + $0x80] ss:$8 sps:$4 sm:$0xff]   ;;  %v1726_v18 = vld [vmem:[%s3032_s0 + $0x94] ss:$8 sps:$4 sm:$0xff]   ;;  %v1728_v19 = vld [vmem:[%s3032_s0 + $0x90] ss:$8 sps:$4 sm:$0xff]  }
  0x1f   :  { %530 = vmatpush1.bf16.msra.mxu0 %v1649_v30  ;;  %663 = vmatpush1.bf16.msra.mxu1 %v1650_v31 }
  0x20   :  { %531 = vmatprep.subr.bf16.mxu0 %v1651_v32  ;;  %664 = vmatprep.subr.bf16.mxu1 %v1653_v33 }
  0x23   :  { %532 = vmatpush1.bf16.msra.mxu0 %v1655_v34  ;;  %665 = vmatpush1.bf16.msra.mxu1 %v1656_v35 }
  0x24   :  { %533 = vmatprep.subr.bf16.mxu0 %v1657_v36  ;;  %666 = vmatprep.subr.bf16.mxu1 %v1659_v37 }
  0x27   :  { %534 = vmatpush1.bf16.msra.mxu0 %v1661_v38  ;;  %667 = vmatpush1.bf16.msra.mxu1 %v1662_v39 }
  0x28   :  { %535 = vmatprep.subr.bf16.mxu0 %v1663_v40  ;;  %668 = vmatprep.subr.bf16.mxu1 %v1665_v41 }
  0x2b   :  { %536 = vmatpush1.bf16.msra.mxu0 %v1667_v42  ;;  %669 = vmatpush1.bf16.msra.mxu1 %v1668_v43 }
  0x2c   :  { %537 = vmatprep.subr.bf16.mxu0 %v1669_v44  ;;  %670 = vmatprep.subr.bf16.mxu1 %v1671_v45 }
  0x2f   :  { %538 = vmatpush1.bf16.msra.mxu0 %v1673_v46  ;;  %671 = vmatpush1.bf16.msra.mxu1 %v1674_v47 }
  0x30   :  { %539 = vmatprep.subr.bf16.mxu0 %v1675_v49  ;;  %672 = vmatprep.subr.bf16.mxu1 %v1677_v50 }
  0x33   :  { %540 = vmatpush1.bf16.msra.mxu0 %v1679_v51  ;;  %673 = vmatpush1.bf16.msra.mxu1 %v1680_v52 }
  0x34   :  { %541 = vmatprep.subr.bf16.mxu0 %v1681_v53  ;;  %674 = vmatprep.subr.bf16.mxu1 %v1683_v54 }
  0x37   :  { %542 = vmatpush1.bf16.msra.mxu0 %v1685_v55  ;;  %675 = vmatpush1.bf16.msra.mxu1 %v1686_v56 }
  0x38   :  { %543 = vmatprep.subr.bf16.mxu0 %v1687_v57  ;;  %676 = vmatprep.subr.bf16.mxu1 %v1689_v58 }
  0x3b   :  { %544 = vmatpush1.bf16.msra.mxu0 %v1691_v59  ;;  %677 = vmatpush1.bf16.msra.mxu1 %v1692_v60 }
  0x3c   :  { %545 = vmatprep.subr.bf16.mxu0 %v1693_v61  ;;  %678 = vmatprep.subr.bf16.mxu1 %v1695_v62 }
  0x3f   :  { %546 = vmatpush1.bf16.msra.mxu0 %v1697_v63  ;;  %679 = vmatpush1.bf16.msra.mxu1 %v1698_v0 }
  0x42   :  { %548 = vmatmul.mubr.bf16.vlgmr.msra.gmra.mrb[0].mxu0 %v1699_v1  ;;  %681 = vmatmul.mubr.bf16.vlgmr.msra.gmra.mrb[0].mxu1 %v1699_v1 }
  0x43   :  { %557 = vmatprep.mubr.bf16.mxu0 %v1702_v2  ;;  %690 = vmatprep.mubr.bf16.mxu1 %v1702_v2 }
  0x4a   :  { %558 = vmatmul.mubr.bf16.gmra.mrb[4].mxu0 %v1704_v3  ;;  %691 = vmatmul.mubr.bf16.gmra.mrb[4].mxu1 %v1704_v3 }
  0x4b   :  { %567 = vmatprep.mubr.bf16.mxu0 %v1705_v4  ;;  %700 = vmatprep.mubr.bf16.mxu1 %v1705_v4 }
  0x52   :  { %568 = vmatmul.mubr.bf16.gmra.mrb[8].mxu0 %v1707_v5  ;;  %701 = vmatmul.mubr.bf16.gmra.mrb[8].mxu1 %v1707_v5 }
  0x53   :  { %577 = vmatprep.mubr.bf16.mxu0 %v1708_v6  ;;  %710 = vmatprep.mubr.bf16.mxu1 %v1708_v6 }
  0x5a   :  { %578 = vmatmul.mubr.bf16.gmra.mrb[12].mxu0 %v1710_v7  ;;  %711 = vmatmul.mubr.bf16.gmra.mrb[12].mxu1 %v1710_v7 }
  0x5b   :  { %587 = vmatprep.mubr.bf16.mxu0 %v1711_v8  ;;  %720 = vmatprep.mubr.bf16.mxu1 %v1711_v8 }
  0x62   :  { %588 = vmatmul.mubr.bf16.gmra.mrb[16].mxu0 %v1713_v9  ;;  %721 = vmatmul.mubr.bf16.gmra.mrb[16].mxu1 %v1713_v9 }
  0x63   :  { %597 = vmatprep.mubr.bf16.mxu0 %v1714_v10  ;;  %730 = vmatprep.mubr.bf16.mxu1 %v1714_v10 }
  0x6a   :  { %598 = vmatmul.mubr.bf16.gmra.mrb[20].mxu0 %v1716_v11  ;;  %731 = vmatmul.mubr.bf16.gmra.mrb[20].mxu1 %v1716_v11 }
  0x6b   :  { %607 = vmatprep.mubr.bf16.mxu0 %v1717_v12  ;;  %740 = vmatprep.mubr.bf16.mxu1 %v1717_v12 }
  0x72   :  { %608 = vmatmul.mubr.bf16.gmra.mrb[24].mxu0 %v1719_v13  ;;  %741 = vmatmul.mubr.bf16.gmra.mrb[24].mxu1 %v1719_v13 }
  0x73   :  { %617 = vmatprep.mubr.bf16.mxu0 %v1720_v14  ;;  %750 = vmatprep.mubr.bf16.mxu1 %v1720_v14 }
  0x7a   :  { %618 = vmatmul.mubr.bf16.gmra.mrb[28].mxu0 %v1722_v15  ;;  %751 = vmatmul.mubr.bf16.gmra.mrb[28].mxu1 %v1722_v15 }
  0x7b   :  { %627 = vmatprep.mubr.bf16.mxu0 %v1723_v16  ;;  %760 = vmatprep.mubr.bf16.mxu1 %v1723_v16 }
  0x82   :  { %628 = vmatmul.mubr.bf16.gmra.mrb[32].mxu0 %v1725_v17  ;;  %761 = vmatmul.mubr.bf16.gmra.mrb[32].mxu1 %v1725_v17 }
  0x83   :  { %637 = vmatprep.mubr.bf16.mxu0 %v1726_v18  ;;  %770 = vmatprep.mubr.bf16.mxu1 %v1726_v18 }
  0x8a   :  { %638 = vmatmul.mubr.bf16.gmra.mrb[36].mxu0 %v1728_v19  ;;  %771 = vmatmul.mubr.bf16.gmra.mrb[36].mxu1 %v1728_v19 }
 0x115   :  { %v2236_v20 = vpop.f32.mrb[0].mxu0  ;;  %v2238_v21 = vpop.f32.mrb[0].mxu1 }
 0x116   :  { %v781_v22 = vmul.f32 %v2236_v20, %v2236_v20  ;;  %v801_v23 = vmul.f32 %v2238_v21, %v2238_v21  ;;  %v2244_v24 = vpop.f32.mrb[1].mxu0  ;;  %v2246_v25 = vpop.f32.mrb[1].mxu1 }
 0x117   :  { %v782_v26 = vmul.f32 %v2244_v24, %v2244_v24  ;;  %v802_v27 = vmul.f32 %v2246_v25, %v2246_v25  ;;  %v2252_v28 = vpop.f32.mrb[2].mxu0  ;;  %v2254_v29 = vpop.f32.mrb[2].mxu1 }
 0x118   :  { %v821_v30 = vadd.f32 %v801_v23, %v781_v22  ;;  %v783_v31 = vmul.f32 %v2252_v28, %v2252_v28  ;;  %v803_v32 = vmul.f32 %v2254_v29, %v2254_v29  ;;  %v2260_v33 = vpop.f32.mrb[3].mxu0  ;;  %v2262_v34 = vpop.f32.mrb[3].mxu1 }
 0x119   :  { %v822_v35 = vadd.f32 %v802_v27, %v782_v26  ;;  %v784_v36 = vmul.f32 %v2260_v33, %v2260_v33  ;;  %v804_v37 = vmul.f32 %v2262_v34, %v2262_v34 }
 0x11a   :  { %v901_v38 = vmax.f32 %v821_v30, 1e-24  ;;  %v823_v39 = vadd.f32 %v803_v32, %v783_v31 }
 0x11b   :  { %v902_v40 = vmax.f32 %v822_v35, 1e-24  ;;  %v824_v41 = vadd.f32 %v804_v37, %v784_v36 }
 0x11c   :  { %1729 = vlog2.f32 %v901_v38  ;;  %v903_v42 = vmax.f32 %v823_v39, 1e-24 }
 0x11d   :  { %1731 = vrsqrt.f32 %v901_v38  ;;  %v2268_v43 = vpop.f32.mrb[4].mxu0  ;;  %v2270_v44 = vpop.f32.mrb[4].mxu1  ;;  %v904_v45 = vmax.f32 %v824_v41, 1e-24 }
 0x11e   :  { %1733 = vlog2.f32 %v902_v40  ;;  %v785_v46 = vmul.f32 %v2268_v43, %v2268_v43  ;;  %v805_v47 = vmul.f32 %v2270_v44, %v2270_v44  ;;  %v2276_v48 = vpop.f32.mrb[5].mxu0  ;;  %v2278_v49 = vpop.f32.mrb[5].mxu1 }
 0x11f   :  { %1735 = vrsqrt.f32 %v902_v40  ;;  %v786_v50 = vmul.f32 %v2276_v48, %v2276_v48  ;;  %v806_v51 = vmul.f32 %v2278_v49, %v2278_v49  ;;  %v2284_v52 = vpop.f32.mrb[6].mxu0  ;;  %v2286_v53 = vpop.f32.mrb[6].mxu1 }
 0x120   :  { %1737 = vlog2.f32 %v903_v42  ;;  %v825_v54 = vadd.f32 %v805_v47, %v785_v46  ;;  %v787_v55 = vmul.f32 %v2284_v52, %v2284_v52  ;;  %v807_v56 = vmul.f32 %v2286_v53, %v2286_v53  ;;  %v2292_v57 = vpop.f32.mrb[7].mxu0  ;;  %v2294_v58 = vpop.f32.mrb[7].mxu1 }
 0x121   :  { %1739 = vrsqrt.f32 %v903_v42  ;;  %v826_v59 = vadd.f32 %v806_v51, %v786_v50  ;;  %v788_v60 = vmul.f32 %v2292_v57, %v2292_v57  ;;  %v808_v61 = vmul.f32 %v2294_v58, %v2294_v58 }
 0x122   :  { %1741 = vlog2.f32 %v904_v45  ;;  %v905_v62 = vmax.f32 %v825_v54, 1e-24  ;;  %v827_v63 = vadd.f32 %v807_v56, %v787_v55 }
 0x123   :  { %1743 = vrsqrt.f32 %v904_v45  ;;  %v906_v0 = vmax.f32 %v826_v59, 1e-24  ;;  %v828_v1 = vadd.f32 %v808_v61, %v788_v60 }
 0x124   :  { %1745 = vlog2.f32 %v905_v62  ;;  %v907_v2 = vmax.f32 %v827_v63, 1e-24 }
 0x125   :  { %1747 = vrsqrt.f32 %v905_v62  ;;  %v2300_v3 = vpop.f32.mrb[8].mxu0  ;;  %v2302_v4 = vpop.f32.mrb[8].mxu1  ;;  %v908_v6 = vmax.f32 %v828_v1, 1e-24 }
 0x126   :  { %v1730_v5 = vpop.eup %1729  ;;  %1749 = vlog2.f32 %v906_v0  ;;  %v789_v7 = vmul.f32 %v2300_v3, %v2300_v3  ;;  %v809_v8 = vmul.f32 %v2302_v4, %v2302_v4  ;;  %v2308_v9 = vpop.f32.mrb[9].mxu0 }
 0x127   :  { %v2310_v10 = vpop.f32.mrb[9].mxu1  ;;  %v2312_v11 = vpop.eup %1731  ;;  %v922_v12 = vmul.f32 0.6931472, %v1730_v5  ;;  %1751 = vrsqrt.f32 %v906_v0  ;;  %v790_v13 = vmul.f32 %v2308_v9, %v2308_v9 }
 0x128   :  { %v810_v14 = vmul.f32 %v2310_v10, %v2310_v10  ;;  %v2318_v15 = vpop.f32.mrb[10].mxu0  ;;  %v2320_v16 = vpop.f32.mrb[10].mxu1  ;;  %1753 = vlog2.f32 %v907_v2  ;;  %v829_v18 = vadd.f32 %v809_v8, %v789_v7 }
 0x129   :  { %v1734_v17 = vpop.eup %1733  ;;  %v791_v19 = vmul.f32 %v2318_v15, %v2318_v15  ;;  %v811_v22 = vmul.f32 %v2320_v16, %v2320_v16  ;;  %v2326_v23 = vpop.f32.mrb[11].mxu0  ;;  %v961_v30 = vmul.f32 0.15, %v922_v12  ;;  %1755 = vrsqrt.f32 %v907_v2 }
 0x12a   :  { %v2328_v26 = vpop.f32.mrb[11].mxu1  ;;  %v2330_v27 = vpop.eup %1735  ;;  %v924_v31 = vmul.f32 0.6931472, %v1734_v17  ;;  %v830_v32 = vadd.f32 %v810_v14, %v790_v13  ;;  %1757 = vlog2.f32 %v908_v6  ;;  %v909_v36 = vmax.f32 %v829_v18, 1e-24 }
 0x12b   :  { %v1738_v35 = vpop.eup %1737  ;;  %v2332_v37 = vadd.f32 %v811_v22, %v791_v19  ;;  %v792_v38 = vmul.f32 %v2326_v23, %v2326_v23  ;;  %v981_v40 = vmul.f32 1.442695, %v961_v30  ;;  %1759 = vrsqrt.f32 %v908_v6 }
 0x12c   :  { %v2336_v39 = vpop.eup %1739  ;;  %v962_v41 = vmul.f32 0.15, %v924_v31  ;;  %v926_v42 = vmul.f32 0.6931472, %v1738_v35  ;;  %1761 = vlog2.f32 %v909_v36  ;;  %v910_v46 = vmax.f32 %v830_v32, 1e-24 }
 0x12d   :  { %v1742_v45 = vpop.eup %1741  ;;  %v812_v47 = vmul.f32 %v2328_v26, %v2328_v26  ;;  %1763 = vpow2.f32 %v981_v40  ;;  %v911_v59 = vmax.f32 %v2332_v37, 1e-24  ;;  %v2345_v61 = vpop.f32.mrb[12].mxu0 }
 0x12e   :  { %v2340_v50 = vpop.eup %1743  ;;  %v983_v51 = vmul.f32 1.442695, %v962_v41  ;;  %v963_v54 = vmul.f32 0.15, %v926_v42  ;;  %v928_v55 = vmul.f32 0.6931472, %v1742_v45  ;;  %1765 = vrsqrt.f32 %v909_v36 }
 0x12f   :  { %v1746_v56 = vpop.eup %1745  ;;  %v2343_v60 = vadd.f32 %v812_v47, %v792_v38  ;;  %v2347_v62 = vpop.f32.mrb[12].mxu1  ;;  %v793_v7 = vmul.f32 %v2345_v61, %v2345_v61 }
 0x130   :  { %v2349_v63 = vpop.eup %1747  ;;  %1767 = vpow2.f32 %v983_v51  ;;  %v985_v0 = vmul.f32 1.442695, %v963_v54  ;;  %v964_v1 = vmul.f32 0.15, %v928_v55  ;;  %v930_v2 = vmul.f32 0.6931472, %v1746_v56 }
 0x131   :  { %v1750_v5 = vpop.eup %1749  ;;  %1769 = vlog2.f32 %v910_v46  ;;  %v3034_v6 = vmax.f32 %v2343_v60, 1e-24  ;;  %v813_v8 = vmul.f32 %v2347_v62, %v2347_v62  ;;  %v2356_v12 = vpop.f32.mrb[13].mxu0 }
 0x132   :  { %v2358_v13 = vpop.f32.mrb[13].mxu1  ;;  %v2360_v14 = vpop.eup %1751  ;;  %1771 = vpow2.f32 %v985_v0  ;;  %v987_v17 = vmul.f32 1.442695, %v964_v1  ;;  %v965_v18 = vmul.f32 0.15, %v930_v2  ;;  %v794_v31 = vmul.f32 %v2356_v12, %v2356_v12 }
 0x133   :  { %v932_v19 = vmul.f32 0.6931472, %v1750_v5  ;;  %v1754_v22 = vpop.eup %1753  ;;  %1773 = vrsqrt.f32 %v910_v46  ;;  %v2362_v30 = vadd.f32 %v813_v8, %v793_v7  ;;  %v814_v32 = vmul.f32 %v2358_v13, %v2358_v13  ;;  %v2368_v35 = vpop.f32.mrb[14].mxu0 }
 0x134   :  { %v2370_v36 = vpop.f32.mrb[14].mxu1  ;;  %v2372_v37 = vpop.eup %1755  ;;  %1775 = vpow2.f32 %v987_v17  ;;  %v989_v38 = vmul.f32 1.442695, %v965_v18  ;;  %v934_v41 = vmul.f32 0.6931472, %v1754_v22  ;;  %v795_v47 = vmul.f32 %v2368_v35, %v2368_v35 }
 0x135   :  { %v966_v40 = vmul.f32 0.15, %v932_v19  ;;  %v1758_v42 = vpop.eup %1757  ;;  %1777 = vlog2.f32 %v911_v59  ;;  %v2375_v46 = vadd.f32 %v814_v32, %v794_v31  ;;  %v2379_v51 = vpop.f32.mrb[15].mxu0  ;;  %v815_v7 = vmul.f32 %v2370_v36, %v2370_v36 }
 0x136   :  { %3068 = vst [vmem:[#allocation2_spill] sm:$0xff] %v2379_v51  ;;  %v2381_v54 = vpop.f32.mrb[15].mxu1  ;;  %v2383_v55 = vpop.eup %1759  ;;  %1779 = vpow2.f32 %v989_v38  ;;  %v967_v0 = vmul.f32 0.15, %v934_v41  ;;  %v936_v1 = vmul.f32 0.6931472, %v1758_v42  ;;  %v796_v8 = vmul.f32 %v2379_v51, %v2379_v51 }
 0x137   :  { %3069 = vst [vmem:[#allocation3_spill] sm:$0xff] %v2381_v54  ;;  %v991_v56 = vmul.f32 1.442695, %v966_v40  ;;  %v1762_v2 = vpop.eup %1761  ;;  %1781 = vrsqrt.f32 %v911_v59  ;;  %v2390_v17 = vpop.f32.mrb[16].mxu0  ;;  %v2402_v40 = vadd.f32 %v815_v7, %v795_v47  ;;  %v816_v41 = vmul.f32 %v2381_v54, %v2381_v54 }
 0x138   :  { %3070 = vst [vmem:[#allocation4_spill] sm:$0xff] %v2390_v17  ;;  %v2392_v18 = vpop.f32.mrb[16].mxu1  ;;  %v2394_v19 = vpop.eup %1763  ;;  %v993_v22 = vmul.f32 1.442695, %v967_v0  ;;  %v968_v31 = vmul.f32 0.15, %v936_v1 }
 0x139   :  { %3071 = vst [vmem:[#allocation5_spill] sm:$0xff] %v2394_v19  ;;  %1783 = vpow2.f32 %v991_v56  ;;  %v938_v32 = vmul.f32 0.6931472, %v1762_v2  ;;  %v2396_v38 = vpop.eup %1765  ;;  %v1229_v59 = vmul.f32 %v2394_v19, %v2312_v11  ;;  %v2406_v42 = vpop.f32.mrb[17].mxu0  ;;  %v797_v11 = vmul.f32 %v2390_v17, %v2390_v17 }
 0x13a   :  { %1785 = vlog2.f32 %v3034_v6  ;;  %v2408_v5 = vpop.f32.mrb[17].mxu1  ;;  %v2410_v56 = vpop.eup %1767  ;;  %v995_v0 = vmul.f32 1.442695, %v968_v31 }
 0x13b   :  { %1787 = vpow2.f32 %v993_v22  ;;  %v969_v1 = vmul.f32 0.15, %v938_v32  ;;  %v2414_v2 = vpop.f32.mrb[18].mxu0  ;;  %v2416_v45 = vpop.f32.mrb[18].mxu1  ;;  %v2419_v7 = vmul.f32 %v1229_v59, %v2236_v20  ;;  %v2422_v6 = vmul.f32 %v1229_v59, %v2238_v21 }
 0x13c   :  { %v1770_v47 = vpop.eup %1769  ;;  %v1230_v19 = vmul.f32 %v2410_v56, %v2330_v27  ;;  %v3073_v22 = vmax.f32 %v2343_v60, 1e-24  ;;  %v2428_v31 = vpop.f32.mrb[19].mxu0  ;;  %v915_v20 = vmax.f32 %v2402_v40, 1e-24  ;;  %v817_v40 = vmul.f32 %v2392_v18, %v2392_v18 }
 0x13d   :  { %3072 = vst [vmem:[#allocation6_spill] sm:$0xff] %v2419_v7  ;;  %v2430_v32 = vpop.f32.mrb[19].mxu1  ;;  %v2432_v17 = vpop.eup %1771  ;;  %v997_v54 = vmul.f32 1.442695, %v969_v1  ;;  %v940_v51 = vmul.f32 0.6931472, %v1770_v47  ;;  %v836_v1 = vadd.f32 %v816_v41, %v796_v8 }
 0x13e   :  { %1789 = vrsqrt.f32 %v3073_v22  ;;  %3074 = vst [vmem:[#allocation7_spill] sm:$0xff] %v2432_v17  ;;  %v2435_v7 = vpop.eup %1773  ;;  %v2438_v21 = vmul.f32 %v1230_v19, %v2244_v24  ;;  %v2441_v27 = vmul.f32 %v1230_v19, %v2246_v25  ;;  %v1231_v60 = vmul.f32 %v2432_v17, %v2336_v39  ;;  %v2451_v47 = vpop.f32.mrb[20].mxu0 }
 0x13f   :  { %1791 = vpow2.f32 %v995_v0  ;;  %v3077_v59 = vmax.f32 %v2362_v30, 1e-24  ;;  %v2447_v22 = vpop.eup %1775  ;;  %v970_v0 = vmul.f32 0.15, %v940_v51  ;;  %v2453_v24 = vpop.f32.mrb[20].mxu1 }
 0x140   :  { %3075 = vst [vmem:[#allocation8_spill] sm:$0xff] %v2438_v21  ;;  %3076 = vst [vmem:[#allocation9_spill] sm:$0xff] %v2441_v27  ;;  %v1778_v25 = vpop.eup %1777  ;;  %v2456_v19 = vmul.f32 %v1231_v60, %v2252_v28  ;;  %v2459_v39 = vmul.f32 %v1231_v60, %v2254_v29  ;;  %v3081_v51 = vmax.f32 %v2362_v30, 1e-24  ;;  %v2467_v8 = vpop.f32.mrb[21].mxu1 }
 0x141   :  { %1793 = vlog2.f32 %v3077_v59  ;;  %3078 = vst [vmem:[#allocation10_spill] sm:$0xff] %v2447_v22  ;;  %v1232_v59 = vmul.f32 %v2447_v22, %v2340_v50  ;;  %3083 = vst [vmem:[#allocation14_spill] sm:$0xff] %v2467_v8  ;;  %v2469_v41 = vpop.eup %1779  ;;  %v999_v27 = vmul.f32 1.442695, %v970_v0  ;;  %v942_v21 = vmul.f32 0.6931472, %v1778_v25 }
 0x142   :  { %1795 = vpow2.f32 %v997_v54  ;;  %3079 = vst [vmem:[#allocation11_spill] sm:$0xff] %v2456_v19  ;;  %3080 = vst [vmem:[#allocation12_spill] sm:$0xff] %v2459_v39  ;;  %v2465_v54 = vpop.f32.mrb[21].mxu0  ;;  %v3085_v28 = vmax.f32 %v2375_v46, 1e-24  ;;  %v2473_v29 = vpop.eup %1781  ;;  %v1233_v30 = vmul.f32 %v2469_v41, %v2349_v63  ;;  %v837_v39 = vadd.f32 %v817_v40, %v797_v11 }
 0x143   :  { %1797 = vrsqrt.f32 %v3081_v51  ;;  %3082 = vst [vmem:[#allocation13_spill] sm:$0xff] %v2465_v54  ;;  %3084 = vst [vmem:[#allocation15_spill] sm:$0xff] %v2469_v41  ;;  %v916_v19 = vmax.f32 %v836_v1, 1e-24  ;;  %v2476_v60 = vmul.f32 %v1232_v59, %v2260_v33  ;;  %v2479_v50 = vmul.f32 %v1232_v59, %v2262_v34  ;;  %v2485_v0 = vpop.f32.mrb[22].mxu0  ;;  %v2487_v25 = vpop.f32.mrb[22].mxu1 }
 0x144   :  { %1799 = vlog2.f32 %v3085_v28  ;;  %v3088_v51 = vmov %v3085_v28  ;;  %v2489_v28 = vpop.eup %1783  ;;  %v971_v1 = vmul.f32 0.15, %v942_v21  ;;  %v798_v33 = vmul.f32 %v2406_v42, %v2406_v42  ;;  %v2493_v34 = vpop.f32.mrb[23].mxu0 }
 0x145   :  { %3086 = vst [vmem:[#allocation16_spill] sm:$0xff] %v2476_v60  ;;  %3087 = vst [vmem:[#allocation17_spill] sm:$0xff] %v2479_v50  ;;  %1801 = vrsqrt.f32 %v3088_v51  ;;  %v2495_v59 = vpop.f32.mrb[23].mxu1  ;;  %v1786_v63 = vpop.eup %1785  ;;  %v2498_v46 = vmul.f32 %v1233_v30, %v2268_v43  ;;  %v2501_v51 = vmul.f32 %v1233_v30, %v2270_v44  ;;  %v1234_v50 = vmul.f32 %v2489_v28, %v2360_v14 }
 0x146   :  { %3089 = vst [vmem:[#allocation18_spill] sm:$0xff] %v2489_v28  ;;  %1803 = vpow2.f32 %v999_v27  ;;  %v2505_v21 = vpop.eup %1787  ;;  %v1001_v11 = vmul.f32 1.442695, %v971_v1  ;;  %v944_v27 = vmul.f32 0.6931472, %v1786_v63  ;;  %v2523_v1 = vpop.f32.mrb[24].mxu0 }
 0x147   :  { %3090 = vst [vmem:[#allocation19_spill] sm:$0xff] %v2498_v46  ;;  %3091 = vst [vmem:[#allocation20_spill] sm:$0xff] %v2501_v51  ;;  %1805 = vlog2.f32 %v915_v20  ;;  %v917_v40 = vmax.f32 %v837_v39, 1e-24  ;;  %v2510_v41 = vmul.f32 %v1234_v50, %v2276_v48  ;;  %v2513_v43 = vmul.f32 %v1234_v50, %v2278_v49  ;;  %v2525_v48 = vpop.f32.mrb[24].mxu1 }
 0x148   :  { %3092 = vst [vmem:[#allocation21_spill] sm:$0xff] %v2505_v21  ;;  %1807 = vrsqrt.f32 %v915_v20  ;;  %v2507_v60 = vpop.eup %1789  ;;  %v1235_v44 = vmul.f32 %v2505_v21, %v2372_v37  ;;  %v972_v30 = vmul.f32 0.15, %v944_v27  ;;  %v818_v20 = vmul.f32 %v2408_v5, %v2408_v5  ;;  %v2537_v27 = vpop.f32.mrb[25].mxu1 }
 0x149   :  { %3093 = vst [vmem:[#allocation22_spill] sm:$0xff] %v2510_v41  ;;  %3094 = vst [vmem:[#allocation23_spill] sm:$0xff] %v2513_v43  ;;  %1809 = vlog2.f32 %v916_v19  ;;  %v2517_v14 = vpop.eup %1791  ;;  %v799_v39 = vmul.f32 %v2414_v2, %v2414_v2 }
 0x14a   :  { %3095 = vst [vmem:[#allocation24_spill] sm:$0xff] %v2517_v14  ;;  %1811 = vpow2.f32 %v1001_v11  ;;  %v2528_v50 = vmul.f32 %v1235_v44, %v2284_v52  ;;  %v2531_v37 = vmul.f32 %v1235_v44, %v2286_v53  ;;  %v1236_v63 = vmul.f32 %v2517_v14, %v2383_v55  ;;  %v2535_v11 = vpop.f32.mrb[25].mxu0  ;;  %v2543_v52 = vpop.f32.mrb[26].mxu1 }
 0x14b   :  { %v1794_v49 = vpop.eup %1793  ;;  %1813 = vrsqrt.f32 %v916_v19  ;;  %v1003_v41 = vmul.f32 1.442695, %v972_v30  ;;  %v838_v51 = vadd.f32 %v818_v20, %v798_v33  ;;  %v2541_v46 = vpop.f32.mrb[26].mxu0 }
 0x14c   :  { %3096 = vst [vmem:[#allocation25_spill] sm:$0xff] %v2528_v50  ;;  %3097 = vst [vmem:[#allocation26_spill] sm:$0xff] %v2531_v37  ;;  %v2539_v43 = vpop.eup %1795  ;;  %v946_v21 = vmul.f32 0.6931472, %v1794_v49  ;;  %1815 = vlog2.f32 %v917_v40  ;;  %v2548_v44 = vmul.f32 %v1236_v63, %v2292_v57  ;;  %v2551_v55 = vmul.f32 %v1236_v63, %v2294_v58  ;;  %v2555_v30 = vpop.f32.mrb[27].mxu0 }
 0x14d   :  { %3098 = vst [vmem:[#allocation27_spill] sm:$0xff] %v2539_v43  ;;  %v2545_v53 = vpop.eup %1797  ;;  %v1237_v19 = vmul.f32 %v2539_v43, %v2396_v38  ;;  %1817 = vrsqrt.f32 %v917_v40  ;;  %v2557_v49 = vpop.f32.mrb[27].mxu1  ;;  %v918_v37 = vmax.f32 %v838_v51, 1e-24  ;;  %v819_v50 = vmul.f32 %v2416_v45, %v2416_v45 }
 0x14e   :  { %3099 = vst [vmem:[#allocation28_spill] sm:$0xff] %v2548_v44  ;;  %3100 = vst [vmem:[#allocation29_spill] sm:$0xff] %v2551_v55  ;;  %v1800_v33 = vpop.eup %1799  ;;  %1819 = vpow2.f32 %v1003_v41  ;;  %v973_v20 = vmul.f32 0.15, %v946_v21  ;;  %v800_v40 = vmul.f32 %v2428_v31, %v2428_v31  ;;  %v820_v21 = vmul.f32 %v2430_v32, %v2430_v32  ;;  %v2581_v44 = vpop.f32.mrb[28].mxu0 }
 0x14f   :  { %v2561_v57 = vpop.eup %1801  ;;  %v2564_v58 = vmul.f32 %v1237_v19, %v2300_v3  ;;  %v2567_v63 = vmul.f32 %v1237_v19, %v2302_v4  ;;  %v948_v38 = vmul.f32 0.6931472, %v1800_v33  ;;  %1821 = vlog2.f32 %v918_v37 }
 0x150   :  { %v2571_v43 = vpop.eup %1803  ;;  %v1005_v41 = vmul.f32 1.442695, %v973_v20  ;;  %v839_v51 = vadd.f32 %v819_v50, %v799_v39  ;;  %1823 = vrsqrt.f32 %v918_v37  ;;  %v841_v4 = vmul.f32 %v2451_v47, %v2451_v47  ;;  %v2583_v39 = vpop.f32.mrb[28].mxu1 }
 0x151   :  { %3101 = vst [vmem:[#allocation30_spill] sm:$0xff] %v2564_v58  ;;  %3102 = vst [vmem:[#allocation31_spill] sm:$0xff] %v2567_v63  ;;  %v1806_v55 = vpop.eup %1805  ;;  %v1238_v3 = vmul.f32 %v2571_v43, %v2435_v7  ;;  %v974_v58 = vmul.f32 0.15, %v948_v38  ;;  %v840_v20 = vadd.f32 %v820_v21, %v800_v40  ;;  %v861_v38 = vmul.f32 %v2453_v24, %v2453_v24 }
 0x152   :  { %3103 = vst [vmem:[#allocation32_spill] sm:$0xff] %v2571_v43  ;;  %v2579_v19 = vpop.eup %1807  ;;  %1825 = vpow2.f32 %v1005_v41  ;;  %v950_v33 = vmul.f32 0.6931472, %v1806_v55  ;;  %v919_v63 = vmax.f32 %v839_v51, 1e-24  ;;  %v2593_v43 = vpop.f32.mrb[29].mxu0 }
 0x153   :  { %v1810_v50 = vpop.eup %1809  ;;  %v2586_v14 = vmul.f32 %v1238_v3, %v2308_v9  ;;  %v2589_v7 = vmul.f32 %v1238_v3, %v2310_v10  ;;  %v1007_v37 = vmul.f32 1.442695, %v974_v58  ;;  %v2595_v55 = vpop.f32.mrb[29].mxu1  ;;  %v920_v21 = vmax.f32 %v840_v20, 1e-24 }
 0x154   :  { %v2597_v40 = vpop.eup %1811  ;;  %v975_v41 = vmul.f32 0.15, %v950_v33  ;;  %v952_v51 = vmul.f32 0.6931472, %v1810_v50  ;;  %1827 = vlog2.f32 %v919_v63  ;;  %v881_v10 = vadd.f32 %v861_v38, %v841_v4  ;;  %v2605_v3 = vpop.f32.mrb[30].mxu0 }
 0x155   :  { %3104 = vst [vmem:[#allocation33_spill] sm:$0xff] %v2586_v14  ;;  %3105 = vst [vmem:[#allocation34_spill] sm:$0xff] %v2589_v7  ;;  %v2599_v28 = vpop.eup %1813  ;;  %v1239_v9 = vmul.f32 %v2597_v40, %v2473_v29  ;;  %1829 = vpow2.f32 %v1007_v37  ;;  %v842_v58 = vmul.f32 %v2465_v54, %v2465_v54  ;;  %v2607_v7 = vpop.f32.mrb[30].mxu1  ;;  %v862_v20 = vmul.f32 %v2467_v8, %v2467_v8 }
 0x156   :  { %3106 = vst [vmem:[#allocation35_spill] sm:$0xff] %v2597_v40  ;;  %v1816_v14 = vpop.eup %1815  ;;  %v1009_v22 = vmul.f32 1.442695, %v975_v41  ;;  %v976_v33 = vmul.f32 0.15, %v952_v51  ;;  %1831 = vrsqrt.f32 %v919_v63  ;;  %v2611_v50 = vpop.f32.mrb[31].mxu0 }
 0x157   :  { %v2613_v17 = vpop.f32.mrb[31].mxu1  ;;  %v2615_v29 = vpop.eup %1817  ;;  %v2618_v4 = vmul.f32 %v1239_v9, %v2318_v15  ;;  %v2621_v37 = vmul.f32 %v1239_v9, %v2320_v16  ;;  %v954_v38 = vmul.f32 0.6931472, %v1816_v14  ;;  %1833 = vlog2.f32 %v920_v21 }
 0x158   :  { %v2623_v41 = vpop.eup %1819  ;;  %1835 = vpow2.f32 %v1009_v22  ;;  %v1011_v63 = vmul.f32 1.442695, %v976_v33  ;;  %v1021_v51 = vmax.f32 %v881_v10, 1e-24  ;;  %v882_v40 = vadd.f32 %v862_v20, %v842_v58  ;;  %v2633_v9 = vpop.f32.mrb[32].mxu0 }
 0x159   :  { %3107 = vst [vmem:[#allocation36_spill] sm:$0xff] %v2618_v4  ;;  %3108 = vst [vmem:[#allocation37_spill] sm:$0xff] %v2621_v37  ;;  %v1240_v8 = vmul.f32 %v2623_v41, %v2507_v60  ;;  %v977_v54 = vmul.f32 0.15, %v954_v38  ;;  %1837 = vrsqrt.f32 %v920_v21  ;;  %v843_v15 = vmul.f32 %v2485_v0, %v2485_v0  ;;  %v1822_v4 = vpop.eup %1821  ;;  %v2635_v10 = vpop.f32.mrb[32].mxu1 }
 0x15a   :  { %3109 = vst [vmem:[#allocation38_spill] sm:$0xff] %v2623_v41  ;;  %1839 = vpow2.f32 %v1011_v63  ;;  %v1022_v16 = vmax.f32 %v882_v40, 1e-24  ;;  %v863_v14 = vmul.f32 %v2487_v25, %v2487_v25  ;;  %v844_v22 = vmul.f32 %v2493_v34, %v2493_v34  ;;  %3110 = vst [vmem:[#allocation39_spill] sm:$0xff] %v2633_v9  ;;  %v2637_v58 = vpop.eup %1823  ;;  %v2645_v20 = vpop.f32.mrb[33].mxu0 }
 0x15b   :  { %3111 = vst [vmem:[#allocation40_spill] sm:$0xff] %v2635_v10  ;;  %v2640_v60 = vmul.f32 %v1240_v8, %v2326_v23  ;;  %v2643_v21 = vmul.f32 %v1240_v8, %v2328_v26  ;;  %v1013_v33 = vmul.f32 1.442695, %v977_v54  ;;  %v956_v40 = vmul.f32 0.6931472, %v1822_v4  ;;  %3114 = vst [vmem:[#allocation43_spill] sm:$0xff] %v2645_v20 }
 0x15c   :  { %v2647_v38 = vpop.f32.mrb[33].mxu1  ;;  %v2649_v63 = vpop.eup %1825  ;;  %1841 = vlog2.f32 %v1021_v51  ;;  %v883_v41 = vadd.f32 %v863_v14, %v843_v15  ;;  %v864_v37 = vmul.f32 %v2495_v59, %v2495_v59  ;;  %v845_v23 = vmul.f32 %v2523_v1, %v2523_v1 }
 0x15d   :  { %3112 = vst [vmem:[#allocation41_spill] sm:$0xff] %v2640_v60  ;;  %3113 = vst [vmem:[#allocation42_spill] sm:$0xff] %v2643_v21  ;;  %v2655_v60 = vpop.f32.mrb[34].mxu0  ;;  %v2657_v26 = vpop.f32.mrb[34].mxu1  ;;  %v1241_v54 = vmul.f32 %v2649_v63, %v2545_v53  ;;  %1843 = vpow2.f32 %v1013_v33  ;;  %v978_v8 = vmul.f32 0.15, %v956_v40  ;;  %v865_v4 = vmul.f32 %v2525_v48, %v2525_v48 }
 0x15e   :  { %3115 = vst [vmem:[#allocation44_spill] sm:$0xff] %v2647_v38  ;;  %3116 = vst [vmem:[#allocation45_spill] sm:$0xff] %v2649_v63  ;;  %v2663_v21 = vpop.f32.mrb[35].mxu0  ;;  %v2665_v15 = vpop.f32.mrb[35].mxu1  ;;  %1845 = vrsqrt.f32 %v1021_v51  ;;  %v1023_v38 = vmax.f32 %v883_v41, 1e-24  ;;  %v884_v20 = vadd.f32 %v864_v37, %v844_v22 }
 0x15f   :  { %3117 = vst [vmem:[#allocation46_spill] sm:$0xff] %v2655_v60  ;;  %3118 = vst [vmem:[#allocation47_spill] sm:$0xff] %v2657_v26  ;;  %v1828_v14 = vpop.eup %1827  ;;  %v846_v60 = vmul.f32 %v2535_v11, %v2535_v11  ;;  %v2672_v53 = vmul.f32 %v1241_v54, %v2345_v61  ;;  %v2675_v33 = vmul.f32 %v1241_v54, %v2347_v62  ;;  %v1015_v40 = vmul.f32 1.442695, %v978_v8 }
 0x160   :  { %3119 = vst [vmem:[#allocation48_spill] sm:$0xff] %v2663_v21  ;;  %3120 = vst [vmem:[#allocation49_spill] sm:$0xff] %v2665_v15  ;;  %v2669_v26 = vpop.eup %1829  ;;  %v958_v63 = vmul.f32 0.6931472, %v1828_v14  ;;  %1847 = vlog2.f32 %v1022_v16  ;;  %v1024_v37 = vmax.f32 %v884_v20, 1e-24  ;;  %v885_v41 = vadd.f32 %v865_v4, %v845_v23 }
 0x161   :  { %3121 = vst [vmem:[#allocation50_spill] sm:$0xff] %v2669_v26  ;;  %3122 = vst [vmem:[#allocation51_spill] sm:$0xff] %v2672_v53  ;;  %v2677_v21 = vpop.eup %1831  ;;  %v1242_v51 = vmul.f32 %v2669_v26, %v2561_v57  ;;  %1849 = vpow2.f32 %v1015_v40  ;;  %v866_v61 = vmul.f32 %v2537_v27, %v2537_v27  ;;  %v847_v62 = vmul.f32 %v2541_v46, %v2541_v46  ;;  %v2693_v20 = vpop.f32.mrb[36].mxu0 }
 0x162   :  { %3123 = vst [vmem:[#allocation52_spill] sm:$0xff] %v2675_v33  ;;  %v1834_v22 = vpop.eup %1833  ;;  %v979_v15 = vmul.f32 0.15, %v958_v63  ;;  %1851 = vrsqrt.f32 %v1022_v16  ;;  %v2695_v23 = vpop.f32.mrb[36].mxu1  ;;  %v1025_v33 = vmax.f32 %v885_v41, 1e-24 }
 0x163   :  { %v2685_v54 = vpop.eup %1835  ;;  %v2688_v8 = vmul.f32 %v1242_v51, %v2356_v12  ;;  %v2691_v14 = vmul.f32 %v1242_v51, %v2358_v13  ;;  %v960_v57 = vmul.f32 0.6931472, %v1834_v22  ;;  %1853 = vlog2.f32 %v1023_v38  ;;  %v2701_v53 = vpop.f32.mrb[37].mxu0 }
 0x164   :  { %3124 = vst [vmem:[#allocation53_spill] sm:$0xff] %v2685_v54  ;;  %v2697_v63 = vpop.eup %1837  ;;  %v1243_v4 = vmul.f32 %v2685_v54, %v2579_v19  ;;  %v1017_v40 = vmul.f32 1.442695, %v979_v15  ;;  %v2703_v12 = vpop.f32.mrb[37].mxu1  ;;  %1855 = vrsqrt.f32 %v1023_v38  ;;  %v886_v16 = vadd.f32 %v866_v61, %v846_v60 }
 0x165   :  { %3125 = vst [vmem:[#allocation54_spill] sm:$0xff] %v2688_v8  ;;  %3126 = vst [vmem:[#allocation55_spill] sm:$0xff] %v2691_v14  ;;  %v2705_v13 = vpop.eup %1839  ;;  %v980_v51 = vmul.f32 0.15, %v960_v57  ;;  %v867_v22 = vmul.f32 %v2543_v52, %v2543_v52  ;;  %v2709_v14 = vpop.f32.mrb[38].mxu0 }
 0x166   :  { %3127 = vst [vmem:[#allocation56_spill] sm:$0xff] %v2705_v13  ;;  %v2711_v8 = vpop.f32.mrb[38].mxu1  ;;  %v2714_v19 = vmul.f32 %v1243_v4, %v2368_v35  ;;  %v2717_v15 = vmul.f32 %v1243_v4, %v2370_v36  ;;  %v1244_v41 = vmul.f32 %v2705_v13, %v2599_v28  ;;  %1857 = vpow2.f32 %v1017_v40  ;;  %v2721_v57 = vpop.f32.mrb[39].mxu0  ;;  %v3132_v35 = vld [vmem:[#allocation2_spill] sm:$0xff]  ;;  %v3134_v36 = vld [vmem:[#allocation3_spill] sm:$0xff] }
 0x167   :  { %3128 = vst [vmem:[#allocation57_spill] sm:$0xff] %v2711_v8  ;;  %v2723_v60 = vpop.f32.mrb[39].mxu1  ;;  %v1842_v38 = vpop.eup %1841  ;;  %v1019_v61 = vmul.f32 1.442695, %v980_v51  ;;  %1859 = vlog2.f32 %v1024_v37  ;;  %v1026_v54 = vmax.f32 %v886_v16, 1e-24  ;;  %v887_v26 = vadd.f32 %v867_v22, %v847_v62 }
 0x168   :  { %3129 = vst [vmem:[#allocation58_spill] sm:$0xff] %v2714_v19  ;;  %3130 = vst [vmem:[#allocation59_spill] sm:$0xff] %v2717_v15  ;;  %v2725_v8 = vpop.eup %1843  ;;  %v2728_v19 = vmul.f32 %v1244_v41, %v3132_v35  ;;  %v2731_v4 = vmul.f32 %v1244_v41, %v3134_v36  ;;  %v1042_v15 = vmul.f32 0.6931472, %v1842_v38  ;;  %1861 = vrsqrt.f32 %v1024_v37  ;;  %v3136_v37 = vld [vmem:[#allocation4_spill] sm:$0xff] }
 0x169   :  { %3131 = vst [vmem:[#allocation60_spill] sm:$0xff] %v2725_v8  ;;  %v2733_v28 = vpop.eup %1845  ;;  %v1245_v40 = vmul.f32 %v2725_v8, %v2615_v29  ;;  %1863 = vpow2.f32 %v1019_v61  ;;  %v1027_v51 = vmax.f32 %v887_v26, 1e-24  ;;  %v848_v62 = vmul.f32 %v2555_v30, %v2555_v30 }
 0x16a   :  { %3133 = vst [vmem:[#allocation2_spill] sm:$0xff] %v2728_v19  ;;  %3135 = vst [vmem:[#allocation3_spill] sm:$0xff] %v2731_v4  ;;  %v1081_v16 = vmul.f32 0.15, %v1042_v15  ;;  %1865 = vlog2.f32 %v1025_v33  ;;  %v868_v22 = vmul.f32 %v2557_v49, %v2557_v49  ;;  %v849_v41 = vmul.f32 %v2581_v44, %v2581_v44  ;;  %v1848_v38 = vpop.eup %1847  ;;  %v3152_v19 = vld [vmem:[#allocation14_spill] sm:$0xff] }
 0x16b   :  { %v2744_v35 = vmul.f32 %v1245_v40, %v3136_v37  ;;  %v2747_v36 = vmul.f32 %v1245_v40, %v2392_v18  ;;  %1867 = vrsqrt.f32 %v1025_v33  ;;  %v869_v29 = vmul.f32 %v2583_v39, %v2583_v39  ;;  %v2751_v26 = vpop.eup %1849 }
 0x16c   :  { %3139 = vst [vmem:[#allocation62_spill] sm:$0xff] %v2751_v26  ;;  %v1101_v15 = vmul.f32 1.442695, %v1081_v16  ;;  %v1044_v61 = vmul.f32 0.6931472, %v1848_v38  ;;  %1869 = vlog2.f32 %v1026_v54  ;;  %v888_v8 = vadd.f32 %v868_v22, %v848_v62  ;;  %v2753_v13 = vpop.eup %1851 }
 0x16d   :  { %3137 = vst [vmem:[#allocation4_spill] sm:$0xff] %v2744_v35  ;;  %3138 = vst [vmem:[#allocation61_spill] sm:$0xff] %v2747_v36  ;;  %v1246_v4 = vmul.f32 %v2751_v26, %v2637_v58  ;;  %1871 = vrsqrt.f32 %v1026_v54  ;;  %v889_v37 = vadd.f32 %v869_v29, %v849_v41  ;;  %v850_v18 = vmul.f32 %v2593_v43, %v2593_v43  ;;  %v1854_v33 = vpop.eup %1853 }
 0x16e   :  { %1873 = vpow2.f32 %v1101_v15  ;;  %v1082_v40 = vmul.f32 0.15, %v1044_v61  ;;  %v1028_v36 = vmax.f32 %v888_v8, 1e-24  ;;  %v870_v16 = vmul.f32 %v2595_v55, %v2595_v55  ;;  %v2761_v38 = vpop.eup %1855 }
 0x16f   :  { %v2764_v62 = vmul.f32 %v1246_v4, %v2406_v42  ;;  %v2767_v22 = vmul.f32 %v1246_v4, %v2408_v5  ;;  %v1046_v58 = vmul.f32 0.6931472, %v1854_v33  ;;  %1875 = vlog2.f32 %v1027_v51 }
 0x170   :  { %v2769_v54 = vpop.eup %1857  ;;  %v1103_v41 = vmul.f32 1.442695, %v1082_v40  ;;  %1877 = vrsqrt.f32 %v1027_v51  ;;  %v1029_v29 = vmax.f32 %v889_v37, 1e-24  ;;  %v890_v15 = vadd.f32 %v870_v16, %v850_v18 }
 0x171   :  { %3140 = vst [vmem:[#allocation63_spill] sm:$0xff] %v2764_v62  ;;  %3141 = vst [vmem:[#allocation64_spill] sm:$0xff] %v2767_v22  ;;  %v1860_v8 = vpop.eup %1859  ;;  %v1247_v61 = vmul.f32 %v2769_v54, %v2677_v21  ;;  %v1083_v26 = vmul.f32 0.15, %v1046_v58  ;;  %1879 = vlog2.f32 %v1028_v36  ;;  %v851_v42 = vmul.f32 %v2605_v3, %v2605_v3 }
 0x172   :  { %3142 = vst [vmem:[#allocation65_spill] sm:$0xff] %v2769_v54  ;;  %v2775_v62 = vpop.eup %1861  ;;  %1881 = vpow2.f32 %v1103_v41  ;;  %v1048_v5 = vmul.f32 0.6931472, %v1860_v8  ;;  %v1030_v4 = vmax.f32 %v890_v15, 1e-24  ;;  %v871_v33 = vmul.f32 %v2607_v7, %v2607_v7 }
 0x173   :  { %v2779_v51 = vpop.eup %1863  ;;  %v2782_v37 = vmul.f32 %v1247_v61, %v2414_v2  ;;  %v2785_v21 = vmul.f32 %v1247_v61, %v2416_v45  ;;  %v1105_v18 = vmul.f32 1.442695, %v1083_v26  ;;  %1883 = vrsqrt.f32 %v1028_v36 }
 0x174   :  { %3143 = vst [vmem:[#allocation66_spill] sm:$0xff] %v2779_v51  ;;  %v1866_v40 = vpop.eup %1865  ;;  %v1248_v16 = vmul.f32 %v2779_v51, %v2697_v63  ;;  %v1084_v58 = vmul.f32 0.15, %v1048_v5  ;;  %1885 = vlog2.f32 %v1029_v29  ;;  %v2789_v41 = vadd.f32 %v871_v33, %v851_v42 }
 0x175   :  { %3144 = vst [vmem:[#allocation67_spill] sm:$0xff] %v2782_v37  ;;  %3145 = vst [vmem:[#allocation68_spill] sm:$0xff] %v2785_v21  ;;  %v2791_v15 = vpop.eup %1867  ;;  %1887 = vpow2.f32 %v1105_v18  ;;  %v1050_v8 = vmul.f32 0.6931472, %v1866_v40  ;;  %v852_v2 = vmul.f32 %v2611_v50, %v2611_v50  ;;  %v872_v45 = vmul.f32 %v2613_v17, %v2613_v17 }
 0x176   :  { %v1870_v26 = vpop.eup %1869  ;;  %v2798_v36 = vmul.f32 %v1248_v16, %v2428_v31  ;;  %v2801_v63 = vmul.f32 %v1248_v16, %v2430_v32  ;;  %v1107_v61 = vmul.f32 1.442695, %v1084_v58  ;;  %1889 = vrsqrt.f32 %v1029_v29  ;;  %v3148_v58 = vld [vmem:[#allocation5_spill] sm:$0xff] }
 0x177   :  { %v2803_v42 = vpop.eup %1871  ;;  %v1085_v5 = vmul.f32 0.15, %v1050_v8  ;;  %v1052_v33 = vmul.f32 0.6931472, %v1870_v26  ;;  %1891 = vlog2.f32 %v1030_v4  ;;  %v2806_v51 = vadd.f32 %v872_v45, %v852_v2 }
 0x178   :  { %3146 = vst [vmem:[#allocation69_spill] sm:$0xff] %v2798_v36  ;;  %3147 = vst [vmem:[#allocation70_spill] sm:$0xff] %v2801_v63  ;;  %v1874_v40 = vpop.eup %1873  ;;  %1893 = vpow2.f32 %v1107_v61  ;;  %v853_v31 = vmul.f32 %v2633_v9, %v2633_v9  ;;  %v873_v32 = vmul.f32 %v2635_v10, %v2635_v10 }
 0x179   :  { %v1876_v16 = vpop.eup %1875  ;;  %v1141_v29 = vsub.f32 %v3148_v58, %v1874_v40  ;;  %v1269_v36 = vmul.f32 %v1874_v40, %v2733_v28  ;;  %v1109_v8 = vmul.f32 1.442695, %v1085_v5  ;;  %v1086_v26 = vmul.f32 0.15, %v1052_v33  ;;  %v3150_v33 = vld [vmem:[#allocation6_spill] sm:$0xff] }
 0x17a   :  { %v2814_v63 = vpop.eup %1877  ;;  %v1054_v18 = vmul.f32 0.6931472, %v1876_v16  ;;  %1895 = vrsqrt.f32 %v1030_v4  ;;  %v2816_v61 = vadd.f32 %v873_v32, %v853_v31  ;;  %v3149_v28 = vmax.f32 %v2789_v41, 1e-24 }
 0x17b   :  { %v1880_v2 = vpop.eup %1879  ;;  %v1161_v45 = vmul.f32 %v1141_v29, %v1141_v29  ;;  %v1309_v21 = vmul.f32 %v1269_v36, %v2451_v47  ;;  %v1369_v37 = vmul.f32 %v1269_v36, %v2453_v24  ;;  %1897 = vpow2.f32 %v1109_v8 }
 0x17c   :  { %v1882_v54 = vpop.eup %1881  ;;  %v1111_v22 = vmul.f32 1.442695, %v1086_v26  ;;  %v1087_v58 = vmul.f32 0.15, %v1054_v18  ;;  %v1056_v35 = vmul.f32 0.6931472, %v1880_v2  ;;  %1899 = vlog2.f32 %v3149_v28 }
 0x17d   :  { %v2822_v5 = vpop.eup %1883  ;;  %v1329_v4 = vsub.f32 %v3150_v33, %v1309_v21  ;;  %v1389_v40 = vsub.f32 %v2422_v6, %v1369_v37  ;;  %v1142_v31 = vsub.f32 %v2410_v56, %v1882_v54  ;;  %v1270_v47 = vmul.f32 %v1882_v54, %v2753_v13  ;;  %v3151_v26 = vld [vmem:[#allocation13_spill] sm:$0xff]  ;;  %v3153_v33 = vld [vmem:[#allocation7_spill] sm:$0xff] }
 0x17e   :  { %v1886_v32 = vpop.eup %1885  ;;  %1901 = vpow2.f32 %v1111_v22  ;;  %v1113_v24 = vmul.f32 1.442695, %v1087_v58  ;;  %v1088_v36 = vmul.f32 0.15, %v1056_v35  ;;  %v3154_v35 = vld [vmem:[#allocation8_spill] sm:$0xff] }
 0x17f   :  { %v1888_v16 = vpop.eup %1887  ;;  %v1409_v18 = vmul.f32 %v1329_v4, %v1329_v4  ;;  %v1429_v29 = vmul.f32 %v1389_v40, %v1389_v40  ;;  %v1162_v8 = vmul.f32 %v1142_v31, %v1142_v31  ;;  %v1310_v2 = vmul.f32 %v1270_v47, %v3151_v26  ;;  %v3155_v40 = vld [vmem:[#allocation9_spill] sm:$0xff] }
 0x180   :  { %v2829_v28 = vpop.eup %1889  ;;  %v1370_v21 = vmul.f32 %v1270_v47, %v3152_v19  ;;  %v1143_v6 = vsub.f32 %v3153_v33, %v1888_v16  ;;  %v1271_v56 = vmul.f32 %v1888_v16, %v2761_v38  ;;  %1903 = vpow2.f32 %v1113_v24  ;;  %v3156_v33 = vld [vmem:[#allocation10_spill] sm:$0xff] }
 0x181   :  { %v2834_v13 = vpop.eup %1891  ;;  %v1449_v22 = vadd.f32 %v1429_v29, %v1409_v18  ;;  %v1181_v54 = vadd.f32 %v1162_v8, %v1161_v45  ;;  %v1330_v37 = vsub.f32 %v3154_v35, %v1310_v2  ;;  %v1115_v58 = vmul.f32 1.442695, %v1088_v36  ;;  %v3157_v18 = vld [vmem:[#allocation11_spill] sm:$0xff]  ;;  %v3158_v29 = vld [vmem:[#allocation12_spill] sm:$0xff] }
 0x182   :  { %v1894_v4 = vpop.eup %1893  ;;  %v1390_v31 = vsub.f32 %v3155_v40, %v1370_v21  ;;  %v1163_v26 = vmul.f32 %v1143_v6, %v1143_v6  ;;  %v1311_v10 = vmul.f32 %v1271_v56, %v2485_v0  ;;  %v1371_v19 = vmul.f32 %v1271_v56, %v2487_v25 }
 0x183   :  { %v1410_v47 = vmul.f32 %v1330_v37, %v1330_v37  ;;  %v1144_v9 = vsub.f32 %v3156_v33, %v1894_v4  ;;  %v1272_v38 = vmul.f32 %v1894_v4, %v2775_v62  ;;  %1905 = vpow2.f32 %v1115_v58  ;;  %v3159_v58 = vld [vmem:[#allocation15_spill] sm:$0xff] }
 0x184   :  { %v2842_v24 = vpop.eup %1895  ;;  %v1430_v45 = vmul.f32 %v1390_v31, %v1390_v31  ;;  %v1182_v16 = vadd.f32 %v1181_v54, %v1163_v26  ;;  %v1331_v36 = vsub.f32 %v3157_v18, %v1311_v10  ;;  %v1391_v8 = vsub.f32 %v3158_v29, %v1371_v19  ;;  %v3160_v31 = vld [vmem:[#allocation16_spill] sm:$0xff]  ;;  %v3161_v26 = vld [vmem:[#allocation17_spill] sm:$0xff] }
 0x185   :  { %v1898_v2 = vpop.eup %1897  ;;  %v1164_v21 = vmul.f32 %v1144_v9, %v1144_v9  ;;  %v1312_v0 = vmul.f32 %v1272_v38, %v2493_v34  ;;  %v1372_v25 = vmul.f32 %v1272_v38, %v2495_v59  ;;  %v1058_v6 = vmul.f32 0.6931472, %v1886_v32 }
 0x186   :  { %v1900_v56 = vpop.eup %1899  ;;  %v1450_v35 = vadd.f32 %v1430_v45, %v1410_v47  ;;  %v1411_v37 = vmul.f32 %v1331_v36, %v1331_v36  ;;  %v1431_v62 = vmul.f32 %v1391_v8, %v1391_v8  ;;  %v1145_v4 = vsub.f32 %v3159_v58, %v1898_v2  ;;  %v3162_v8 = vld [vmem:[#allocation18_spill] sm:$0xff] }
 0x187   :  { %v1183_v40 = vadd.f32 %v1182_v16, %v1164_v21  ;;  %v1332_v54 = vsub.f32 %v3160_v31, %v1312_v0  ;;  %v1392_v10 = vsub.f32 %v3161_v26, %v1372_v25  ;;  %v1273_v19 = vmul.f32 %v1898_v2, %v2791_v15  ;;  %v3163_v15 = vld [vmem:[#allocation19_spill] sm:$0xff] }
 0x188   :  { %v1902_v33 = vpop.eup %1901  ;;  %v1469_v9 = vadd.f32 %v1450_v35, %v1449_v22  ;;  %v1451_v18 = vadd.f32 %v1431_v62, %v1411_v37  ;;  %v1165_v34 = vmul.f32 %v1145_v4, %v1145_v4  ;;  %v1089_v29 = vmul.f32 0.15, %v1058_v6  ;;  %v3164_v22 = vld [vmem:[#allocation20_spill] sm:$0xff]  ;;  %v3165_v37 = vld [vmem:[#allocation21_spill] sm:$0xff] }
 0x189   :  { %v1412_v59 = vmul.f32 %v1332_v54, %v1332_v54  ;;  %v1432_v32 = vmul.f32 %v1392_v10, %v1392_v10  ;;  %v1313_v47 = vmul.f32 %v1273_v19, %v2523_v1  ;;  %v1373_v38 = vmul.f32 %v1273_v19, %v2525_v48  ;;  %v3166_v10 = vld [vmem:[#allocation22_spill] sm:$0xff] }
 0x18a   :  { %v1904_v45 = vpop.eup %1903  ;;  %v1470_v36 = vadd.f32 %v1469_v9, %v1451_v18  ;;  %v1184_v16 = vadd.f32 %v1183_v40, %v1165_v34  ;;  %v1146_v21 = vsub.f32 %v3162_v8, %v1902_v33  ;;  %v1274_v0 = vmul.f32 %v1902_v33, %v2803_v42  ;;  %v3167_v33 = vld [vmem:[#allocation23_spill] sm:$0xff]  ;;  %v3170_v8 = vld [vmem:[#allocation26_spill] sm:$0xff] }
 0x18b   :  { %v1452_v25 = vadd.f32 %v1432_v32, %v1412_v59  ;;  %v1333_v2 = vsub.f32 %v3163_v15, %v1313_v47  ;;  %v1393_v35 = vsub.f32 %v3164_v22, %v1373_v38  ;;  %v1147_v6 = vsub.f32 %v3165_v37, %v1904_v45 }
 0x18c   :  { %v1166_v62 = vmul.f32 %v1146_v21, %v1146_v21  ;;  %v1314_v58 = vmul.f32 %v1274_v0, %v2535_v11  ;;  %v1374_v1 = vmul.f32 %v1274_v0, %v2537_v27  ;;  %v1275_v48 = vmul.f32 %v1904_v45, %v2814_v63  ;;  %v3168_v11 = vld [vmem:[#allocation24_spill] sm:$0xff]  ;;  %v3169_v45 = vld [vmem:[#allocation25_spill] sm:$0xff] }
 0x18d   :  { %v1906_v4 = vpop.eup %1905  ;;  %v1471_v40 = vadd.f32 %v1470_v36, %v1452_v25  ;;  %v1413_v31 = vmul.f32 %v1333_v2, %v1333_v2  ;;  %v1433_v54 = vmul.f32 %v1393_v35, %v1393_v35  ;;  %v1167_v26 = vmul.f32 %v1147_v6, %v1147_v6 }
 0x18e   :  { %v1185_v42 = vadd.f32 %v1184_v16, %v1166_v62  ;;  %v1334_v19 = vsub.f32 %v3166_v10, %v1314_v58  ;;  %v1394_v9 = vsub.f32 %v3167_v33, %v1374_v1  ;;  %v1315_v18 = vmul.f32 %v1275_v48, %v2541_v46  ;;  %v3172_v58 = vld [vmem:[#allocation29_spill] sm:$0xff] }
 0x18f   :  { %v1453_v34 = vadd.f32 %v1433_v54, %v1413_v31  ;;  %v1375_v59 = vmul.f32 %v1275_v48, %v2543_v52  ;;  %v2867_v32 = vsub.f32 %v3168_v11, %v1906_v4  ;;  %v1276_v27 = vmul.f32 %v1906_v4, %v2822_v5  ;;  %v3171_v5 = vld [vmem:[#allocation28_spill] sm:$0xff]  ;;  %v3173_v48 = vld [vmem:[#allocation43_spill] sm:$0xff] }
 0x190   :  { %v1414_v63 = vmul.f32 %v1334_v19, %v1334_v19  ;;  %v1434_v47 = vmul.f32 %v1394_v9, %v1394_v9  ;;  %v2870_v38 = vadd.f32 %v1185_v42, %v1167_v26  ;;  %v1335_v36 = vsub.f32 %v3169_v45, %v1315_v18  ;;  %v3175_v42 = vld [vmem:[#allocation46_spill] sm:$0xff] }
 0x191   :  { %v1472_v16 = vadd.f32 %v1471_v40, %v1453_v34  ;;  %v1395_v21 = vsub.f32 %v3170_v8, %v1375_v59  ;;  %v1316_v0 = vmul.f32 %v1276_v27, %v2555_v30  ;;  %v1032_v46 = vmax.f32 %v2806_v51, 1e-24  ;;  %v3177_v34 = vld [vmem:[#allocation47_spill] sm:$0xff] }
 0x192   :  { %v1454_v25 = vadd.f32 %v1434_v47, %v1414_v63  ;;  %v1415_v52 = vmul.f32 %v1335_v36, %v1335_v36  ;;  %v1376_v15 = vmul.f32 %v1276_v27, %v2557_v49  ;;  %v1117_v2 = vmul.f32 1.442695, %v1089_v29  ;;  %v3174_v29 = vld [vmem:[#allocation44_spill] sm:$0xff]  ;;  %v3179_v27 = vld [vmem:[#allocation49_spill] sm:$0xff] }
 0x193   :  { %v1435_v22 = vmul.f32 %v1395_v21, %v1395_v21  ;;  %v1336_v35 = vsub.f32 %v3171_v5, %v1316_v0  ;;  %v1060_v37 = vmul.f32 0.6931472, %v2834_v13  ;;  %v1062_v6 = vmul.f32 0.6931472, %v1900_v56 }
 0x194   :  { %v1473_v62 = vadd.f32 %v1472_v16, %v1454_v25  ;;  %v1396_v1 = vsub.f32 %v3172_v58, %v1376_v15  ;;  %1907 = vpow2.f32 %v1117_v2  ;;  %v854_v30 = vmul.f32 %v3173_v48, %v3173_v48 }
 0x195   :  { %v1455_v4 = vadd.f32 %v1435_v22, %v1415_v52  ;;  %v1416_v51 = vmul.f32 %v1336_v35, %v1336_v35  ;;  %v1090_v40 = vmul.f32 0.15, %v1060_v37  ;;  %v1091_v31 = vmul.f32 0.15, %v1062_v6  ;;  %v3180_v22 = vld [vmem:[#allocation57_spill] sm:$0xff] }
 0x196   :  { %v1436_v54 = vmul.f32 %v1396_v1, %v1396_v1  ;;  %v1033_v49 = vmax.f32 %v2816_v61, 1e-24  ;;  %v874_v26 = vmul.f32 %v3174_v29, %v3174_v29  ;;  %v855_v13 = vmul.f32 %v3175_v42, %v3175_v42  ;;  %v3178_v61 = vld [vmem:[#allocation48_spill] sm:$0xff] }
 0x197   :  { %v1474_v56 = vadd.f32 %v1473_v62, %v1455_v4  ;;  %v1119_v10 = vmul.f32 1.442695, %v1090_v40  ;;  %v1121_v19 = vmul.f32 1.442695, %v1091_v31  ;;  %1909 = vlog2.f32 %v1032_v46  ;;  %v3181_v62 = vld [vmem:[#allocation27_spill] sm:$0xff] }
 0x198   :  { %v1456_v33 = vadd.f32 %v1436_v54, %v1416_v51  ;;  %v3176_v9 = vmax.f32 %v2789_v41, 1e-24  ;;  %v894_v18 = vadd.f32 %v874_v26, %v854_v30  ;;  %v875_v59 = vmul.f32 %v3177_v34, %v3177_v34 }
 0x199   :  { %v856_v11 = vmul.f32 %v3178_v61, %v3178_v61  ;;  %v876_v63 = vmul.f32 %v3179_v27, %v3179_v27  ;;  %v857_v47 = vmul.f32 %v2693_v20, %v2693_v20  ;;  %v877_v8 = vmul.f32 %v2695_v23, %v2695_v23 }
 0x19a   :  { %1911 = vrsqrt.f32 %v3176_v9  ;;  %v2897_v45 = vadd.f32 %v1474_v56, %v1456_v33  ;;  %v1034_v36 = vmax.f32 %v894_v18, 1e-24  ;;  %v895_v41 = vadd.f32 %v875_v59, %v855_v13  ;;  %v3183_v33 = vld [vmem:[#allocation31_spill] sm:$0xff] }
 0x19b   :  { %1913 = vpow2.f32 %v1119_v10  ;;  %v896_v16 = vadd.f32 %v876_v63, %v856_v11  ;;  %v858_v21 = vmul.f32 %v2701_v53, %v2701_v53  ;;  %v878_v25 = vmul.f32 %v2703_v12, %v2703_v12 }
 0x19c   :  { %1915 = vpow2.f32 %v1121_v19  ;;  %v1035_v0 = vmax.f32 %v895_v41, 1e-24  ;;  %v859_v52 = vmul.f32 %v2709_v14, %v2709_v14  ;;  %v2907_v2 = vadd.f32 %v877_v8, %v857_v47 }
 0x19d   :  { %1917 = vlog2.f32 %v1033_v49  ;;  %v1036_v15 = vmax.f32 %v896_v16, 1e-24  ;;  %v879_v5 = vmul.f32 %v3180_v22, %v3180_v22  ;;  %v2911_v37 = vadd.f32 %v878_v25, %v858_v21 }
 0x19e   :  { %1919 = vrsqrt.f32 %v1032_v46  ;;  %v1908_v35 = vpop.eup %1907  ;;  %v860_v46 = vmul.f32 %v2721_v57, %v2721_v57  ;;  %v880_v6 = vmul.f32 %v2723_v60, %v2723_v60  ;;  %v1037_v30 = vmax.f32 %v2907_v2, 1e-24 }
 0x19f   :  { %1921 = vlog2.f32 %v1034_v36  ;;  %v1149_v58 = vsub.f32 %v3181_v62, %v1908_v35  ;;  %v1277_v1 = vmul.f32 %v1908_v35, %v2829_v28  ;;  %v1168_v4 = vmul.f32 %v2867_v32, %v2867_v32  ;;  %v3182_v32 = vld [vmem:[#allocation30_spill] sm:$0xff] }
 0x1a0   :  { %1923 = vrsqrt.f32 %v1033_v49  ;;  %v2922_v51 = vadd.f32 %v879_v5, %v859_v52  ;;  %v2924_v40 = vadd.f32 %v880_v6, %v860_v46  ;;  %v1038_v26 = vmax.f32 %v2911_v37, 1e-24  ;;  %v3185_v6 = vld [vmem:[#allocation33_spill] sm:$0xff] }
 0x1a1   :  { %1925 = vlog2.f32 %v1035_v0  ;;  %v1910_v31 = vpop.eup %1909  ;;  %v1317_v54 = vmul.f32 %v1277_v1, %v2581_v44  ;;  %v1377_v49 = vmul.f32 %v1277_v1, %v2583_v39  ;;  %v2929_v13 = vmul.f32 %v1149_v58, %v1149_v58  ;;  %v3184_v39 = vld [vmem:[#allocation32_spill] sm:$0xff]  ;;  %v3186_v58 = vld [vmem:[#allocation34_spill] sm:$0xff] }
 0x1a2   :  { %1927 = vrsqrt.f32 %v1034_v36  ;;  %v1064_v56 = vmul.f32 0.6931472, %v1910_v31  ;;  %v1187_v44 = vadd.f32 %v2870_v38, %v1168_v4  ;;  %v1039_v35 = vmax.f32 %v2922_v51, 1e-24  ;;  %v3187_v31 = vld [vmem:[#allocation36_spill] sm:$0xff] }
 0x1a3   :  { %1929 = vlog2.f32 %v1036_v15  ;;  %v1337_v19 = vsub.f32 %v3182_v32, %v1317_v54  ;;  %v1397_v9 = vsub.f32 %v3183_v33, %v1377_v49  ;;  %v3188_v49 = vld [vmem:[#allocation37_spill] sm:$0xff] }
 0x1a4   :  { %v1912_v28 = vpop.eup %1911  ;;  %1931 = vrsqrt.f32 %v1035_v0  ;;  %v1092_v63 = vmul.f32 0.15, %v1064_v56 }
 0x1a5   :  { %v1914_v10 = vpop.eup %1913  ;;  %1933 = vlog2.f32 %v1037_v30  ;;  %v1417_v36 = vmul.f32 %v1337_v19, %v1337_v19  ;;  %v1437_v41 = vmul.f32 %v1397_v9, %v1397_v9 }
 0x1a6   :  { %v1916_v18 = vpop.eup %1915  ;;  %v1150_v59 = vsub.f32 %v3184_v39, %v1914_v10  ;;  %v1278_v11 = vmul.f32 %v1914_v10, %v2842_v24  ;;  %1935 = vrsqrt.f32 %v1036_v15  ;;  %v1123_v38 = vmul.f32 1.442695, %v1092_v63 }
 0x1a7   :  { %v1918_v47 = vpop.eup %1917  ;;  %v1279_v16 = vmul.f32 %v1916_v18, %v1912_v28  ;;  %1937 = vlog2.f32 %v1038_v26  ;;  %v1457_v5 = vadd.f32 %v1437_v41, %v1417_v36 }
 0x1a8   :  { %v1920_v8 = vpop.eup %1919  ;;  %v1318_v21 = vmul.f32 %v1278_v11, %v2593_v43  ;;  %v1378_v0 = vmul.f32 %v1278_v11, %v2595_v55  ;;  %v1066_v25 = vmul.f32 0.6931472, %v1918_v47  ;;  %1939 = vpow2.f32 %v1123_v38  ;;  %v3189_v38 = vld [vmem:[#allocation35_spill] sm:$0xff] }
 0x1a9   :  { %v1922_v52 = vpop.eup %1921  ;;  %v1319_v24 = vmul.f32 %v1279_v16, %v2605_v3  ;;  %v1379_v15 = vmul.f32 %v1279_v16, %v2607_v7  ;;  %v1476_v55 = vadd.f32 %v2897_v45, %v1457_v5  ;;  %1941 = vlog2.f32 %v1039_v35 }
 0x1aa   :  { %v2945_v46 = vpop.eup %1923  ;;  %v1338_v62 = vsub.f32 %v3185_v6, %v1318_v21  ;;  %v1398_v1 = vsub.f32 %v3186_v58, %v1378_v0  ;;  %v1093_v43 = vmul.f32 0.15, %v1066_v25  ;;  %v1068_v3 = vmul.f32 0.6931472, %v1922_v52 }
 0x1ab   :  { %v1926_v4 = vpop.eup %1925  ;;  %v1339_v54 = vsub.f32 %v3187_v31, %v1319_v24  ;;  %v1399_v28 = vsub.f32 %v3188_v49, %v1379_v15  ;;  %v1040_v0 = vmax.f32 %v2924_v40, 1e-24  ;;  %v1151_v25 = vsub.f32 %v3189_v38, %v1916_v18 }
 0x1ac   :  { %v2952_v56 = vpop.eup %1927  ;;  %v1418_v7 = vmul.f32 %v1338_v62, %v1338_v62  ;;  %v1438_v10 = vmul.f32 %v1398_v1, %v1398_v1  ;;  %v1125_v32 = vmul.f32 1.442695, %v1093_v43  ;;  %v1070_v19 = vmul.f32 0.6931472, %v1926_v4 }
 0x1ad   :  { %v1930_v33 = vpop.eup %1929  ;;  %v1419_v9 = vmul.f32 %v1339_v54, %v1339_v54  ;;  %v1439_v39 = vmul.f32 %v1399_v28, %v1399_v28  ;;  %v1094_v11 = vmul.f32 0.15, %v1068_v3  ;;  %v1170_v58 = vmul.f32 %v1150_v59, %v1150_v59 }
 0x1ae   :  { %v2956_v63 = vpop.eup %1931  ;;  %v1458_v45 = vadd.f32 %v1438_v10, %v1418_v7  ;;  %1943 = vpow2.f32 %v1125_v32  ;;  %v1095_v47 = vmul.f32 0.15, %v1070_v19  ;;  %v1072_v36 = vmul.f32 0.6931472, %v1930_v33  ;;  %v3190_v7 = vld [vmem:[#allocation38_spill] sm:$0xff] }
 0x1af   :  { %v1934_v41 = vpop.eup %1933  ;;  %v1459_v16 = vadd.f32 %v1439_v39, %v1419_v9  ;;  %v1127_v21 = vmul.f32 1.442695, %v1094_v11  ;;  %v1188_v1 = vadd.f32 %v1187_v44, %v2929_v13  ;;  %v1171_v28 = vmul.f32 %v1151_v25, %v1151_v25  ;;  %v3192_v39 = vld [vmem:[#allocation42_spill] sm:$0xff] }
 0x1b0   :  { %v2960_v52 = vpop.eup %1935  ;;  %v1477_v5 = vadd.f32 %v1476_v55, %v1458_v45  ;;  %v1129_v24 = vmul.f32 1.442695, %v1095_v47  ;;  %v1096_v15 = vmul.f32 0.15, %v1072_v36  ;;  %v1074_v6 = vmul.f32 0.6931472, %v1934_v41 }
 0x1b1   :  { %v1938_v62 = vpop.eup %1937  ;;  %1945 = vpow2.f32 %v1127_v21  ;;  %v1189_v40 = vadd.f32 %v1188_v1, %v1170_v58  ;;  %v3198_v1 = vld [vmem:[#allocation52_spill] sm:$0xff] }
 0x1b2   :  { %v1478_v43 = vadd.f32 %v1477_v5, %v1459_v16  ;;  %1947 = vpow2.f32 %v1129_v24  ;;  %v1131_v4 = vmul.f32 1.442695, %v1096_v15  ;;  %v1097_v31 = vmul.f32 0.15, %v1074_v6  ;;  %v1940_v49 = vpop.eup %1939  ;;  %v3194_v16 = vld [vmem:[#allocation39_spill] sm:$0xff]  ;;  %v3196_v24 = vld [vmem:[#allocation50_spill] sm:$0xff] }
 0x1b3   :  { %v1076_v54 = vmul.f32 0.6931472, %v1938_v62  ;;  %1949 = vlog2.f32 %v1040_v0  ;;  %v1280_v55 = vmul.f32 %v1940_v49, %v1920_v8  ;;  %v1152_v59 = vsub.f32 %v3190_v7, %v1940_v49  ;;  %v1942_v44 = vpop.eup %1941  ;;  %v3197_v62 = vld [vmem:[#allocation51_spill] sm:$0xff] }
 0x1b4   :  { %1951 = vpow2.f32 %v1131_v4  ;;  %v1133_v18 = vmul.f32 1.442695, %v1097_v31  ;;  %v1190_v13 = vadd.f32 %v1189_v40, %v1171_v28  ;;  %v1078_v9 = vmul.f32 0.6931472, %v1942_v44 }
 0x1b5   :  { %1953 = vrsqrt.f32 %v1037_v30  ;;  %v1098_v3 = vmul.f32 0.15, %v1076_v54  ;;  %v1320_v10 = vmul.f32 %v1280_v55, %v2611_v50  ;;  %v1380_v32 = vmul.f32 %v1280_v55, %v2613_v17  ;;  %v3191_v30 = vld [vmem:[#allocation41_spill] sm:$0xff] }
 0x1b6   :  { %1955 = vpow2.f32 %v1133_v18  ;;  %v1172_v2 = vmul.f32 %v1152_v59, %v1152_v59  ;;  %v1099_v50 = vmul.f32 0.15, %v1078_v9  ;;  %v3193_v17 = vld [vmem:[#allocation45_spill] sm:$0xff] }
 0x1b7   :  { %v1135_v19 = vmul.f32 1.442695, %v1098_v3  ;;  %1957 = vrsqrt.f32 %v1038_v26  ;;  %v1340_v8 = vsub.f32 %v3191_v30, %v1320_v10  ;;  %v1400_v11 = vsub.f32 %v3192_v39, %v1380_v32  ;;  %v3200_v10 = vld [vmem:[#allocation55_spill] sm:$0xff] }
 0x1b8   :  { %v1944_v33 = vpop.eup %1943  ;;  %1959 = vrsqrt.f32 %v1039_v35  ;;  %v2976_v36 = vadd.f32 %v1190_v13, %v1172_v2  ;;  %v3195_v35 = vld [vmem:[#allocation40_spill] sm:$0xff]  ;;  %v1137_v5 = vmul.f32 1.442695, %v1099_v50  ;;  %v3199_v13 = vld [vmem:[#allocation54_spill] sm:$0xff] }
 0x1b9   :  { %v1281_v45 = vmul.f32 %v1944_v33, %v2945_v46  ;;  %1961 = vpow2.f32 %v1135_v19  ;;  %v1153_v47 = vsub.f32 %v3193_v17, %v1944_v33  ;;  %v1420_v26 = vmul.f32 %v1340_v8, %v1340_v8 }
 0x1ba   :  { %1963 = vrsqrt.f32 %v1040_v0  ;;  %v1440_v41 = vmul.f32 %v1400_v11, %v1400_v11  ;;  %v3202_v11 = vld [vmem:[#allocation59_spill] sm:$0xff] }
 0x1bb   :  { %v1946_v37 = vpop.eup %1945  ;;  %v1321_v51 = vmul.f32 %v1281_v45, %v3194_v16  ;;  %v1381_v21 = vmul.f32 %v1281_v45, %v3195_v35  ;;  %v2984_v15 = vmul.f32 %v1153_v47, %v1153_v47  ;;  %1965 = vpow2.f32 %v1137_v5  ;;  %v3203_v16 = vld [vmem:[#allocation2_spill] sm:$0xff]  ;;  %v3205_v5 = vld [vmem:[#allocation4_spill] sm:$0xff] }
 0x1bc   :  { %v1948_v38 = vpop.eup %1947  ;;  %v1282_v25 = vmul.f32 %v1946_v37, %v2952_v56  ;;  %v2982_v46 = vsub.f32 %v3196_v24, %v1946_v37  ;;  %v1460_v6 = vadd.f32 %v1440_v41, %v1420_v26 }
 0x1bd   :  { %v1950_v0 = vpop.eup %1949  ;;  %v1341_v58 = vsub.f32 %v3197_v62, %v1321_v51  ;;  %v1401_v4 = vsub.f32 %v3198_v1, %v1381_v21  ;;  %v1283_v31 = vmul.f32 %v1948_v38, %v2956_v63  ;;  %v3204_v21 = vld [vmem:[#allocation3_spill] sm:$0xff]  ;;  %v3206_v1 = vld [vmem:[#allocation61_spill] sm:$0xff] }
 0x1be   :  { %v1952_v54 = vpop.eup %1951  ;;  %v1322_v40 = vmul.f32 %v1282_v25, %v3173_v48  ;;  %v1382_v49 = vmul.f32 %v1282_v25, %v3174_v29  ;;  %v1080_v56 = vmul.f32 0.6931472, %v1950_v0  ;;  %v1479_v28 = vadd.f32 %v1478_v43, %v1460_v6  ;;  %v3201_v29 = vld [vmem:[#allocation58_spill] sm:$0xff] }
 0x1bf   :  { %v1954_v18 = vpop.eup %1953  ;;  %v1421_v55 = vmul.f32 %v1341_v58, %v1341_v58  ;;  %v1441_v3 = vmul.f32 %v1401_v4, %v1401_v4  ;;  %v1323_v7 = vmul.f32 %v1283_v31, %v3175_v42  ;;  %v1383_v63 = vmul.f32 %v1283_v31, %v3177_v34 }
 0x1c0   :  { %v1956_v59 = vpop.eup %1955  ;;  %v1342_v44 = vsub.f32 %v3199_v13, %v1322_v40  ;;  %v1402_v32 = vsub.f32 %v3200_v10, %v1382_v49  ;;  %v1284_v19 = vmul.f32 %v1952_v54, %v2960_v52  ;;  %v1100_v30 = vmul.f32 0.15, %v1080_v56  ;;  %v3209_v13 = vld [vmem:[#allocation64_spill] sm:$0xff] }
 0x1c1   :  { %v1958_v48 = vpop.eup %1957  ;;  %v1461_v33 = vadd.f32 %v1441_v3, %v1421_v55  ;;  %v1343_v9 = vsub.f32 %v3201_v29, %v1323_v7  ;;  %v1285_v2 = vmul.f32 %v1956_v59, %v1954_v18  ;;  %v1403_v42 = vsub.f32 %v3202_v11, %v1383_v63  ;;  %v3207_v18 = vld [vmem:[#allocation53_spill] sm:$0xff]  ;;  %v3208_v3 = vld [vmem:[#allocation63_spill] sm:$0xff]  ;;  %v3210_v63 = vld [vmem:[#allocation56_spill] sm:$0xff] }
 0x1c2   :  { %v1960_v43 = vpop.eup %1959  ;;  %v1422_v8 = vmul.f32 %v1342_v44, %v1342_v44  ;;  %v1442_v39 = vmul.f32 %v1402_v32, %v1402_v32  ;;  %v1324_v45 = vmul.f32 %v1284_v19, %v3178_v61  ;;  %v1384_v34 = vmul.f32 %v1284_v19, %v3179_v27 }
 0x1c3   :  { %v1962_v50 = vpop.eup %1961  ;;  %v1480_v17 = vadd.f32 %v1479_v28, %v1461_v33  ;;  %v1423_v47 = vmul.f32 %v1343_v9, %v1343_v9  ;;  %v1325_v52 = vmul.f32 %v1285_v2, %v2693_v20  ;;  %v1443_v41 = vmul.f32 %v1403_v42, %v1403_v42  ;;  %v3214_v42 = vld [vmem:[#allocation67_spill] sm:$0xff] }
 0x1c4   :  { %v1964_v37 = vpop.eup %1963  ;;  %v1462_v26 = vadd.f32 %v1442_v39, %v1422_v8  ;;  %v1344_v51 = vsub.f32 %v3203_v16, %v1324_v45  ;;  %v1385_v35 = vmul.f32 %v1285_v2, %v2695_v23  ;;  %v1404_v25 = vsub.f32 %v3204_v21, %v1384_v34  ;;  %v3213_v8 = vld [vmem:[#allocation65_spill] sm:$0xff]  ;;  %v3216_v21 = vld [vmem:[#allocation66_spill] sm:$0xff] }
 0x1c5   :  { %v1345_v24 = vsub.f32 %v3205_v5, %v1325_v52  ;;  %v1286_v0 = vmul.f32 %v1962_v50, %v1958_v48  ;;  %v1139_v61 = vmul.f32 1.442695, %v1100_v30  ;;  %v1463_v62 = vadd.f32 %v1443_v41, %v1423_v47  ;;  %v1966_v49 = vpop.eup %1965  ;;  %v3211_v48 = vld [vmem:[#allocation60_spill] sm:$0xff] }
 0x1c6   :  { %v1481_v6 = vadd.f32 %v1480_v17, %v1462_v26  ;;  %v1424_v58 = vmul.f32 %v1344_v51, %v1344_v51  ;;  %v1405_v27 = vsub.f32 %v3206_v1, %v1385_v35  ;;  %v1444_v4 = vmul.f32 %v1404_v25, %v1404_v25 }
 0x1c7   :  { %v1425_v20 = vmul.f32 %v1345_v24, %v1345_v24  ;;  %v1326_v31 = vmul.f32 %v1286_v0, %v2701_v53  ;;  %v1386_v40 = vmul.f32 %v1286_v0, %v2703_v12  ;;  %1967 = vpow2.f32 %v1139_v61  ;;  %v3212_v53 = vld [vmem:[#allocation62_spill] sm:$0xff] }
 0x1c8   :  { %v1482_v56 = vadd.f32 %v1481_v6, %v1463_v62  ;;  %v1445_v23 = vmul.f32 %v1405_v27, %v1405_v27  ;;  %v1155_v28 = vsub.f32 %v3207_v18, %v1948_v38  ;;  %v1464_v55 = vadd.f32 %v1444_v4, %v1424_v58  ;;  %v3217_v6 = vld [vmem:[#allocation70_spill] sm:$0xff]  ;;  %v3218_v58 = vld [vmem:[#allocation69_spill] sm:$0xff] }
 0x1c9   :  { %v1346_v7 = vsub.f32 %v3208_v3, %v1326_v31  ;;  %v1406_v44 = vsub.f32 %v3209_v13, %v1386_v40  ;;  %v1287_v10 = vmul.f32 %v1966_v49, %v1960_v43  ;;  %v1156_v19 = vsub.f32 %v3210_v63, %v1952_v54  ;;  %v3215_v54 = vld [vmem:[#allocation68_spill] sm:$0xff] }
 0x1ca   :  { %v1465_v32 = vadd.f32 %v1445_v23, %v1425_v20  ;;  %v1157_v33 = vsub.f32 %v3211_v48, %v1956_v59  ;;  %v1158_v29 = vsub.f32 %v3212_v53, %v1962_v50  ;;  %v1483_v12 = vadd.f32 %v1482_v56, %v1464_v55 }
 0x1cb   :  { %v1426_v9 = vmul.f32 %v1346_v7, %v1346_v7  ;;  %v1446_v2 = vmul.f32 %v1406_v44, %v1406_v44  ;;  %v1327_v30 = vmul.f32 %v1287_v10, %v2709_v14  ;;  %v1387_v38 = vmul.f32 %v1287_v10, %v3180_v22 }
 0x1cc   :  { %v1159_v39 = vsub.f32 %v3213_v8, %v1966_v49  ;;  %v1174_v11 = vmul.f32 %v2982_v46, %v2982_v46  ;;  %v1192_v59 = vadd.f32 %v2976_v36, %v2984_v15  ;;  %v1484_v47 = vadd.f32 %v1483_v12, %v1465_v32 }
 0x1cd   :  { %v1466_v43 = vadd.f32 %v1446_v2, %v1426_v9  ;;  %v1347_v45 = vsub.f32 %v3214_v42, %v1327_v30  ;;  %v1407_v17 = vsub.f32 %v3215_v54, %v1387_v38  ;;  %v1175_v52 = vmul.f32 %v1155_v28, %v1155_v28 }
 0x1ce   :  { %v1193_v14 = vadd.f32 %v1192_v59, %v1174_v11  ;;  %v1176_v41 = vmul.f32 %v1156_v19, %v1156_v19  ;;  %v1177_v16 = vmul.f32 %v1157_v33, %v1157_v33  ;;  %v1178_v5 = vmul.f32 %v1158_v29, %v1158_v29 }
 0x1cf   :  { %v1427_v50 = vmul.f32 %v1347_v45, %v1347_v45  ;;  %v1447_v34 = vmul.f32 %v1407_v17, %v1407_v17  ;;  %v1485_v26 = vadd.f32 %v1484_v47, %v1466_v43  ;;  %v1179_v27 = vmul.f32 %v1159_v39, %v1159_v39 }
 0x1d0   :  { %v1194_v51 = vadd.f32 %v1193_v14, %v1175_v52  ;;  %v1497_v33 = vlaneseq }
 0x1d1   :  { %v1968_v22 = vpop.eup %1967  ;;  %v1467_v35 = vadd.f32 %v1447_v34, %v1427_v50 }
 0x1d2   :  { %v1288_v46 = vmul.f32 %v1968_v22, %v1964_v37  ;;  %v1160_v25 = vsub.f32 %v3216_v21, %v1968_v22  ;;  %v1195_v24 = vadd.f32 %v1194_v51, %v1176_v41  ;;  %v1498_v53 = vshrl.u32 %v1497_v33, 7 }
 0x1d3   :  { %v1486_v0 = vadd.f32 %v1485_v26, %v1467_v35  ;;  %v1500_v29 = vand.u32 127, %v1497_v33 }
 0x1d4   :  { %v1328_v61 = vmul.f32 %v1288_v46, %v2721_v57  ;;  %v1388_v36 = vmul.f32 %v1288_v46, %v2723_v60  ;;  %v1196_v15 = vadd.f32 %v1195_v24, %v1177_v16  ;;  %v1180_v40 = vmul.f32 %v1160_v25, %v1160_v25 }
 0x1d5   :  { %vm1501_vm0 = vcmp.eq.s32.totalorder %v1498_v53, 0  ;;  %vm1504_vm1 = vcmp.eq.s32.totalorder %v1500_v29, 1  ;;  %vm1502_vm2 = vcmp.eq.s32.totalorder %v1500_v29, 0 }
 0x1d6   :  { %v1408_v62 = vsub.f32 %v3217_v6, %v1388_v36  ;;  %v1348_v1 = vsub.f32 %v3218_v58, %v1328_v61  ;;  %v1197_v4 = vadd.f32 %v1196_v15, %v1178_v5  ;;  %vm1505_vm3 = vmand %vm1501_vm0, %vm1504_vm1 }
 0x1d7   :  { %vm1503_vm4 = vmand %vm1501_vm0, %vm1502_vm2 }
 0x1d8   :  { %v1448_v20 = vmul.f32 %v1408_v62, %v1408_v62  ;;  %v1428_v31 = vmul.f32 %v1348_v1, %v1348_v1  ;;  %v1198_v37 = vadd.f32 %v1197_v4, %v1179_v27 }
 0x1da   :  { %v1468_v49 = vadd.f32 %v1448_v20, %v1428_v31  ;;  %v1199_v56 = vadd.f32 %v1198_v37, %v1180_v40 }
 0x1dc   :  { %v1487_v23 = vadd.f32 %v1486_v0, %v1468_v49  ;;  %1200 = vadd.xlane.f32.xlu0 %v1199_v56 }
 0x1e0   :  { %1488 = vadd.xlane.f32.xlu0 %v1487_v23 }
 0x269   :  { %v1201_v18 = vpop.xlane.xlu0 %1200 }
 0x26a   :  { %v1202_v57 = vrot.slane %v1201_v18, 4 }
 0x26c   :  { %v1203_v28 = vadd.f32 %v1202_v57, %v1201_v18 }
 0x26d   :  { %v1489_v60 = vpop.xlane.xlu0 %1488 }
 0x26e   :  { %v1204_v55 = vrot.slane %v1203_v28, 2  ;;  %v1490_v3 = vrot.slane %v1489_v60, 4 }
 0x270   :  { %v1491_v7 = vadd.f32 %v1490_v3, %v1489_v60  ;;  %v1205_v13 = vadd.f32 %v1204_v55, %v1203_v28 }
 0x272   :  { %v1492_v44 = vrot.slane %v1491_v7, 2  ;;  %v1206_v10 = vrot.slane %v1205_v13, 1 }
 0x274   :  { %v1493_v32 = vadd.f32 %v1492_v44, %v1491_v7  ;;  %v1207_v63 = vadd.f32 %v1206_v10, %v1205_v13 }
 0x276   :  { %1599 = vpush %v1207_v63  ;;  %v1494_v19 = vrot.slane %v1493_v32, 1 }
 0x278   :  { %v1495_v48 = vadd.f32 %v1494_v19, %v1493_v32 }
 0x27a   :  { %1601 = vpush %v1495_v48 }
 0x2a7   :  { %s1600_s0 = spop %1599 }
 0x2a8   :  { %v1508_v9 = vstv %s1600_s0 }
 0x2ab   :  { %s1602_s7 = spop %1601 }
 0x2ac   :  { %v1506_v12 = vstv %s1602_s7 }
 0x2ad   :  { %v1507_v2 = vsel %vm1505_vm3, %v1506_v12, 0.0 }
 0x2ae   :  { %v1509_v30 = vsel %vm1503_vm4, %v1508_v9, %v1507_v2 }
 0x2af   :  { %1510 = vst [vmem:[%s3033_s2] sm:$0xff] %v1509_v30 }

// kernel: _lambda_.3
= control target key start
LH: loop header
LB: loop body
LE: loop exit
PB: predicated region body
PF: predicated region fallthrough
CT: control target
= control target key end

     0   :  { %s5000_s1 = inlined_call_operand.vmem [shape: bf16[512,768], index: 1, kind: input, shape index: {}]   ;;  %s5001_s0 = inlined_call_operand.vmem [shape: bf16[1,96,512], index: 0, kind: input, shape index: {}]   ;;  %s5002_s2 = inlined_call_operand.vmem [shape: f32[8,128], index: 2, kind: output, shape index: {}]  }
   0x1   :  { %v2821_v0 = vld [vmem:[%s5000_s1 + $0x4] ss:$24 sps:$4 sm:$0xff]   ;;  %v2825_v2 = vld [vmem:[%s5000_s1] ss:$24 sps:$4 sm:$0xff]   ;;  %v2827_v4 = vld [vmem:[%s5000_s1 + $0x34] ss:$24 sps:$4 sm:$0xff]  }
   0x2   :  { %v2823_v1 = vld [vmem:[%s5000_s1 + $0x304] ss:$24 sps:$4 sm:$0xff]   ;;  %1307 = vmatprep.subr.bf16.mxu1 %v2821_v0  ;;  %v2826_v3 = vld [vmem:[%s5000_s1 + $0x300] ss:$24 sps:$4 sm:$0xff]   ;;  %v2829_v5 = vld [vmem:[%s5000_s1 + $0x334] ss:$24 sps:$4 sm:$0xff]  }
   0x3   :  { %1400 = vmatprep.subr.bf16.mxu0 %v2823_v1  ;;  %1308 = vmatpush1.bf16.msra.mxu1 %v2825_v2  ;;  %v2831_v6 = vld [vmem:[%s5000_s1 + $0x30] ss:$24 sps:$4 sm:$0xff]   ;;  %v2833_v8 = vld [vmem:[%s5000_s1 + $0x64] ss:$24 sps:$4 sm:$0xff]   ;;  %v2837_v10 = vld [vmem:[%s5000_s1 + $0x60] ss:$24 sps:$4 sm:$0xff]  }
   0x4   :  { %1401 = vmatpush1.bf16.msra.mxu0 %v2826_v3  ;;  %1309 = vmatprep.subr.bf16.mxu1 %v2827_v4  ;;  %v2832_v7 = vld [vmem:[%s5000_s1 + $0x330] ss:$24 sps:$4 sm:$0xff]   ;;  %v2835_v9 = vld [vmem:[%s5000_s1 + $0x364] ss:$24 sps:$4 sm:$0xff]   ;;  %v2838_v11 = vld [vmem:[%s5000_s1 + $0x360] ss:$24 sps:$4 sm:$0xff]  }
   0x5   :  { %1402 = vmatprep.subr.bf16.mxu0 %v2829_v5  ;;  %v2839_v12 = vld [vmem:[%s5000_s1 + $0x94] ss:$24 sps:$4 sm:$0xff]   ;;  %v2843_v14 = vld [vmem:[%s5000_s1 + $0x90] ss:$24 sps:$4 sm:$0xff]   ;;  %v2845_v16 = vld [vmem:[%s5000_s1 + $0xc4] ss:$24 sps:$4 sm:$0xff]  }
   0x6   :  { %v2841_v13 = vld [vmem:[%s5000_s1 + $0x394] ss:$24 sps:$4 sm:$0xff]   ;;  %v2844_v15 = vld [vmem:[%s5000_s1 + $0x390] ss:$24 sps:$4 sm:$0xff]   ;;  %v2847_v17 = vld [vmem:[%s5000_s1 + $0x3c4] ss:$24 sps:$4 sm:$0xff]  }
   0x7   :  { %1310 = vmatpush1.bf16.msra.mxu1 %v2831_v6  ;;  %v2849_v18 = vld [vmem:[%s5000_s1 + $0xc0] ss:$24 sps:$4 sm:$0xff]   ;;  %v2851_v20 = vld [vmem:[%s5000_s1 + $0xf4] ss:$24 sps:$4 sm:$0xff]   ;;  %v2855_v22 = vld [vmem:[%s5000_s1 + $0xf0] ss:$24 sps:$4 sm:$0xff]  }
   0x8   :  { %1403 = vmatpush1.bf16.msra.mxu0 %v2832_v7  ;;  %1311 = vmatprep.subr.bf16.mxu1 %v2833_v8  ;;  %v2850_v19 = vld [vmem:[%s5000_s1 + $0x3c0] ss:$24 sps:$4 sm:$0xff]   ;;  %v2853_v21 = vld [vmem:[%s5000_s1 + $0x3f4] ss:$24 sps:$4 sm:$0xff]   ;;  %v2856_v23 = vld [vmem:[%s5000_s1 + $0x3f0] ss:$24 sps:$4 sm:$0xff]  }
   0x9   :  { %1404 = vmatprep.subr.bf16.mxu0 %v2835_v9  ;;  %v2857_v24 = vld [vmem:[%s5000_s1 + $0x124] ss:$24 sps:$4 sm:$0xff]   ;;  %v2861_v26 = vld [vmem:[%s5000_s1 + $0x120] ss:$24 sps:$4 sm:$0xff]   ;;  %v2863_v28 = vld [vmem:[%s5000_s1 + $0x154] ss:$24 sps:$4 sm:$0xff]  }
   0xa   :  { %v2859_v25 = vld [vmem:[%s5000_s1 + $0x424] ss:$24 sps:$4 sm:$0xff]   ;;  %v2862_v27 = vld [vmem:[%s5000_s1 + $0x420] ss:$24 sps:$4 sm:$0xff]   ;;  %v2865_v29 = vld [vmem:[%s5000_s1 + $0x454] ss:$24 sps:$4 sm:$0xff]  }
   0xb   :  { %1312 = vmatpush1.bf16.msra.mxu1 %v2837_v10  ;;  %v2867_v30 = vld [vmem:[%s5000_s1 + $0x150] ss:$24 sps:$4 sm:$0xff]   ;;  %v2869_v32 = vld [vmem:[%s5000_s1 + $0x184] ss:$24 sps:$4 sm:$0xff]   ;;  %v2873_v34 = vld [vmem:[%s5000_s1 + $0x180] ss:$24 sps:$4 sm:$0xff]  }
   0xc   :  { %1405 = vmatpush1.bf16.msra.mxu0 %v2838_v11  ;;  %1313 = vmatprep.subr.bf16.mxu1 %v2839_v12  ;;  %v2868_v31 = vld [vmem:[%s5000_s1 + $0x450] ss:$24 sps:$4 sm:$0xff]   ;;  %v2871_v33 = vld [vmem:[%s5000_s1 + $0x484] ss:$24 sps:$4 sm:$0xff]   ;;  %v2874_v35 = vld [vmem:[%s5000_s1 + $0x480] ss:$24 sps:$4 sm:$0xff]  }
   0xd   :  { %1406 = vmatprep.subr.bf16.mxu0 %v2841_v13  ;;  %v2875_v36 = vld [vmem:[%s5000_s1 + $0x1b4] ss:$24 sps:$4 sm:$0xff]   ;;  %v2879_v38 = vld [vmem:[%s5000_s1 + $0x1b0] ss:$24 sps:$4 sm:$0xff]   ;;  %v2881_v40 = vld [vmem:[%s5000_s1 + $0x1e4] ss:$24 sps:$4 sm:$0xff]  }
   0xe   :  { %v2877_v37 = vld [vmem:[%s5000_s1 + $0x4b4] ss:$24 sps:$4 sm:$0xff]   ;;  %v2880_v39 = vld [vmem:[%s5000_s1 + $0x4b0] ss:$24 sps:$4 sm:$0xff]   ;;  %v2883_v41 = vld [vmem:[%s5000_s1 + $0x4e4] ss:$24 sps:$4 sm:$0xff]  }
   0xf   :  { %1314 = vmatpush1.bf16.msra.mxu1 %v2843_v14  ;;  %v2885_v42 = vld [vmem:[%s5000_s1 + $0x1e0] ss:$24 sps:$4 sm:$0xff]   ;;  %v2887_v44 = vld [vmem:[%s5000_s1 + $0x214] ss:$24 sps:$4 sm:$0xff]   ;;  %v2891_v46 = vld [vmem:[%s5000_s1 + $0x210] ss:$24 sps:$4 sm:$0xff]  }
  0x10   :  { %1407 = vmatpush1.bf16.msra.mxu0 %v2844_v15  ;;  %1315 = vmatprep.subr.bf16.mxu1 %v2845_v16  ;;  %v2886_v43 = vld [vmem:[%s5000_s1 + $0x4e0] ss:$24 sps:$4 sm:$0xff]   ;;  %v2889_v45 = vld [vmem:[%s5000_s1 + $0x514] ss:$24 sps:$4 sm:$0xff]   ;;  %v2892_v47 = vld [vmem:[%s5000_s1 + $0x510] ss:$24 sps:$4 sm:$0xff]  }
  0x11   :  { %1408 = vmatprep.subr.bf16.mxu0 %v2847_v17  ;;  %v3523_v48 = vld [vmem:[%s5001_s0 + $0x4] ss:$16 sps:$4 sm:$0xff]   ;;  %v3531_v50 = vld [vmem:[%s5001_s0 + $0xc] ss:$16 sps:$4 sm:$0xff]   ;;  %v2897_v52 = vld [vmem:[%s5000_s1 + $0x240] ss:$24 sps:$4 sm:$0xff]  }
  0x12   :  { %v2893_v49 = vld [vmem:[%s5000_s1 + $0x244] ss:$24 sps:$4 sm:$0xff]   ;;  %1339 = vmatprep.mubr.bf16.mxu1 %v3523_v48  ;;  %1432 = vmatprep.mubr.bf16.mxu0 %v3531_v50  ;;  %v2898_v53 = vld [vmem:[%s5000_s1 + $0x540] ss:$24 sps:$4 sm:$0xff]   ;;  %v2899_v54 = vld [vmem:[%s5000_s1 + $0x274] ss:$24 sps:$4 sm:$0xff]  }
  0x13   :  { %1316 = vmatpush1.bf16.msra.mxu1 %v2849_v18  ;;  %v2895_v51 = vld [vmem:[%s5000_s1 + $0x544] ss:$24 sps:$4 sm:$0xff]   ;;  %v2901_v55 = vld [vmem:[%s5000_s1 + $0x574] ss:$24 sps:$4 sm:$0xff]   ;;  %v2903_v56 = vld [vmem:[%s5000_s1 + $0x270] ss:$24 sps:$4 sm:$0xff]  }
  0x14   :  { %1409 = vmatpush1.bf16.msra.mxu0 %v2850_v19  ;;  %1317 = vmatprep.subr.bf16.mxu1 %v2851_v20  ;;  %v2904_v57 = vld [vmem:[%s5000_s1 + $0x570] ss:$24 sps:$4 sm:$0xff]   ;;  %v2905_v58 = vld [vmem:[%s5000_s1 + $0x2a4] ss:$24 sps:$4 sm:$0xff]   ;;  %v2909_v60 = vld [vmem:[%s5000_s1 + $0x2a0] ss:$24 sps:$4 sm:$0xff]  }
  0x15   :  { %1410 = vmatprep.subr.bf16.mxu0 %v2853_v21  ;;  %v2907_v59 = vld [vmem:[%s5000_s1 + $0x5a4] ss:$24 sps:$4 sm:$0xff]   ;;  %v2910_v61 = vld [vmem:[%s5000_s1 + $0x5a0] ss:$24 sps:$4 sm:$0xff]   ;;  %v2911_v62 = vld [vmem:[%s5000_s1 + $0x2d4] ss:$24 sps:$4 sm:$0xff]  }
  0x16   :  { %v2913_v63 = vld [vmem:[%s5000_s1 + $0x5d4] ss:$24 sps:$4 sm:$0xff]   ;;  %v2915_v0 = vld [vmem:[%s5000_s1 + $0x2d0] ss:$24 sps:$4 sm:$0xff]   ;;  %v2934_v9 = vld [vmem:[%s5000_s1 + $0x44] ss:$24 sps:$4 sm:$0xff]  }
  0x17   :  { %1318 = vmatpush1.bf16.msra.mxu1 %v2855_v22  ;;  %v2916_v1 = vld [vmem:[%s5000_s1 + $0x5d0] ss:$24 sps:$4 sm:$0xff]   ;;  %v2925_v2 = vld [vmem:[%s5000_s1 + $0xc] ss:$24 sps:$4 sm:$0xff]   ;;  %v2931_v8 = vld [vmem:[%s5000_s1 + $0x3c] ss:$24 sps:$4 sm:$0xff]  }
  0x18   :  { %1411 = vmatpush1.bf16.msra.mxu0 %v2856_v23  ;;  %1319 = vmatprep.subr.bf16.mxu1 %v2857_v24  ;;  %v2928_v3 = vld [vmem:[%s5000_s1 + $0x14] ss:$24 sps:$4 sm:$0xff]   ;;  %v3589_v4 = vld [vmem:[%s5001_s0] ss:$16 sps:$4 sm:$0xff]   ;;  %v3594_v5 = vld [vmem:[%s5001_s0 + $0x8] ss:$16 sps:$4 sm:$0xff]  }
  0x19   :  { %1412 = vmatprep.subr.bf16.mxu0 %v2859_v25  ;;  %v2923_v6 = vld [vmem:[%s5000_s1 + $0x8] ss:$24 sps:$4 sm:$0xff]   ;;  %v3611_v10 = vld [vmem:[%s5001_s0 + $0x24] ss:$16 sps:$4 sm:$0xff]   ;;  %v3616_v11 = vld [vmem:[%s5001_s0 + $0x2c] ss:$16 sps:$4 sm:$0xff]  }
  0x1a   :  { %v2926_v7 = vld [vmem:[%s5000_s1 + $0x10] ss:$24 sps:$4 sm:$0xff]   ;;  %v2932_v13 = vld [vmem:[%s5000_s1 + $0x40] ss:$24 sps:$4 sm:$0xff]   ;;  %v2937_v14 = vld [vmem:[%s5000_s1 + $0x6c] ss:$24 sps:$4 sm:$0xff]  }
  0x1b   :  { %1320 = vmatpush1.bf16.msra.mxu1 %v2861_v26  ;;  %v2929_v12 = vld [vmem:[%s5000_s1 + $0x38] ss:$24 sps:$4 sm:$0xff]   ;;  %v2940_v15 = vld [vmem:[%s5000_s1 + $0x74] ss:$24 sps:$4 sm:$0xff]   ;;  %v2935_v16 = vld [vmem:[%s5000_s1 + $0x68] ss:$24 sps:$4 sm:$0xff]  }
  0x1c   :  { %1413 = vmatpush1.bf16.msra.mxu0 %v2862_v27  ;;  %1321 = vmatprep.subr.bf16.mxu1 %v2863_v28  ;;  %v2938_v17 = vld [vmem:[%s5000_s1 + $0x70] ss:$24 sps:$4 sm:$0xff]   ;;  %v2943_v20 = vld [vmem:[%s5000_s1 + $0x9c] ss:$24 sps:$4 sm:$0xff]   ;;  %v2944_v25 = vld [vmem:[%s5000_s1 + $0xa0] ss:$24 sps:$4 sm:$0xff]  }
  0x1d   :  { %1414 = vmatprep.subr.bf16.mxu0 %v2865_v29  ;;  %v3643_v18 = vld [vmem:[%s5001_s0 + $0x20] ss:$16 sps:$4 sm:$0xff]   ;;  %v3648_v19 = vld [vmem:[%s5001_s0 + $0x28] ss:$16 sps:$4 sm:$0xff]   ;;  %v2946_v21 = vld [vmem:[%s5000_s1 + $0xa4] ss:$24 sps:$4 sm:$0xff]  }
  0x1e   :  { %v3659_v22 = vld [vmem:[%s5001_s0 + $0x44] ss:$16 sps:$4 sm:$0xff]   ;;  %v3664_v23 = vld [vmem:[%s5001_s0 + $0x4c] ss:$16 sps:$4 sm:$0xff]   ;;  %v2941_v24 = vld [vmem:[%s5000_s1 + $0x98] ss:$24 sps:$4 sm:$0xff]  }
  0x1f   :  { %1322 = vmatpush1.bf16.msra.mxu1 %v2867_v30  ;;  %v2949_v26 = vld [vmem:[%s5000_s1 + $0xcc] ss:$24 sps:$4 sm:$0xff]   ;;  %v2947_v28 = vld [vmem:[%s5000_s1 + $0xc8] ss:$24 sps:$4 sm:$0xff]  }
  0x20   :  { %1415 = vmatpush1.bf16.msra.mxu0 %v2868_v31  ;;  %1323 = vmatprep.subr.bf16.mxu1 %v2869_v32  ;;  %v2952_v27 = vld [vmem:[%s5000_s1 + $0xd4] ss:$24 sps:$4 sm:$0xff]   ;;  %v2950_v29 = vld [vmem:[%s5000_s1 + $0xd0] ss:$24 sps:$4 sm:$0xff]  }
  0x21   :  { %1416 = vmatprep.subr.bf16.mxu0 %v2871_v33  ;;  %v3691_v30 = vld [vmem:[%s5001_s0 + $0x40] ss:$16 sps:$4 sm:$0xff]   ;;  %v3696_v31 = vld [vmem:[%s5001_s0 + $0x48] ss:$16 sps:$4 sm:$0xff]   ;;  %v2955_v32 = vld [vmem:[%s5000_s1 + $0xfc] ss:$24 sps:$4 sm:$0xff]  }
  0x22   :  { %v2958_v33 = vld [vmem:[%s5000_s1 + $0x104] ss:$24 sps:$4 sm:$0xff]  }
  0x23   :  { %1324 = vmatpush1.bf16.msra.mxu1 %v2873_v34  ;;  %v3707_v34 = vld [vmem:[%s5001_s0 + $0x64] ss:$16 sps:$4 sm:$0xff]  }
  0x24   :  { %1417 = vmatpush1.bf16.msra.mxu0 %v2874_v35  ;;  %1325 = vmatprep.subr.bf16.mxu1 %v2875_v36  ;;  %v3712_v35 = vld [vmem:[%s5001_s0 + $0x6c] ss:$16 sps:$4 sm:$0xff]   ;;  %v2953_v36 = vld [vmem:[%s5000_s1 + $0xf8] ss:$24 sps:$4 sm:$0xff]  }
  0x25   :  { %1418 = vmatprep.subr.bf16.mxu0 %v2877_v37  ;;  %v2956_v37 = vld [vmem:[%s5000_s1 + $0x100] ss:$24 sps:$4 sm:$0xff]  }
  0x27   :  { %1326 = vmatpush1.bf16.msra.mxu1 %v2879_v38  ;;  %v2967_v38 = vld [vmem:[%s5000_s1 + $0x12c] ss:$24 sps:$4 sm:$0xff]  }
  0x28   :  { %1419 = vmatpush1.bf16.msra.mxu0 %v2880_v39  ;;  %1327 = vmatprep.subr.bf16.mxu1 %v2881_v40  ;;  %v2970_v39 = vld [vmem:[%s5000_s1 + $0x134] ss:$24 sps:$4 sm:$0xff]   ;;  %v2965_v40 = vld [vmem:[%s5000_s1 + $0x128] ss:$24 sps:$4 sm:$0xff]  }
  0x29   :  { %1420 = vmatprep.subr.bf16.mxu0 %v2883_v41  ;;  %v2968_v41 = vld [vmem:[%s5000_s1 + $0x130] ss:$24 sps:$4 sm:$0xff]  }
  0x2b   :  { %1328 = vmatpush1.bf16.msra.mxu1 %v2885_v42  ;;  %v3739_v42 = vld [vmem:[%s5001_s0 + $0x60] ss:$16 sps:$4 sm:$0xff]  }
  0x2c   :  { %1421 = vmatpush1.bf16.msra.mxu0 %v2886_v43  ;;  %1329 = vmatprep.subr.bf16.mxu1 %v2887_v44  ;;  %v3744_v43 = vld [vmem:[%s5001_s0 + $0x68] ss:$16 sps:$4 sm:$0xff]   ;;  %v2973_v44 = vld [vmem:[%s5000_s1 + $0x15c] ss:$24 sps:$4 sm:$0xff]  }
  0x2d   :  { %1422 = vmatprep.subr.bf16.mxu0 %v2889_v45  ;;  %v2976_v45 = vld [vmem:[%s5000_s1 + $0x164] ss:$24 sps:$4 sm:$0xff]  }
  0x2f   :  { %1330 = vmatpush1.bf16.msra.mxu1 %v2891_v46  ;;  %v3755_v46 = vld [vmem:[%s5001_s0 + $0x84] ss:$16 sps:$4 sm:$0xff]  }
  0x30   :  { %1423 = vmatpush1.bf16.msra.mxu0 %v2892_v47  ;;  %1331 = vmatprep.subr.bf16.mxu1 %v2893_v49  ;;  %v3760_v47 = vld [vmem:[%s5001_s0 + $0x8c] ss:$16 sps:$4 sm:$0xff]   ;;  %v2971_v49 = vld [vmem:[%s5000_s1 + $0x158] ss:$24 sps:$4 sm:$0xff]  }
  0x31   :  { %1424 = vmatprep.subr.bf16.mxu0 %v2895_v51  ;;  %v2974_v51 = vld [vmem:[%s5000_s1 + $0x160] ss:$24 sps:$4 sm:$0xff]  }
  0x33   :  { %1332 = vmatpush1.bf16.msra.mxu1 %v2897_v52  ;;  %v2985_v52 = vld [vmem:[%s5000_s1 + $0x18c] ss:$24 sps:$4 sm:$0xff]  }
  0x34   :  { %1425 = vmatpush1.bf16.msra.mxu0 %v2898_v53  ;;  %1333 = vmatprep.subr.bf16.mxu1 %v2899_v54  ;;  %v2988_v53 = vld [vmem:[%s5000_s1 + $0x194] ss:$24 sps:$4 sm:$0xff]   ;;  %v2983_v54 = vld [vmem:[%s5000_s1 + $0x188] ss:$24 sps:$4 sm:$0xff]  }
  0x35   :  { %1426 = vmatprep.subr.bf16.mxu0 %v2901_v55  ;;  %v2986_v55 = vld [vmem:[%s5000_s1 + $0x190] ss:$24 sps:$4 sm:$0xff]  }
  0x37   :  { %1334 = vmatpush1.bf16.msra.mxu1 %v2903_v56  ;;  %v3787_v56 = vld [vmem:[%s5001_s0 + $0x80] ss:$16 sps:$4 sm:$0xff]  }
  0x38   :  { %1427 = vmatpush1.bf16.msra.mxu0 %v2904_v57  ;;  %1335 = vmatprep.subr.bf16.mxu1 %v2905_v58  ;;  %v3792_v57 = vld [vmem:[%s5001_s0 + $0x88] ss:$16 sps:$4 sm:$0xff]   ;;  %v2991_v58 = vld [vmem:[%s5000_s1 + $0x1bc] ss:$24 sps:$4 sm:$0xff]  }
  0x39   :  { %1428 = vmatprep.subr.bf16.mxu0 %v2907_v59  ;;  %v2994_v59 = vld [vmem:[%s5000_s1 + $0x1c4] ss:$24 sps:$4 sm:$0xff]  }
  0x3b   :  { %1336 = vmatpush1.bf16.msra.mxu1 %v2909_v60  ;;  %v3803_v60 = vld [vmem:[%s5001_s0 + $0xa4] ss:$16 sps:$4 sm:$0xff]  }
  0x3c   :  { %1429 = vmatpush1.bf16.msra.mxu0 %v2910_v61  ;;  %1337 = vmatprep.subr.bf16.mxu1 %v2911_v62  ;;  %v3808_v61 = vld [vmem:[%s5001_s0 + $0xac] ss:$16 sps:$4 sm:$0xff]   ;;  %v2989_v62 = vld [vmem:[%s5000_s1 + $0x1b8] ss:$24 sps:$4 sm:$0xff]  }
  0x3d   :  { %1430 = vmatprep.subr.bf16.mxu0 %v2913_v63  ;;  %v2992_v63 = vld [vmem:[%s5000_s1 + $0x1c0] ss:$24 sps:$4 sm:$0xff]  }
  0x3f   :  { %1338 = vmatpush1.bf16.msra.mxu1 %v2915_v0  ;;  %v3003_v0 = vld [vmem:[%s5000_s1 + $0x1ec] ss:$24 sps:$4 sm:$0xff]  }
  0x40   :  { %1431 = vmatpush1.bf16.msra.mxu0 %v2916_v1  ;;  %1493 = vmatprep.subr.bf16.mxu1 %v2925_v2  ;;  %v3006_v1 = vld [vmem:[%s5000_s1 + $0x1f4] ss:$24 sps:$4 sm:$0xff]   ;;  %v3001_v2 = vld [vmem:[%s5000_s1 + $0x1e8] ss:$24 sps:$4 sm:$0xff]  }
  0x41   :  { %1679 = vmatprep.subr.bf16.mxu0 %v2928_v3  ;;  %v3004_v3 = vld [vmem:[%s5000_s1 + $0x1f0] ss:$24 sps:$4 sm:$0xff]  }
  0x42   :  { %1340 = vmatmul.mubr.bf16.vlgmr.msra.gmra.mrb[0].mxu1 %v3589_v4 }
  0x43   :  { %1433 = vmatmul.mubr.bf16.vlgmr.msra.gmra.mrb[0].mxu0 %v3594_v5  ;;  %1494 = vmatpush1.bf16.msra.mxu1 %v2923_v6  ;;  %v3835_v6 = vld [vmem:[%s5001_s0 + $0xa0] ss:$16 sps:$4 sm:$0xff]  }
  0x44   :  { %1680 = vmatpush1.bf16.msra.mxu0 %v2926_v7  ;;  %1495 = vmatprep.subr.bf16.mxu1 %v2931_v8  ;;  %v3840_v7 = vld [vmem:[%s5001_s0 + $0xa8] ss:$16 sps:$4 sm:$0xff]   ;;  %v3009_v8 = vld [vmem:[%s5000_s1 + $0x21c] ss:$24 sps:$4 sm:$0xff]  }
  0x45   :  { %1681 = vmatprep.subr.bf16.mxu0 %v2934_v9  ;;  %1349 = vmatprep.mubr.bf16.mxu1 %v3611_v10  ;;  %v3012_v9 = vld [vmem:[%s5000_s1 + $0x224] ss:$24 sps:$4 sm:$0xff]  }
  0x46   :  { %1442 = vmatprep.mubr.bf16.mxu0 %v3616_v11 }
  0x47   :  { %1496 = vmatpush1.bf16.msra.mxu1 %v2929_v12  ;;  %v3007_v12 = vld [vmem:[%s5000_s1 + $0x218] ss:$24 sps:$4 sm:$0xff]  }
  0x48   :  { %1682 = vmatpush1.bf16.msra.mxu0 %v2932_v13  ;;  %1497 = vmatprep.subr.bf16.mxu1 %v2937_v14  ;;  %v3010_v13 = vld [vmem:[%s5000_s1 + $0x220] ss:$24 sps:$4 sm:$0xff]   ;;  %v3021_v14 = vld [vmem:[%s5000_s1 + $0x24c] ss:$24 sps:$4 sm:$0xff]  }
  0x49   :  { %1683 = vmatprep.subr.bf16.mxu0 %v2940_v15  ;;  %v3024_v15 = vld [vmem:[%s5000_s1 + $0x254] ss:$24 sps:$4 sm:$0xff]  }
  0x4a   :  { %1350 = vmatmul.mubr.bf16.gmra.mrb[4].mxu1 %v3643_v18 }
  0x4b   :  { %1443 = vmatmul.mubr.bf16.gmra.mrb[4].mxu0 %v3648_v19  ;;  %1498 = vmatpush1.bf16.msra.mxu1 %v2935_v16  ;;  %v3019_v16 = vld [vmem:[%s5000_s1 + $0x248] ss:$24 sps:$4 sm:$0xff]  }
  0x4c   :  { %1684 = vmatpush1.bf16.msra.mxu0 %v2938_v17  ;;  %1499 = vmatprep.subr.bf16.mxu1 %v2943_v20  ;;  %v3022_v17 = vld [vmem:[%s5000_s1 + $0x250] ss:$24 sps:$4 sm:$0xff]   ;;  %v3027_v20 = vld [vmem:[%s5000_s1 + $0x27c] ss:$24 sps:$4 sm:$0xff]  }
  0x4d   :  { %1685 = vmatprep.subr.bf16.mxu0 %v2946_v21  ;;  %1359 = vmatprep.mubr.bf16.mxu1 %v3659_v22  ;;  %v3025_v21 = vld [vmem:[%s5000_s1 + $0x278] ss:$24 sps:$4 sm:$0xff]  }
  0x4e   :  { %1452 = vmatprep.mubr.bf16.mxu0 %v3664_v23 }
  0x4f   :  { %1500 = vmatpush1.bf16.msra.mxu1 %v2941_v24  ;;  %v3028_v24 = vld [vmem:[%s5000_s1 + $0x280] ss:$24 sps:$4 sm:$0xff]  }
  0x50   :  { %1686 = vmatpush1.bf16.msra.mxu0 %v2944_v25  ;;  %1501 = vmatprep.subr.bf16.mxu1 %v2949_v26  ;;  %v3039_v25 = vld [vmem:[%s5000_s1 + $0x2ac] ss:$24 sps:$4 sm:$0xff]  }
  0x51   :  { %1687 = vmatprep.subr.bf16.mxu0 %v2952_v27  ;;  %v3042_v26 = vld [vmem:[%s5000_s1 + $0x2b4] ss:$24 sps:$4 sm:$0xff]   ;;  %v3037_v27 = vld [vmem:[%s5000_s1 + $0x2a8] ss:$24 sps:$4 sm:$0xff]  }
  0x52   :  { %1360 = vmatmul.mubr.bf16.gmra.mrb[8].mxu1 %v3691_v30 }
  0x53   :  { %1453 = vmatmul.mubr.bf16.gmra.mrb[8].mxu0 %v3696_v31  ;;  %1502 = vmatpush1.bf16.msra.mxu1 %v2947_v28  ;;  %v3040_v28 = vld [vmem:[%s5000_s1 + $0x2b0] ss:$24 sps:$4 sm:$0xff]  }
  0x54   :  { %1688 = vmatpush1.bf16.msra.mxu0 %v2950_v29  ;;  %1503 = vmatprep.subr.bf16.mxu1 %v2955_v32  ;;  %v3045_v29 = vld [vmem:[%s5000_s1 + $0x2dc] ss:$24 sps:$4 sm:$0xff]  }
  0x55   :  { %1689 = vmatprep.subr.bf16.mxu0 %v2958_v33  ;;  %1369 = vmatprep.mubr.bf16.mxu1 %v3707_v34  ;;  %v3048_v32 = vld [vmem:[%s5000_s1 + $0x2e4] ss:$24 sps:$4 sm:$0xff]   ;;  %v3043_v33 = vld [vmem:[%s5000_s1 + $0x2d8] ss:$24 sps:$4 sm:$0xff]  }
  0x56   :  { %1462 = vmatprep.mubr.bf16.mxu0 %v3712_v35 }
  0x57   :  { %1504 = vmatpush1.bf16.msra.mxu1 %v2953_v36  ;;  %v3046_v36 = vld [vmem:[%s5000_s1 + $0x2e0] ss:$24 sps:$4 sm:$0xff]  }
  0x58   :  { %1690 = vmatpush1.bf16.msra.mxu0 %v2956_v37  ;;  %1505 = vmatprep.subr.bf16.mxu1 %v2967_v38  ;;  %v3051_v37 = vld [vmem:[%s5000_s1 + $0x30c] ss:$24 sps:$4 sm:$0xff]  }
  0x59   :  { %1691 = vmatprep.subr.bf16.mxu0 %v2970_v39  ;;  %v3054_v38 = vld [vmem:[%s5000_s1 + $0x314] ss:$24 sps:$4 sm:$0xff]   ;;  %v3049_v39 = vld [vmem:[%s5000_s1 + $0x308] ss:$24 sps:$4 sm:$0xff]  }
  0x5a   :  { %1370 = vmatmul.mubr.bf16.gmra.mrb[12].mxu1 %v3739_v42 }
  0x5b   :  { %1463 = vmatmul.mubr.bf16.gmra.mrb[12].mxu0 %v3744_v43  ;;  %1506 = vmatpush1.bf16.msra.mxu1 %v2965_v40  ;;  %v3052_v40 = vld [vmem:[%s5000_s1 + $0x310] ss:$24 sps:$4 sm:$0xff]  }
  0x5c   :  { %1692 = vmatpush1.bf16.msra.mxu0 %v2968_v41  ;;  %1507 = vmatprep.subr.bf16.mxu1 %v2973_v44  ;;  %v3057_v41 = vld [vmem:[%s5000_s1 + $0x33c] ss:$24 sps:$4 sm:$0xff]  }
  0x5d   :  { %1693 = vmatprep.subr.bf16.mxu0 %v2976_v45  ;;  %1379 = vmatprep.mubr.bf16.mxu1 %v3755_v46  ;;  %v3060_v44 = vld [vmem:[%s5000_s1 + $0x344] ss:$24 sps:$4 sm:$0xff]   ;;  %v3055_v45 = vld [vmem:[%s5000_s1 + $0x338] ss:$24 sps:$4 sm:$0xff]  }
  0x5e   :  { %1472 = vmatprep.mubr.bf16.mxu0 %v3760_v47 }
  0x5f   :  { %1508 = vmatpush1.bf16.msra.mxu1 %v2971_v49  ;;  %v3058_v49 = vld [vmem:[%s5000_s1 + $0x340] ss:$24 sps:$4 sm:$0xff]  }
  0x60   :  { %1694 = vmatpush1.bf16.msra.mxu0 %v2974_v51  ;;  %1509 = vmatprep.subr.bf16.mxu1 %v2985_v52  ;;  %v3063_v51 = vld [vmem:[%s5000_s1 + $0x36c] ss:$24 sps:$4 sm:$0xff]   ;;  %v3061_v52 = vld [vmem:[%s5000_s1 + $0x368] ss:$24 sps:$4 sm:$0xff]  }
  0x61   :  { %1695 = vmatprep.subr.bf16.mxu0 %v2988_v53  ;;  %v3064_v53 = vld [vmem:[%s5000_s1 + $0x370] ss:$24 sps:$4 sm:$0xff]  }
  0x62   :  { %1380 = vmatmul.mubr.bf16.gmra.mrb[16].mxu1 %v3787_v56 }
  0x63   :  { %1473 = vmatmul.mubr.bf16.gmra.mrb[16].mxu0 %v3792_v57  ;;  %1510 = vmatpush1.bf16.msra.mxu1 %v2983_v54  ;;  %v3069_v54 = vld [vmem:[%s5000_s1 + $0x39c] ss:$24 sps:$4 sm:$0xff]  }
  0x64   :  { %1696 = vmatpush1.bf16.msra.mxu0 %v2986_v55  ;;  %1511 = vmatprep.subr.bf16.mxu1 %v2991_v58  ;;  %v3067_v55 = vld [vmem:[%s5000_s1 + $0x398] ss:$24 sps:$4 sm:$0xff]  }
  0x65   :  { %1697 = vmatprep.subr.bf16.mxu0 %v2994_v59  ;;  %1389 = vmatprep.mubr.bf16.mxu1 %v3803_v60  ;;  %v3070_v58 = vld [vmem:[%s5000_s1 + $0x3a0] ss:$24 sps:$4 sm:$0xff]   ;;  %v3075_v59 = vld [vmem:[%s5000_s1 + $0x3cc] ss:$24 sps:$4 sm:$0xff]  }
  0x66   :  { %1482 = vmatprep.mubr.bf16.mxu0 %v3808_v61 }
  0x67   :  { %1512 = vmatpush1.bf16.msra.mxu1 %v2989_v62  ;;  %v3078_v62 = vld [vmem:[%s5000_s1 + $0x3d4] ss:$24 sps:$4 sm:$0xff]  }
  0x68   :  { %1698 = vmatpush1.bf16.msra.mxu0 %v2992_v63  ;;  %1513 = vmatprep.subr.bf16.mxu1 %v3003_v0  ;;  %v3076_v63 = vld [vmem:[%s5000_s1 + $0x3d0] ss:$24 sps:$4 sm:$0xff]   ;;  %v3081_v0 = vld [vmem:[%s5000_s1 + $0x3fc] ss:$24 sps:$4 sm:$0xff]  }
  0x69   :  { %1699 = vmatprep.subr.bf16.mxu0 %v3006_v1  ;;  %v3079_v1 = vld [vmem:[%s5000_s1 + $0x3f8] ss:$24 sps:$4 sm:$0xff]  }
  0x6a   :  { %1390 = vmatmul.mubr.bf16.gmra.mrb[20].mxu1 %v3835_v6 }
  0x6b   :  { %1483 = vmatmul.mubr.bf16.gmra.mrb[20].mxu0 %v3840_v7  ;;  %1514 = vmatpush1.bf16.msra.mxu1 %v3001_v2  ;;  %v3082_v2 = vld [vmem:[%s5000_s1 + $0x400] ss:$24 sps:$4 sm:$0xff]  }
  0x6c   :  { %1700 = vmatpush1.bf16.msra.mxu0 %v3004_v3  ;;  %1515 = vmatprep.subr.bf16.mxu1 %v3009_v8  ;;  %v3087_v3 = vld [vmem:[%s5000_s1 + $0x42c] ss:$24 sps:$4 sm:$0xff]   ;;  %v3085_v8 = vld [vmem:[%s5000_s1 + $0x428] ss:$24 sps:$4 sm:$0xff]  }
  0x6d   :  { %1701 = vmatprep.subr.bf16.mxu0 %v3012_v9  ;;  %1525 = vmatprep.mubr.bf16.mxu1 %v3523_v48  ;;  %v3088_v9 = vld [vmem:[%s5000_s1 + $0x430] ss:$24 sps:$4 sm:$0xff]  }
  0x6e   :  { %1711 = vmatprep.mubr.bf16.mxu0 %v3523_v48  ;;  %v3030_v48 = vld [vmem:[%s5000_s1 + $0x284] ss:$24 sps:$4 sm:$0xff]  }
  0x6f   :  { %1516 = vmatpush1.bf16.msra.mxu1 %v3007_v12  ;;  %v3093_v12 = vld [vmem:[%s5000_s1 + $0x45c] ss:$24 sps:$4 sm:$0xff]  }
  0x70   :  { %1702 = vmatpush1.bf16.msra.mxu0 %v3010_v13  ;;  %1517 = vmatprep.subr.bf16.mxu1 %v3021_v14  ;;  %v3091_v13 = vld [vmem:[%s5000_s1 + $0x458] ss:$24 sps:$4 sm:$0xff]  }
  0x71   :  { %1703 = vmatprep.subr.bf16.mxu0 %v3024_v15  ;;  %v3094_v14 = vld [vmem:[%s5000_s1 + $0x460] ss:$24 sps:$4 sm:$0xff]   ;;  %v3099_v15 = vld [vmem:[%s5000_s1 + $0x48c] ss:$24 sps:$4 sm:$0xff]  }
  0x73   :  { %1518 = vmatpush1.bf16.msra.mxu1 %v3019_v16  ;;  %v3097_v16 = vld [vmem:[%s5000_s1 + $0x488] ss:$24 sps:$4 sm:$0xff]  }
  0x74   :  { %1704 = vmatpush1.bf16.msra.mxu0 %v3022_v17  ;;  %1519 = vmatprep.subr.bf16.mxu1 %v3027_v20  ;;  %v3100_v17 = vld [vmem:[%s5000_s1 + $0x490] ss:$24 sps:$4 sm:$0xff]   ;;  %v3105_v20 = vld [vmem:[%s5000_s1 + $0x4bc] ss:$24 sps:$4 sm:$0xff]  }
  0x75   :  { %1705 = vmatprep.subr.bf16.mxu0 %v3030_v48  ;;  %v3103_v48 = vld [vmem:[%s5000_s1 + $0x4b8] ss:$24 sps:$4 sm:$0xff]  }
  0x77   :  { %1520 = vmatpush1.bf16.msra.mxu1 %v3025_v21  ;;  %v3106_v21 = vld [vmem:[%s5000_s1 + $0x4c0] ss:$24 sps:$4 sm:$0xff]  }
  0x78   :  { %1706 = vmatpush1.bf16.msra.mxu0 %v3028_v24  ;;  %1521 = vmatprep.subr.bf16.mxu1 %v3039_v25  ;;  %v3111_v24 = vld [vmem:[%s5000_s1 + $0x4ec] ss:$24 sps:$4 sm:$0xff]   ;;  %v3109_v25 = vld [vmem:[%s5000_s1 + $0x4e8] ss:$24 sps:$4 sm:$0xff]  }
  0x79   :  { %1707 = vmatprep.subr.bf16.mxu0 %v3042_v26  ;;  %v3112_v26 = vld [vmem:[%s5000_s1 + $0x4f0] ss:$24 sps:$4 sm:$0xff]  }
  0x7b   :  { %1522 = vmatpush1.bf16.msra.mxu1 %v3037_v27  ;;  %v3117_v27 = vld [vmem:[%s5000_s1 + $0x51c] ss:$24 sps:$4 sm:$0xff]  }
  0x7c   :  { %1708 = vmatpush1.bf16.msra.mxu0 %v3040_v28  ;;  %1523 = vmatprep.subr.bf16.mxu1 %v3045_v29  ;;  %v3115_v28 = vld [vmem:[%s5000_s1 + $0x518] ss:$24 sps:$4 sm:$0xff]  }
  0x7d   :  { %1709 = vmatprep.subr.bf16.mxu0 %v3048_v32  ;;  %v3118_v29 = vld [vmem:[%s5000_s1 + $0x520] ss:$24 sps:$4 sm:$0xff]   ;;  %v3123_v32 = vld [vmem:[%s5000_s1 + $0x54c] ss:$24 sps:$4 sm:$0xff]  }
  0x7f   :  { %1524 = vmatpush1.bf16.msra.mxu1 %v3043_v33  ;;  %v3121_v33 = vld [vmem:[%s5000_s1 + $0x548] ss:$24 sps:$4 sm:$0xff]  }
  0x80   :  { %1710 = vmatpush1.bf16.msra.mxu0 %v3046_v36  ;;  %1586 = vmatprep.subr.bf16.mxu1 %v3051_v37  ;;  %v3124_v36 = vld [vmem:[%s5000_s1 + $0x550] ss:$24 sps:$4 sm:$0xff]   ;;  %v3129_v37 = vld [vmem:[%s5000_s1 + $0x57c] ss:$24 sps:$4 sm:$0xff]  }
  0x81   :  { %1772 = vmatprep.subr.bf16.mxu0 %v3054_v38  ;;  %v3127_v38 = vld [vmem:[%s5000_s1 + $0x578] ss:$24 sps:$4 sm:$0xff]  }
  0x82   :  { %1526 = vmatmul.mubr.bf16.vlgmr.msra.gmra.mrb[24].mxu1 %v3589_v4 }
  0x83   :  { %1712 = vmatmul.mubr.bf16.vlgmr.msra.gmra.mrb[24].mxu0 %v3589_v4  ;;  %1587 = vmatpush1.bf16.msra.mxu1 %v3049_v39  ;;  %v3066_v4 = vld [vmem:[%s5000_s1 + $0x374] ss:$24 sps:$4 sm:$0xff]   ;;  %v3130_v39 = vld [vmem:[%s5000_s1 + $0x580] ss:$24 sps:$4 sm:$0xff]  }
  0x84   :  { %1773 = vmatpush1.bf16.msra.mxu0 %v3052_v40  ;;  %1588 = vmatprep.subr.bf16.mxu1 %v3057_v41  ;;  %v3135_v40 = vld [vmem:[%s5000_s1 + $0x5ac] ss:$24 sps:$4 sm:$0xff]  }
  0x85   :  { %1774 = vmatprep.subr.bf16.mxu0 %v3060_v44  ;;  %1535 = vmatprep.mubr.bf16.mxu1 %v3611_v10  ;;  %v3138_v41 = vld [vmem:[%s5000_s1 + $0x5b4] ss:$24 sps:$4 sm:$0xff]   ;;  %v3133_v44 = vld [vmem:[%s5000_s1 + $0x5a8] ss:$24 sps:$4 sm:$0xff]  }
  0x86   :  { %1721 = vmatprep.mubr.bf16.mxu0 %v3611_v10  ;;  %v3072_v10 = vld [vmem:[%s5000_s1 + $0x3a4] ss:$24 sps:$4 sm:$0xff]  }
  0x87   :  { %1589 = vmatpush1.bf16.msra.mxu1 %v3055_v45  ;;  %v3136_v45 = vld [vmem:[%s5000_s1 + $0x5b0] ss:$24 sps:$4 sm:$0xff]  }
  0x88   :  { %1775 = vmatpush1.bf16.msra.mxu0 %v3058_v49  ;;  %1590 = vmatprep.subr.bf16.mxu1 %v3063_v51  ;;  %v3141_v49 = vld [vmem:[%s5000_s1 + $0x5dc] ss:$24 sps:$4 sm:$0xff]  }
  0x89   :  { %1776 = vmatprep.subr.bf16.mxu0 %v3066_v4  ;;  %v3144_v51 = vld [vmem:[%s5000_s1 + $0x5e4] ss:$24 sps:$4 sm:$0xff]   ;;  %v3139_v4 = vld [vmem:[%s5000_s1 + $0x5d8] ss:$24 sps:$4 sm:$0xff]  }
  0x8a   :  { %1536 = vmatmul.mubr.bf16.gmra.mrb[28].mxu1 %v3643_v18 }
  0x8b   :  { %1722 = vmatmul.mubr.bf16.gmra.mrb[28].mxu0 %v3643_v18  ;;  %1591 = vmatpush1.bf16.msra.mxu1 %v3061_v52  ;;  %v3073_v18 = vld [vmem:[%s5000_s1 + $0x3c8] ss:$24 sps:$4 sm:$0xff]  }
  0x8c   :  { %1777 = vmatpush1.bf16.msra.mxu0 %v3064_v53  ;;  %1592 = vmatprep.subr.bf16.mxu1 %v3069_v54  ;;  %v3142_v52 = vld [vmem:[%s5000_s1 + $0x5e0] ss:$24 sps:$4 sm:$0xff]  }
  0x8d   :  { %1778 = vmatprep.subr.bf16.mxu0 %v3072_v10  ;;  %1545 = vmatprep.mubr.bf16.mxu1 %v3659_v22 }
  0x8e   :  { %1731 = vmatprep.mubr.bf16.mxu0 %v3659_v22  ;;  %v3084_v22 = vld [vmem:[%s5000_s1 + $0x404] ss:$24 sps:$4 sm:$0xff]  }
  0x8f   :  { %1593 = vmatpush1.bf16.msra.mxu1 %v3067_v55 }
  0x90   :  { %1779 = vmatpush1.bf16.msra.mxu0 %v3070_v58  ;;  %1594 = vmatprep.subr.bf16.mxu1 %v3075_v59 }
  0x91   :  { %1780 = vmatprep.subr.bf16.mxu0 %v3078_v62 }
  0x92   :  { %1546 = vmatmul.mubr.bf16.gmra.mrb[32].mxu1 %v3691_v30 }
  0x93   :  { %1732 = vmatmul.mubr.bf16.gmra.mrb[32].mxu0 %v3691_v30  ;;  %1595 = vmatpush1.bf16.msra.mxu1 %v3073_v18  ;;  %v3090_v30 = vld [vmem:[%s5000_s1 + $0x434] ss:$24 sps:$4 sm:$0xff]  }
  0x94   :  { %1781 = vmatpush1.bf16.msra.mxu0 %v3076_v63  ;;  %1596 = vmatprep.subr.bf16.mxu1 %v3081_v0 }
  0x95   :  { %1782 = vmatprep.subr.bf16.mxu0 %v3084_v22  ;;  %1555 = vmatprep.mubr.bf16.mxu1 %v3707_v34 }
  0x96   :  { %1741 = vmatprep.mubr.bf16.mxu0 %v3707_v34  ;;  %v3096_v34 = vld [vmem:[%s5000_s1 + $0x464] ss:$24 sps:$4 sm:$0xff]  }
  0x97   :  { %1597 = vmatpush1.bf16.msra.mxu1 %v3079_v1 }
  0x98   :  { %1783 = vmatpush1.bf16.msra.mxu0 %v3082_v2  ;;  %1598 = vmatprep.subr.bf16.mxu1 %v3087_v3 }
  0x99   :  { %1784 = vmatprep.subr.bf16.mxu0 %v3090_v30 }
  0x9a   :  { %1556 = vmatmul.mubr.bf16.gmra.mrb[36].mxu1 %v3739_v42 }
  0x9b   :  { %1742 = vmatmul.mubr.bf16.gmra.mrb[36].mxu0 %v3739_v42  ;;  %1599 = vmatpush1.bf16.msra.mxu1 %v3085_v8  ;;  %v3102_v42 = vld [vmem:[%s5000_s1 + $0x494] ss:$24 sps:$4 sm:$0xff]  }
  0x9c   :  { %1785 = vmatpush1.bf16.msra.mxu0 %v3088_v9  ;;  %1600 = vmatprep.subr.bf16.mxu1 %v3093_v12 }
  0x9d   :  { %1786 = vmatprep.subr.bf16.mxu0 %v3096_v34  ;;  %1565 = vmatprep.mubr.bf16.mxu1 %v3755_v46 }
  0x9e   :  { %1751 = vmatprep.mubr.bf16.mxu0 %v3755_v46  ;;  %v3108_v46 = vld [vmem:[%s5000_s1 + $0x4c4] ss:$24 sps:$4 sm:$0xff]  }
  0x9f   :  { %1601 = vmatpush1.bf16.msra.mxu1 %v3091_v13 }
  0xa0   :  { %1787 = vmatpush1.bf16.msra.mxu0 %v3094_v14  ;;  %1602 = vmatprep.subr.bf16.mxu1 %v3099_v15 }
  0xa1   :  { %1788 = vmatprep.subr.bf16.mxu0 %v3102_v42 }
  0xa2   :  { %1566 = vmatmul.mubr.bf16.gmra.mrb[40].mxu1 %v3787_v56 }
  0xa3   :  { %1752 = vmatmul.mubr.bf16.gmra.mrb[40].mxu0 %v3787_v56  ;;  %1603 = vmatpush1.bf16.msra.mxu1 %v3097_v16  ;;  %v3114_v56 = vld [vmem:[%s5000_s1 + $0x4f4] ss:$24 sps:$4 sm:$0xff]  }
  0xa4   :  { %1789 = vmatpush1.bf16.msra.mxu0 %v3100_v17  ;;  %1604 = vmatprep.subr.bf16.mxu1 %v3105_v20 }
  0xa5   :  { %1790 = vmatprep.subr.bf16.mxu0 %v3108_v46  ;;  %1575 = vmatprep.mubr.bf16.mxu1 %v3803_v60 }
  0xa6   :  { %1761 = vmatprep.mubr.bf16.mxu0 %v3803_v60  ;;  %v3120_v60 = vld [vmem:[%s5000_s1 + $0x524] ss:$24 sps:$4 sm:$0xff]  }
  0xa7   :  { %1605 = vmatpush1.bf16.msra.mxu1 %v3103_v48 }
  0xa8   :  { %1791 = vmatpush1.bf16.msra.mxu0 %v3106_v21  ;;  %1606 = vmatprep.subr.bf16.mxu1 %v3111_v24 }
  0xa9   :  { %1792 = vmatprep.subr.bf16.mxu0 %v3114_v56 }
  0xaa   :  { %1576 = vmatmul.mubr.bf16.gmra.mrb[44].mxu1 %v3835_v6 }
  0xab   :  { %1762 = vmatmul.mubr.bf16.gmra.mrb[44].mxu0 %v3835_v6  ;;  %1607 = vmatpush1.bf16.msra.mxu1 %v3109_v25  ;;  %v3126_v6 = vld [vmem:[%s5000_s1 + $0x554] ss:$24 sps:$4 sm:$0xff]  }
  0xac   :  { %1793 = vmatpush1.bf16.msra.mxu0 %v3112_v26  ;;  %1608 = vmatprep.subr.bf16.mxu1 %v3117_v27 }
  0xad   :  { %1794 = vmatprep.subr.bf16.mxu0 %v3120_v60  ;;  %1618 = vmatprep.mubr.bf16.mxu1 %v3531_v50 }
  0xae   :  { %1804 = vmatprep.mubr.bf16.mxu0 %v3531_v50  ;;  %v3132_v50 = vld [vmem:[%s5000_s1 + $0x584] ss:$24 sps:$4 sm:$0xff]  }
  0xaf   :  { %1609 = vmatpush1.bf16.msra.mxu1 %v3115_v28 }
  0xb0   :  { %1795 = vmatpush1.bf16.msra.mxu0 %v3118_v29  ;;  %1610 = vmatprep.subr.bf16.mxu1 %v3123_v32 }
  0xb1   :  { %1796 = vmatprep.subr.bf16.mxu0 %v3126_v6 }
  0xb3   :  { %1611 = vmatpush1.bf16.msra.mxu1 %v3121_v33 }
  0xb4   :  { %1797 = vmatpush1.bf16.msra.mxu0 %v3124_v36  ;;  %1612 = vmatprep.subr.bf16.mxu1 %v3129_v37 }
  0xb5   :  { %1798 = vmatprep.subr.bf16.mxu0 %v3132_v50 }
  0xb7   :  { %1613 = vmatpush1.bf16.msra.mxu1 %v3127_v38 }
  0xb8   :  { %1799 = vmatpush1.bf16.msra.mxu0 %v3130_v39  ;;  %1614 = vmatprep.subr.bf16.mxu1 %v3135_v40 }
  0xb9   :  { %1800 = vmatprep.subr.bf16.mxu0 %v3138_v41 }
  0xbb   :  { %1615 = vmatpush1.bf16.msra.mxu1 %v3133_v44 }
  0xbc   :  { %1801 = vmatpush1.bf16.msra.mxu0 %v3136_v45  ;;  %1616 = vmatprep.subr.bf16.mxu1 %v3141_v49 }
  0xbd   :  { %1802 = vmatprep.subr.bf16.mxu0 %v3144_v51 }
  0xbf   :  { %1617 = vmatpush1.bf16.msra.mxu1 %v3139_v4 }
  0xc0   :  { %1803 = vmatpush1.bf16.msra.mxu0 %v3142_v52 }
  0xc2   :  { %1619 = vmatmul.mubr.bf16.vlgmr.msra.gmra.mrb[24].mxu1 %v3594_v5 }
  0xc3   :  { %1805 = vmatmul.mubr.bf16.vlgmr.msra.gmra.mrb[24].mxu0 %v3594_v5  ;;  %1628 = vmatprep.mubr.bf16.mxu1 %v3616_v11 }
  0xc4   :  { %1814 = vmatprep.mubr.bf16.mxu0 %v3616_v11 }
  0xca   :  { %1629 = vmatmul.mubr.bf16.gmra.mrb[28].mxu1 %v3648_v19 }
  0xcb   :  { %1815 = vmatmul.mubr.bf16.gmra.mrb[28].mxu0 %v3648_v19  ;;  %1638 = vmatprep.mubr.bf16.mxu1 %v3664_v23 }
  0xcc   :  { %1824 = vmatprep.mubr.bf16.mxu0 %v3664_v23 }
  0xd2   :  { %1639 = vmatmul.mubr.bf16.gmra.mrb[32].mxu1 %v3696_v31 }
  0xd3   :  { %1825 = vmatmul.mubr.bf16.gmra.mrb[32].mxu0 %v3696_v31  ;;  %1648 = vmatprep.mubr.bf16.mxu1 %v3712_v35 }
  0xd4   :  { %1834 = vmatprep.mubr.bf16.mxu0 %v3712_v35 }
  0xda   :  { %1649 = vmatmul.mubr.bf16.gmra.mrb[36].mxu1 %v3744_v43 }
  0xdb   :  { %1835 = vmatmul.mubr.bf16.gmra.mrb[36].mxu0 %v3744_v43  ;;  %1658 = vmatprep.mubr.bf16.mxu1 %v3760_v47 }
  0xdc   :  { %1844 = vmatprep.mubr.bf16.mxu0 %v3760_v47 }
  0xe2   :  { %1659 = vmatmul.mubr.bf16.gmra.mrb[40].mxu1 %v3792_v57 }
  0xe3   :  { %1845 = vmatmul.mubr.bf16.gmra.mrb[40].mxu0 %v3792_v57  ;;  %1668 = vmatprep.mubr.bf16.mxu1 %v3808_v61 }
  0xe4   :  { %1854 = vmatprep.mubr.bf16.mxu0 %v3808_v61 }
  0xea   :  { %1669 = vmatmul.mubr.bf16.gmra.mrb[44].mxu1 %v3840_v7 }
  0xeb   :  { %1855 = vmatmul.mubr.bf16.gmra.mrb[44].mxu0 %v3840_v7 }
 0x115   :  { %v1341_v5 = vpop.f32.mrb[0].mxu1 }
 0x116   :  { %v1434_v11 = vpop.f32.mrb[0].mxu0  ;;  %v1343_v23 = vpop.f32.mrb[1].mxu1 }
 0x117   :  { %v4144_v19 = vadd.f32 %v1434_v11, %v1341_v5  ;;  %v1436_v31 = vpop.f32.mrb[1].mxu0  ;;  %v1345_v43 = vpop.f32.mrb[2].mxu1 }
 0x118   :  { %v4146_v35 = vadd.f32 %v1436_v31, %v1343_v23  ;;  %v1438_v47 = vpop.f32.mrb[2].mxu0  ;;  %v1347_v57 = vpop.f32.mrb[3].mxu1 }
 0x119   :  { %v4148_v53 = vadd.f32 %v1438_v47, %v1345_v43  ;;  %v1440_v54 = vpop.f32.mrb[3].mxu0 }
 0x11a   :  { %v4150_v10 = vadd.f32 %v1440_v54, %v1347_v57 }
 0x11d   :  { %v1351_v61 = vpop.f32.mrb[4].mxu1 }
 0x11e   :  { %v1444_v55 = vpop.f32.mrb[4].mxu0  ;;  %v1353_v7 = vpop.f32.mrb[5].mxu1 }
 0x11f   :  { %v4152_v58 = vadd.f32 %v1444_v55, %v1351_v61  ;;  %v1446_v59 = vpop.f32.mrb[5].mxu0  ;;  %v1355_v18 = vpop.f32.mrb[6].mxu1  ;;  %v1865_v61 = vmul.f32 %v4144_v19, %v4144_v19  ;;  %v1866_v55 = vmul.f32 %v4146_v35, %v4146_v35 }
 0x120   :  { %v4154_v62 = vadd.f32 %v1446_v59, %v1353_v7  ;;  %v1448_v63 = vpop.f32.mrb[6].mxu0  ;;  %v1357_v22 = vpop.f32.mrb[7].mxu1 }
 0x121   :  { %v4156_v0 = vadd.f32 %v1448_v63, %v1355_v18  ;;  %v1450_v1 = vpop.f32.mrb[7].mxu0  ;;  %v1868_v18 = vmul.f32 %v4148_v53, %v4148_v53  ;;  %v1869_v63 = vmul.f32 %v4150_v10, %v4150_v10 }
 0x122   :  { %v4158_v2 = vadd.f32 %v1450_v1, %v1357_v22 }
 0x123   :  { %5063 = vst [vmem:[#allocation2_spill] sm:$0xff] %v4156_v0 }
 0x124   :  { %5064 = vst [vmem:[#allocation3_spill] sm:$0xff] %v4158_v2 }
 0x125   :  { %v1361_v3 = vpop.f32.mrb[8].mxu1 }
 0x126   :  { %v1454_v30 = vpop.f32.mrb[8].mxu0  ;;  %v1363_v9 = vpop.f32.mrb[9].mxu1 }
 0x127   :  { %v4160_v8 = vadd.f32 %v1454_v30, %v1361_v3  ;;  %v1456_v12 = vpop.f32.mrb[9].mxu0  ;;  %v1365_v13 = vpop.f32.mrb[10].mxu1 }
 0x128   :  { %v4162_v34 = vadd.f32 %v1456_v12, %v1363_v9  ;;  %v1458_v14 = vpop.f32.mrb[10].mxu0  ;;  %v1367_v42 = vpop.f32.mrb[11].mxu1  ;;  %v1871_v9 = vmul.f32 %v4152_v58, %v4152_v58  ;;  %v1872_v12 = vmul.f32 %v4154_v62, %v4154_v62 }
 0x129   :  { %5065 = vst [vmem:[#allocation4_spill] sm:$0xff] %v4160_v8  ;;  %v4164_v15 = vadd.f32 %v1458_v14, %v1365_v13  ;;  %v1460_v16 = vpop.f32.mrb[11].mxu0 }
 0x12a   :  { %5066 = vst [vmem:[#allocation5_spill] sm:$0xff] %v4162_v34  ;;  %v4166_v17 = vadd.f32 %v1460_v16, %v1367_v42 }
 0x12b   :  { %5067 = vst [vmem:[#allocation6_spill] sm:$0xff] %v4164_v15 }
 0x12c   :  { %5068 = vst [vmem:[#allocation7_spill] sm:$0xff] %v4166_v17 }
 0x12d   :  { %v1371_v20 = vpop.f32.mrb[12].mxu1 }
 0x12e   :  { %v1464_v46 = vpop.f32.mrb[12].mxu0  ;;  %v1373_v21 = vpop.f32.mrb[13].mxu1 }
 0x12f   :  { %v4168_v48 = vadd.f32 %v1464_v46, %v1371_v20  ;;  %v1466_v24 = vpop.f32.mrb[13].mxu0  ;;  %v1375_v25 = vpop.f32.mrb[14].mxu1  ;;  %v1874_v20 = vmul.f32 %v4156_v0, %v4156_v0 }
 0x130   :  { %v4170_v56 = vadd.f32 %v1466_v24, %v1373_v21  ;;  %v1468_v26 = vpop.f32.mrb[14].mxu0  ;;  %v1377_v60 = vpop.f32.mrb[15].mxu1 }
 0x131   :  { %5069 = vst [vmem:[#allocation8_spill] sm:$0xff] %v4168_v48  ;;  %v4172_v27 = vadd.f32 %v1468_v26, %v1375_v25  ;;  %v1470_v28 = vpop.f32.mrb[15].mxu0 }
 0x132   :  { %5070 = vst [vmem:[#allocation9_spill] sm:$0xff] %v4170_v56  ;;  %v4174_v29 = vadd.f32 %v1470_v28, %v1377_v60 }
 0x133   :  { %5071 = vst [vmem:[#allocation10_spill] sm:$0xff] %v4172_v27 }
 0x134   :  { %5072 = vst [vmem:[#allocation11_spill] sm:$0xff] %v4174_v29 }
 0x135   :  { %v1381_v32 = vpop.f32.mrb[16].mxu1 }
 0x136   :  { %v1474_v6 = vpop.f32.mrb[16].mxu0  ;;  %v1383_v36 = vpop.f32.mrb[17].mxu1 }
 0x137   :  { %v4176_v33 = vadd.f32 %v1474_v6, %v1381_v32  ;;  %v1476_v37 = vpop.f32.mrb[17].mxu0  ;;  %v1385_v38 = vpop.f32.mrb[18].mxu1 }
 0x138   :  { %v4178_v50 = vadd.f32 %v1476_v37, %v1383_v36  ;;  %v1478_v39 = vpop.f32.mrb[18].mxu0  ;;  %v1387_v41 = vpop.f32.mrb[19].mxu1  ;;  %v1875_v36 = vmul.f32 %v4158_v2, %v4158_v2  ;;  %v4242_v37 = vmul.f32 %v4160_v8, %v4160_v8 }
 0x139   :  { %5073 = vst [vmem:[#allocation12_spill] sm:$0xff] %v4176_v33  ;;  %v4180_v40 = vadd.f32 %v1478_v39, %v1385_v38  ;;  %v1480_v44 = vpop.f32.mrb[19].mxu0 }
 0x13a   :  { %5074 = vst [vmem:[#allocation13_spill] sm:$0xff] %v4178_v50  ;;  %v4182_v45 = vadd.f32 %v1480_v44, %v1387_v41  ;;  %v4246_v41 = vmul.f32 %v4162_v34, %v4162_v34 }
 0x13b   :  { %5075 = vst [vmem:[#allocation14_spill] sm:$0xff] %v4180_v40 }
 0x13c   :  { %5076 = vst [vmem:[#allocation15_spill] sm:$0xff] %v4182_v45 }
 0x13d   :  { %v1391_v49 = vpop.f32.mrb[20].mxu1 }
 0x13e   :  { %v1484_v51 = vpop.f32.mrb[20].mxu0  ;;  %v1393_v52 = vpop.f32.mrb[21].mxu1 }
 0x13f   :  { %v4184_v4 = vadd.f32 %v1484_v51, %v1391_v49  ;;  %v1486_v5 = vpop.f32.mrb[21].mxu0  ;;  %v1395_v23 = vpop.f32.mrb[22].mxu1 }
 0x140   :  { %v4186_v11 = vadd.f32 %v1486_v5, %v1393_v52  ;;  %v1488_v31 = vpop.f32.mrb[22].mxu0  ;;  %v1397_v47 = vpop.f32.mrb[23].mxu1  ;;  %v4250_v52 = vmul.f32 %v4164_v15, %v4164_v15  ;;  %v4254_v5 = vmul.f32 %v4166_v17, %v4166_v17 }
 0x141   :  { %5077 = vst [vmem:[#allocation16_spill] sm:$0xff] %v4184_v4  ;;  %v4188_v43 = vadd.f32 %v1488_v31, %v1395_v23  ;;  %v1490_v57 = vpop.f32.mrb[23].mxu0  ;;  %v4258_v31 = vmul.f32 %v4168_v48, %v4168_v48 }
 0x142   :  { %5078 = vst [vmem:[#allocation17_spill] sm:$0xff] %v4186_v11  ;;  %v4190_v54 = vadd.f32 %v1490_v57, %v1397_v47  ;;  %v4262_v47 = vmul.f32 %v4170_v56, %v4170_v56  ;;  %v4266_v57 = vmul.f32 %v4172_v27, %v4172_v27  ;;  %v4306_v56 = vmul.f32 %v4174_v29, %v4174_v29 }
 0x143   :  { %5079 = vst [vmem:[#allocation18_spill] sm:$0xff] %v4188_v43 }
 0x144   :  { %5080 = vst [vmem:[#allocation19_spill] sm:$0xff] %v4190_v54 }
 0x195   :  { %v4196_v7 = vpop.f32.mrb[24].mxu1 }
 0x196   :  { %v4198_v59 = vpop.f32.mrb[24].mxu0  ;;  %v1867_v22 = vmul.f32 %v4196_v7, %v4196_v7  ;;  %v4208_v3 = vpop.f32.mrb[25].mxu1 }
 0x197   :  { %v1884_v1 = vmul.f32 %v4198_v59, %v4198_v59  ;;  %v4210_v30 = vpop.f32.mrb[25].mxu0  ;;  %v1883_v13 = vmul.f32 %v4208_v3, %v4208_v3  ;;  %v4220_v42 = vpop.f32.mrb[26].mxu1 }
 0x198   :  { %v1885_v14 = vmul.f32 %v4210_v30, %v4210_v30  ;;  %v4222_v16 = vpop.f32.mrb[26].mxu0  ;;  %v1870_v21 = vmul.f32 %v4220_v42, %v4220_v42  ;;  %v4230_v25 = vpop.f32.mrb[27].mxu1 }
 0x199   :  { %v1902_v46 = vadd.f32 %v1884_v1, %v1866_v55  ;;  %v1887_v24 = vmul.f32 %v4222_v16, %v4222_v16  ;;  %v4232_v26 = vpop.f32.mrb[27].mxu0  ;;  %v1901_v60 = vadd.f32 %v1883_v13, %v1865_v61  ;;  %v1886_v32 = vmul.f32 %v4230_v25, %v4230_v25 }
 0x19a   :  { %v1903_v28 = vadd.f32 %v1885_v14, %v1867_v22  ;;  %v1888_v6 = vmul.f32 %v4232_v26, %v4232_v26 }
 0x19b   :  { %v1974_v38 = vmax.f32 %v1902_v46, 1e-24  ;;  %v1905_v39 = vadd.f32 %v1887_v24, %v1869_v63  ;;  %v1973_v44 = vmax.f32 %v1901_v60, 1e-24  ;;  %v1904_v49 = vadd.f32 %v1886_v32, %v1868_v18 }
 0x19c   :  { %v1906_v51 = vadd.f32 %v1888_v6, %v1870_v21  ;;  %v1975_v23 = vmax.f32 %v1903_v28, 1e-24 }
 0x19d   :  { %3145 = vlog2.f32 %v1974_v38  ;;  %v4268_v61 = vpop.f32.mrb[28].mxu1  ;;  %v1977_v18 = vmax.f32 %v1905_v39, 1e-24  ;;  %v1976_v14 = vmax.f32 %v1904_v49, 1e-24 }
 0x19e   :  { %3147 = vrsqrt.f32 %v1974_v38  ;;  %v4270_v55 = vpop.f32.mrb[28].mxu0  ;;  %v1873_v63 = vmul.f32 %v4268_v61, %v4268_v61  ;;  %v4276_v1 = vpop.f32.mrb[29].mxu1  ;;  %v1978_v48 = vmax.f32 %v1906_v51, 1e-24 }
 0x19f   :  { %3149 = vlog2.f32 %v1973_v44  ;;  %v1890_v22 = vmul.f32 %v4270_v55, %v4270_v55  ;;  %v4278_v13 = vpop.f32.mrb[29].mxu0  ;;  %v1889_v46 = vmul.f32 %v4276_v1, %v4276_v1  ;;  %v4284_v24 = vpop.f32.mrb[30].mxu1 }
 0x1a0   :  { %3151 = vrsqrt.f32 %v1973_v44  ;;  %v1891_v21 = vmul.f32 %v4278_v13, %v4278_v13  ;;  %5081 = vst [vmem:[#allocation20_spill] sm:$0xff] %v4284_v24  ;;  %v4286_v60 = vpop.f32.mrb[30].mxu0  ;;  %v1876_v32 = vmul.f32 %v4284_v24, %v4284_v24  ;;  %v4292_v38 = vpop.f32.mrb[31].mxu1 }
 0x1a1   :  { %5082 = vst [vmem:[#allocation21_spill] sm:$0xff] %v4286_v60  ;;  %3153 = vlog2.f32 %v1975_v23  ;;  %v1908_v28 = vadd.f32 %v1890_v22, %v1872_v12  ;;  %v1893_v6 = vmul.f32 %v4286_v60, %v4286_v60  ;;  %5083 = vst [vmem:[#allocation22_spill] sm:$0xff] %v4292_v38  ;;  %v4294_v39 = vpop.f32.mrb[31].mxu0  ;;  %v1907_v44 = vadd.f32 %v1889_v46, %v1871_v9 }
 0x1a2   :  { %5084 = vst [vmem:[#allocation23_spill] sm:$0xff] %v4294_v39  ;;  %3155 = vrsqrt.f32 %v1975_v23  ;;  %v4296_v49 = vadd.f32 %v1891_v21, %v1873_v63  ;;  %v1892_v27 = vmul.f32 %v4292_v38, %v4292_v38  ;;  %v1894_v22 = vmul.f32 %v4294_v39, %v4294_v39 }
 0x1a3   :  { %3157 = vlog2.f32 %v1977_v18  ;;  %v4300_v12 = vadd.f32 %v1893_v6, %v1875_v36  ;;  %v4310_v23 = vmul.f32 %v4176_v33, %v4176_v33  ;;  %v4316_v63 = vmul.f32 %v4178_v50, %v4178_v50 }
 0x1a4   :  { %3159 = vrsqrt.f32 %v1977_v18  ;;  %v4312_v9 = vadd.f32 %v1892_v27, %v1874_v20  ;;  %v1980_v36 = vmax.f32 %v1908_v28, 1e-24  ;;  %v4318_v51 = vadd.f32 %v1894_v22, %v1876_v32 }
 0x1a5   :  { %3161 = vlog2.f32 %v1976_v14  ;;  %v4322_v46 = vmul.f32 %v4180_v40, %v4180_v40  ;;  %v4326_v21 = vmul.f32 %v4182_v45, %v4182_v45  ;;  %v4330_v27 = vmul.f32 %v4184_v4, %v4184_v4  ;;  %v4332_v20 = vpop.f32.mrb[32].mxu1 }
 0x1a6   :  { %3163 = vrsqrt.f32 %v1976_v14  ;;  %5088 = vst [vmem:[#allocation27_spill] sm:$0xff] %v4332_v20  ;;  %v4334_v18 = vpop.f32.mrb[32].mxu0  ;;  %v1979_v32 = vmax.f32 %v1907_v44, 1e-24  ;;  %v1879_v6 = vmul.f32 %v4332_v20, %v4332_v20  ;;  %v4340_v40 = vpop.f32.mrb[33].mxu1 }
 0x1a7   :  { %5085 = vst [vmem:[#allocation24_spill] sm:$0xff] %v4322_v46  ;;  %5086 = vst [vmem:[#allocation25_spill] sm:$0xff] %v4326_v21  ;;  %v3146_v28 = vpop.eup %3145  ;;  %3165 = vlog2.f32 %v1978_v48  ;;  %v1896_v22 = vmul.f32 %v4334_v18, %v4334_v18  ;;  %v4342_v45 = vpop.f32.mrb[33].mxu0  ;;  %v1895_v33 = vmul.f32 %v4340_v40, %v4340_v40  ;;  %v1981_v54 = vmax.f32 %v4296_v49, 1e-24 }
 0x1a8   :  { %5087 = vst [vmem:[#allocation26_spill] sm:$0xff] %v4330_v27  ;;  %5089 = vst [vmem:[#allocation28_spill] sm:$0xff] %v4334_v18  ;;  %v4344_v4 = vpop.eup %3147  ;;  %v1994_v14 = vmul.f32 0.6931472, %v3146_v28  ;;  %3167 = vrsqrt.f32 %v1978_v48  ;;  %v1897_v44 = vmul.f32 %v4342_v45, %v4342_v45  ;;  %v4350_v50 = vpop.f32.mrb[34].mxu1 }
 0x1a9   :  { %5090 = vst [vmem:[#allocation29_spill] sm:$0xff] %v4340_v40  ;;  %5091 = vst [vmem:[#allocation30_spill] sm:$0xff] %v4342_v45  ;;  %v4352_v29 = vpop.f32.mrb[34].mxu0  ;;  %v3150_v15 = vpop.eup %3149  ;;  %3169 = vlog2.f32 %v1980_v36  ;;  %v4356_v17 = vadd.f32 %v1896_v22, %v4246_v41  ;;  %v4367_v8 = vadd.f32 %v1895_v33, %v4242_v37  ;;  %v1983_v41 = vmax.f32 %v4300_v12, 1e-24 }
 0x1aa   :  { %5092 = vst [vmem:[#allocation31_spill] sm:$0xff] %v4350_v50  ;;  %5093 = vst [vmem:[#allocation32_spill] sm:$0xff] %v4352_v29  ;;  %v1899_v48 = vmul.f32 %v4352_v29, %v4352_v29  ;;  %v4360_v28 = vpop.f32.mrb[35].mxu1  ;;  %v4362_v20 = vpop.f32.mrb[35].mxu0  ;;  %v2028_v45 = vmul.f32 0.15, %v1994_v14  ;;  %3171 = vrsqrt.f32 %v1980_v36  ;;  %v4370_v49 = vadd.f32 %v1897_v44, %v1879_v6 }
 0x1ab   :  { %5094 = vst [vmem:[#allocation33_spill] sm:$0xff] %v4360_v28  ;;  %5095 = vst [vmem:[#allocation34_spill] sm:$0xff] %v4362_v20  ;;  %v4364_v27 = vpop.eup %3151  ;;  %v1992_v40 = vmul.f32 0.6931472, %v3150_v15  ;;  %3173 = vlog2.f32 %v1979_v32  ;;  %v1982_v33 = vmax.f32 %v4312_v9, 1e-24  ;;  %v1882_v12 = vmul.f32 %v4350_v50, %v4350_v50 }
 0x1ac   :  { %v3154_v18 = vpop.eup %3153  ;;  %v4373_v22 = vadd.f32 %v1899_v48, %v4254_v5  ;;  %v2047_v34 = vmul.f32 1.442695, %v2028_v45  ;;  %3175 = vrsqrt.f32 %v1979_v32  ;;  %v1898_v45 = vmul.f32 %v4360_v28, %v4360_v28 }
 0x1ad   :  { %v4375_v29 = vpop.eup %3155  ;;  %v2027_v39 = vmul.f32 0.15, %v1992_v40  ;;  %v1996_v24 = vmul.f32 0.6931472, %v3154_v18  ;;  %3177 = vlog2.f32 %v1981_v54  ;;  %v1900_v9 = vmul.f32 %v4362_v20, %v4362_v20  ;;  %v4388_v18 = vpop.f32.mrb[36].mxu1 }
 0x1ae   :  { %v3158_v15 = vpop.eup %3157  ;;  %3179 = vpow2.f32 %v2047_v34  ;;  %5096 = vst [vmem:[#allocation35_spill] sm:$0xff] %v4388_v18  ;;  %v4390_v32 = vpop.f32.mrb[36].mxu0  ;;  %v4396_v40 = vadd.f32 %v1898_v45, %v4250_v52  ;;  %v1921_v52 = vmul.f32 %v4388_v18, %v4388_v18 }
 0x1af   :  { %v4381_v36 = vpop.eup %3159  ;;  %v2045_v5 = vmul.f32 1.442695, %v2027_v39  ;;  %v2029_v6 = vmul.f32 0.15, %v1996_v24  ;;  %v2000_v14 = vmul.f32 0.6931472, %v3158_v15  ;;  %3181 = vrsqrt.f32 %v1981_v54 }
 0x1b0   :  { %v3162_v44 = vpop.eup %3161  ;;  %5097 = vst [vmem:[#allocation36_spill] sm:$0xff] %v4390_v32  ;;  %v4398_v37 = vadd.f32 %v1900_v9, %v1882_v12  ;;  %v4400_v20 = vpop.f32.mrb[37].mxu1  ;;  %v1938_v12 = vmul.f32 %v4390_v32, %v4390_v32 }
 0x1b1   :  { %v4392_v48 = vpop.eup %3163  ;;  %3183 = vpow2.f32 %v2045_v5  ;;  %v2049_v34 = vmul.f32 1.442695, %v2029_v6  ;;  %v2031_v24 = vmul.f32 0.15, %v2000_v14  ;;  %v1998_v39 = vmul.f32 0.6931472, %v3162_v44 }
 0x1b2   :  { %v3166_v15 = vpop.eup %3165  ;;  %3185 = vlog2.f32 %v1983_v41  ;;  %5098 = vst [vmem:[#allocation37_spill] sm:$0xff] %v4400_v20  ;;  %v4402_v50 = vpop.f32.mrb[37].mxu0  ;;  %v1937_v46 = vmul.f32 %v4400_v20, %v4400_v20 }
 0x1b3   :  { %5099 = vst [vmem:[#allocation38_spill] sm:$0xff] %v4402_v50  ;;  %v4404_v28 = vpop.eup %3167  ;;  %3187 = vpow2.f32 %v2049_v34  ;;  %v2053_v5 = vmul.f32 1.442695, %v2031_v24  ;;  %v2030_v6 = vmul.f32 0.15, %v1998_v39  ;;  %v4411_v45 = vpop.f32.mrb[38].mxu1  ;;  %v1939_v18 = vmul.f32 %v4402_v50, %v4402_v50 }
 0x1b4   :  { %v2002_v14 = vmul.f32 0.6931472, %v3166_v15  ;;  %v3170_v44 = vpop.eup %3169  ;;  %3189 = vrsqrt.f32 %v1983_v41  ;;  %5100 = vst [vmem:[#allocation39_spill] sm:$0xff] %v4411_v45  ;;  %v4413_v9 = vpop.f32.mrb[38].mxu0  ;;  %v4418_v41 = vadd.f32 %v1938_v12, %v4262_v47  ;;  %v4432_v12 = vadd.f32 %v1937_v46, %v4258_v31 }
 0x1b5   :  { %5101 = vst [vmem:[#allocation40_spill] sm:$0xff] %v4413_v9  ;;  %v4415_v54 = vpop.eup %3171  ;;  %3191 = vpow2.f32 %v2053_v5  ;;  %v2051_v34 = vmul.f32 1.442695, %v2030_v6  ;;  %v2006_v39 = vmul.f32 0.6931472, %v3170_v44  ;;  %v4424_v32 = vpop.f32.mrb[39].mxu1  ;;  %v4434_v20 = vadd.f32 %v1939_v18, %v1921_v52 }
 0x1b6   :  { %v2032_v24 = vmul.f32 0.15, %v2002_v14  ;;  %v3174_v15 = vpop.eup %3173  ;;  %3193 = vlog2.f32 %v1982_v33  ;;  %5102 = vst [vmem:[#allocation41_spill] sm:$0xff] %v4424_v32  ;;  %v4426_v21 = vpop.f32.mrb[39].mxu0  ;;  %v5106_v31 = vmax.f32 %v4318_v51, 1e-24 }
 0x1b7   :  { %5103 = vst [vmem:[#allocation42_spill] sm:$0xff] %v4426_v21  ;;  %v4428_v38 = vpop.eup %3175  ;;  %3195 = vpow2.f32 %v2051_v34  ;;  %v2034_v6 = vmul.f32 0.15, %v2006_v39  ;;  %v2004_v14 = vmul.f32 0.6931472, %v3174_v15  ;;  %v4436_v50 = vpop.f32.mrb[40].mxu1 }
 0x1b8   :  { %v2055_v5 = vmul.f32 1.442695, %v2032_v24  ;;  %v3178_v44 = vpop.eup %3177  ;;  %3197 = vrsqrt.f32 %v1982_v33  ;;  %5104 = vst [vmem:[#allocation43_spill] sm:$0xff] %v4436_v50  ;;  %v4438_v0 = vpop.f32.mrb[40].mxu0 }
 0x1b9   :  { %v4440_v60 = vpop.eup %3179  ;;  %v2059_v34 = vmul.f32 1.442695, %v2034_v6  ;;  %v2033_v24 = vmul.f32 0.15, %v2004_v14  ;;  %v2008_v39 = vmul.f32 0.6931472, %v3178_v44  ;;  %v4458_v6 = vmul.f32 %v4186_v11, %v4186_v11 }
 0x1ba   :  { %5105 = vst [vmem:[#allocation44_spill] sm:$0xff] %v4440_v60  ;;  %3199 = vpow2.f32 %v2055_v5  ;;  %v4442_v15 = vpop.eup %3181  ;;  %v2270_v33 = vmul.f32 %v4440_v60, %v4344_v4  ;;  %v4450_v52 = vpop.f32.mrb[41].mxu1  ;;  %v5109_v11 = vmax.f32 %v4318_v51, 1e-24 }
 0x1bb   :  { %3201 = vlog2.f32 %v5106_v31  ;;  %v4452_v47 = vpop.f32.mrb[41].mxu0  ;;  %v4454_v5 = vpop.eup %3183  ;;  %5107 = vst [vmem:[#allocation45_spill] sm:$0xff] %v4458_v6  ;;  %v2057_v14 = vmul.f32 1.442695, %v2033_v24  ;;  %v2035_v4 = vmul.f32 0.15, %v2008_v39 }
 0x1bc   :  { %3203 = vpow2.f32 %v2059_v34  ;;  %v4460_v44 = vpop.f32.mrb[42].mxu1  ;;  %v4462_v31 = vpop.f32.mrb[42].mxu0  ;;  %v4465_v18 = vmul.f32 %v2270_v33, %v4146_v35  ;;  %v4468_v60 = vmul.f32 %v2270_v33, %v4198_v59  ;;  %v2269_v2 = vmul.f32 %v4454_v5, %v4364_v27 }
 0x1bd   :  { %5108 = vst [vmem:[#allocation46_spill] sm:$0xff] %v4460_v44  ;;  %v3186_v46 = vpop.eup %3185  ;;  %3205 = vrsqrt.f32 %v5109_v11  ;;  %v4474_v34 = vpop.f32.mrb[43].mxu1  ;;  %v2061_v6 = vmul.f32 1.442695, %v2035_v4  ;;  %v1941_v35 = vmul.f32 %v4413_v9, %v4413_v9  ;;  %v5114_v27 = vmax.f32 %v4356_v17, 1e-24 }
 0x1be   :  { %5110 = vst [vmem:[#allocation47_spill] sm:$0xff] %v4474_v34  ;;  %v4476_v24 = vpop.f32.mrb[43].mxu0  ;;  %v4478_v39 = vpop.eup %3187  ;;  %3207 = vpow2.f32 %v2057_v14  ;;  %v2012_v44 = vmul.f32 0.6931472, %v3186_v46  ;;  %v4485_v33 = vmul.f32 %v2269_v2, %v4144_v19  ;;  %v4488_v51 = vmul.f32 %v2269_v2, %v4208_v3 }
 0x1bf   :  { %5111 = vst [vmem:[#allocation48_spill] sm:$0xff] %v4476_v24  ;;  %v4482_v59 = vpop.eup %3189  ;;  %v2271_v11 = vmul.f32 %v4478_v39, %v4375_v29  ;;  %3209 = vlog2.f32 %v5114_v27  ;;  %v4497_v4 = vadd.f32 %v1941_v35, %v4306_v56  ;;  %v1940_v19 = vmul.f32 %v4424_v32, %v4424_v32  ;;  %v4501_v9 = vpop.f32.mrb[44].mxu1 }
 0x1c0   :  { %5112 = vst [vmem:[#allocation49_spill] sm:$0xff] %v4485_v33  ;;  %5113 = vst [vmem:[#allocation50_spill] sm:$0xff] %v4488_v51  ;;  %v4494_v14 = vpop.eup %3191  ;;  %3211 = vpow2.f32 %v2061_v6  ;;  %v2037_v46 = vmul.f32 0.15, %v2012_v44  ;;  %v4503_v2 = vpop.f32.mrb[44].mxu0 }
 0x1c1   :  { %5115 = vst [vmem:[#allocation51_spill] sm:$0xff] %v4494_v14  ;;  %5116 = vst [vmem:[#allocation52_spill] sm:$0xff] %v4501_v9  ;;  %v3194_v3 = vpop.eup %3193  ;;  %v4506_v29 = vmul.f32 %v2271_v11, %v4196_v7  ;;  %v4509_v27 = vmul.f32 %v2271_v11, %v4210_v30  ;;  %v2273_v6 = vmul.f32 %v4494_v14, %v4381_v36  ;;  %v5118_v56 = vmax.f32 %v4356_v17, 1e-24  ;;  %v4515_v44 = vpop.f32.mrb[45].mxu1 }
 0x1c2   :  { %5117 = vst [vmem:[#allocation53_spill] sm:$0xff] %v4503_v2  ;;  %5119 = vst [vmem:[#allocation54_spill] sm:$0xff] %v4515_v44  ;;  %v4517_v35 = vpop.f32.mrb[45].mxu0  ;;  %v4519_v32 = vpop.eup %3195  ;;  %v2065_v51 = vmul.f32 1.442695, %v2037_v46  ;;  %v1924_v30 = vmul.f32 %v4411_v45, %v4411_v45 }
 0x1c3   :  { %3213 = vrsqrt.f32 %v5118_v56  ;;  %5120 = vst [vmem:[#allocation55_spill] sm:$0xff] %v4517_v35  ;;  %5121 = vst [vmem:[#allocation56_spill] sm:$0xff] %v4519_v32  ;;  %v2010_v33 = vmul.f32 0.6931472, %v3194_v3  ;;  %v5122_v7 = vmax.f32 %v4367_v8, 1e-24  ;;  %v4525_v11 = vpop.eup %3197  ;;  %v4528_v36 = vmul.f32 %v2273_v6, %v4150_v10 }
 0x1c4   :  { %v4531_v17 = vmul.f32 %v2273_v6, %v4222_v16  ;;  %v2272_v56 = vmul.f32 %v4519_v32, %v4392_v48  ;;  %v4537_v3 = vpop.f32.mrb[46].mxu1  ;;  %v4541_v14 = vpop.eup %3199  ;;  %v4544_v10 = vadd.f32 %v1940_v19, %v4266_v57  ;;  %v1942_v16 = vmul.f32 %v4426_v21, %v4426_v21 }
 0x1c5   :  { %3215 = vlog2.f32 %v5122_v7  ;;  %5123 = vst [vmem:[#allocation57_spill] sm:$0xff] %v4528_v36  ;;  %v5125_v46 = vmov %v5122_v7  ;;  %5126 = vst [vmem:[#allocation59_spill] sm:$0xff] %v4537_v3  ;;  %v4539_v7 = vpop.f32.mrb[46].mxu0  ;;  %v2036_v45 = vmul.f32 0.15, %v2010_v33  ;;  %v4548_v6 = vpop.f32.mrb[47].mxu1  ;;  %v2274_v33 = vmul.f32 %v4541_v14, %v4404_v28 }
 0x1c6   :  { %5124 = vst [vmem:[#allocation58_spill] sm:$0xff] %v4531_v17  ;;  %3217 = vrsqrt.f32 %v5125_v46  ;;  %5127 = vst [vmem:[#allocation60_spill] sm:$0xff] %v4539_v7  ;;  %v4550_v48 = vpop.f32.mrb[47].mxu0  ;;  %v3202_v8 = vpop.eup %3201  ;;  %v4553_v46 = vmul.f32 %v2272_v56, %v4148_v53  ;;  %v4556_v17 = vmul.f32 %v2272_v56, %v4230_v25  ;;  %v5129_v57 = vmax.f32 %v4370_v49, 1e-24 }
 0x1c7   :  { %3219 = vpow2.f32 %v2065_v51  ;;  %5128 = vst [vmem:[#allocation61_spill] sm:$0xff] %v4548_v6  ;;  %v4562_v51 = vpop.eup %3203  ;;  %v2063_v19 = vmul.f32 1.442695, %v2036_v45  ;;  %v2014_v21 = vmul.f32 0.6931472, %v3202_v8  ;;  %v4570_v25 = vmul.f32 %v2274_v33, %v4220_v42 }
 0x1c8   :  { %3221 = vlog2.f32 %v5129_v57  ;;  %v5130_v36 = vmov %v5129_v57  ;;  %v2082_v32 = vmax.f32 %v4418_v41, 1e-24  ;;  %v4567_v53 = vpop.eup %3205  ;;  %v4573_v56 = vmul.f32 %v2274_v33, %v4232_v26 }
 0x1c9   :  { %3223 = vrsqrt.f32 %v5130_v36  ;;  %v2276_v28 = vmul.f32 %v4562_v51, %v4415_v54  ;;  %v5131_v57 = vmax.f32 %v4373_v22, 1e-24  ;;  %v4579_v45 = vpop.eup %3207  ;;  %v2038_v49 = vmul.f32 0.15, %v2014_v21 }
 0x1ca   :  { %v2081_v41 = vmax.f32 %v4432_v12, 1e-24  ;;  %v4582_v36 = vadd.f32 %v1942_v16, %v1924_v30  ;;  %v3210_v8 = vpop.eup %3209  ;;  %v2275_v54 = vmul.f32 %v4579_v45, %v4428_v38  ;;  %v5133_v12 = vmax.f32 %v4396_v40, 1e-24 }
 0x1cb   :  { %3225 = vlog2.f32 %v5131_v57  ;;  %v4585_v42 = vmul.f32 %v2276_v28, %v4154_v62  ;;  %v4588_v26 = vmul.f32 %v2276_v28, %v4270_v55  ;;  %v5132_v33 = vmov %v5131_v57  ;;  %v4594_v57 = vpop.eup %3211 }
 0x1cc   :  { %3227 = vpow2.f32 %v2063_v19  ;;  %v2067_v21 = vmul.f32 1.442695, %v2038_v49  ;;  %v2018_v19 = vmul.f32 0.6931472, %v3210_v8  ;;  %v1927_v62 = vmul.f32 %v4436_v50, %v4436_v50 }
 0x1cd   :  { %3229 = vrsqrt.f32 %v5132_v33  ;;  %v4600_v30 = vpop.eup %3213  ;;  %v4603_v55 = vmul.f32 %v2275_v54, %v4152_v58  ;;  %v4606_v38 = vmul.f32 %v2275_v54, %v4276_v1  ;;  %v2277_v22 = vmul.f32 %v4594_v57, %v4442_v15 }
 0x1ce   :  { %3231 = vlog2.f32 %v5133_v12  ;;  %v5134_v16 = vmov %v5133_v12  ;;  %v2040_v49 = vmul.f32 0.15, %v2018_v19  ;;  %v1944_v8 = vmul.f32 %v4438_v0, %v4438_v0 }
 0x1cf   :  { %3233 = vrsqrt.f32 %v5134_v16  ;;  %v3216_v28 = vpop.eup %3215  ;;  %v1943_v33 = vmul.f32 %v4450_v52, %v4450_v52  ;;  %v4619_v1 = vmul.f32 %v2277_v22, %v4268_v61  ;;  %v4622_v54 = vmul.f32 %v2277_v22, %v4278_v13 }
 0x1d0   :  { %3235 = vpow2.f32 %v2067_v21  ;;  %v4616_v58 = vpop.eup %3217  ;;  %v2016_v15 = vmul.f32 0.6931472, %v3216_v28  ;;  %v5137_v40 = vmax.f32 %v4398_v37, 1e-24  ;;  %v2071_v19 = vmul.f32 1.442695, %v2040_v49 }
 0x1d1   :  { %5135 = vst [vmem:[#allocation62_spill] sm:$0xff] %v4619_v1  ;;  %5136 = vst [vmem:[#allocation63_spill] sm:$0xff] %v4622_v54  ;;  %v4626_v21 = vpop.eup %3219  ;;  %v4631_v16 = vadd.f32 %v1944_v8, %v4316_v63  ;;  %v4634_v50 = vadd.f32 %v1943_v33, %v4310_v23  ;;  %v1945_v28 = vmul.f32 %v4452_v47, %v4452_v47  ;;  %v2083_v23 = vmax.f32 %v4434_v20, 1e-24  ;;  %v5140_v8 = vld [vmem:[#allocation3_spill] sm:$0xff] }
 0x1d2   :  { %3237 = vlog2.f32 %v5137_v40  ;;  %5138 = vst [vmem:[#allocation64_spill] sm:$0xff] %v4626_v21  ;;  %v5139_v12 = vmov %v5137_v40  ;;  %v3222_v61 = vpop.eup %3221  ;;  %v2279_v13 = vmul.f32 %v4626_v21, %v4482_v59  ;;  %v2039_v22 = vmul.f32 0.15, %v2016_v15  ;;  %v5142_v59 = vld [vmem:[#allocation21_spill] sm:$0xff] }
 0x1d3   :  { %3239 = vrsqrt.f32 %v5139_v12  ;;  %v4640_v40 = vpop.eup %3223  ;;  %v4644_v37 = vmul.f32 %v4188_v43, %v4188_v43  ;;  %v2020_v63 = vmul.f32 0.6931472, %v3222_v61  ;;  %v4655_v43 = vadd.f32 %v1945_v28, %v1927_v62  ;;  %v5146_v28 = vld [vmem:[#allocation2_spill] sm:$0xff] }
 0x1d4   :  { %3241 = vlog2.f32 %v2082_v32  ;;  %v4648_v33 = vmul.f32 %v2279_v13, %v5140_v8  ;;  %v4651_v15 = vmul.f32 %v2279_v13, %v5142_v59  ;;  %v2069_v12 = vmul.f32 1.442695, %v2039_v22 }
 0x1d5   :  { %3243 = vpow2.f32 %v2071_v19  ;;  %v3226_v49 = vpop.eup %3225  ;;  %v2041_v1 = vmul.f32 0.15, %v2020_v63  ;;  %v2085_v61 = vmax.f32 %v4497_v4, 1e-24  ;;  %v1947_v13 = vmul.f32 %v4462_v31, %v4462_v31  ;;  %v5145_v63 = vld [vmem:[#allocation46_spill] sm:$0xff] }
 0x1d6   :  { %5141 = vst [vmem:[#allocation3_spill] sm:$0xff] %v4648_v33  ;;  %5143 = vst [vmem:[#allocation21_spill] sm:$0xff] %v4651_v15  ;;  %3245 = vrsqrt.f32 %v2082_v32  ;;  %v4653_v54 = vpop.eup %3227  ;;  %v2024_v21 = vmul.f32 0.6931472, %v3226_v49  ;;  %v1930_v49 = vmul.f32 %v5145_v63, %v5145_v63  ;;  %v5148_v15 = vld [vmem:[#allocation22_spill] sm:$0xff]  ;;  %v5155_v33 = vld [vmem:[#allocation23_spill] sm:$0xff] }
 0x1d7   :  { %5144 = vst [vmem:[#allocation65_spill] sm:$0xff] %v4653_v54  ;;  %3247 = vlog2.f32 %v2081_v41  ;;  %v4657_v19 = vpop.eup %3229  ;;  %v2278_v20 = vmul.f32 %v4653_v54, %v4525_v11  ;;  %v2073_v32 = vmul.f32 1.442695, %v2041_v1  ;;  %v5151_v1 = vld [vmem:[#allocation25_spill] sm:$0xff] }
 0x1d8   :  { %3249 = vpow2.f32 %v2069_v12  ;;  %v3232_v22 = vpop.eup %3231  ;;  %v2043_v8 = vmul.f32 0.15, %v2024_v21  ;;  %v4677_v21 = vadd.f32 %v1947_v13, %v5151_v1  ;;  %v5152_v13 = vld [vmem:[#allocation24_spill] sm:$0xff] }
 0x1d9   :  { %3251 = vrsqrt.f32 %v2081_v41  ;;  %v4666_v62 = vpop.eup %3233  ;;  %v4669_v59 = vmul.f32 %v2278_v20, %v5146_v28  ;;  %v4672_v11 = vmul.f32 %v2278_v20, %v5148_v15  ;;  %v2022_v12 = vmul.f32 0.6931472, %v3232_v22 }
 0x1da   :  { %3253 = vlog2.f32 %v2083_v23  ;;  %v4674_v4 = vpop.eup %3235  ;;  %v2077_v54 = vmul.f32 1.442695, %v2043_v8  ;;  %v1946_v41 = vmul.f32 %v4474_v34, %v4474_v34  ;;  %v1948_v15 = vmul.f32 %v4476_v24, %v4476_v24 }
 0x1db   :  { %5147 = vst [vmem:[#allocation2_spill] sm:$0xff] %v4669_v59  ;;  %5149 = vst [vmem:[#allocation22_spill] sm:$0xff] %v4672_v11  ;;  %3255 = vpow2.f32 %v2073_v32  ;;  %v2280_v28 = vmul.f32 %v4674_v4, %v4567_v53  ;;  %v2042_v59 = vmul.f32 0.15, %v2022_v12  ;;  %v2084_v32 = vmax.f32 %v4544_v10, 1e-24 }
 0x1dc   :  { %5150 = vst [vmem:[#allocation66_spill] sm:$0xff] %v4674_v4  ;;  %v3238_v63 = vpop.eup %3237  ;;  %3257 = vrsqrt.f32 %v2083_v23  ;;  %v4689_v8 = vadd.f32 %v1946_v41, %v5152_v13  ;;  %v5153_v11 = vld [vmem:[#allocation20_spill] sm:$0xff]  ;;  %v4705_v41 = vadd.f32 %v1948_v15, %v1930_v49 }
 0x1dd   :  { %v4685_v20 = vpop.eup %3239  ;;  %3259 = vpow2.f32 %v2077_v54  ;;  %v2026_v22 = vmul.f32 0.6931472, %v3238_v63  ;;  %v4692_v34 = vmul.f32 %v2280_v28, %v5153_v11  ;;  %v4695_v53 = vmul.f32 %v2280_v28, %v5155_v33 }
 0x1de   :  { %v3242_v1 = vpop.eup %3241  ;;  %v2075_v23 = vmul.f32 1.442695, %v2042_v59  ;;  %3261 = vlog2.f32 %v2085_v61  ;;  %v2086_v54 = vmax.f32 %v4582_v36, 1e-24  ;;  %v2088_v11 = vmax.f32 %v4631_v16, 1e-24 }
 0x1df   :  { %5154 = vst [vmem:[#allocation25_spill] sm:$0xff] %v4692_v34  ;;  %5156 = vst [vmem:[#allocation24_spill] sm:$0xff] %v4695_v53  ;;  %v4697_v12 = vpop.eup %3243  ;;  %v2044_v24 = vmul.f32 0.15, %v2026_v22  ;;  %v2102_v4 = vmul.f32 0.6931472, %v3242_v1  ;;  %3263 = vrsqrt.f32 %v2085_v61  ;;  %v1950_v22 = vmul.f32 %v4503_v2, %v4503_v2 }
 0x1e0   :  { %v4700_v10 = vpop.eup %3245  ;;  %v2282_v63 = vmul.f32 %v4697_v12, %v4600_v30  ;;  %3265 = vpow2.f32 %v2075_v23  ;;  %v5158_v36 = vld [vmem:[#allocation5_spill] sm:$0xff]  ;;  %v5160_v1 = vld [vmem:[#allocation28_spill] sm:$0xff] }
 0x1e1   :  { %v3248_v33 = vpop.eup %3247  ;;  %v2079_v59 = vmul.f32 1.442695, %v2044_v24  ;;  %v2136_v28 = vmul.f32 0.15, %v2102_v4  ;;  %3267 = vlog2.f32 %v2084_v32  ;;  %v2087_v4 = vmax.f32 %v4634_v50, 1e-24 }
 0x1e2   :  { %v4709_v61 = vpop.eup %3249  ;;  %v4712_v13 = vmul.f32 %v2282_v63, %v5158_v36  ;;  %v4715_v53 = vmul.f32 %v2282_v63, %v5160_v1  ;;  %v2100_v30 = vmul.f32 0.6931472, %v3248_v33  ;;  %3269 = vrsqrt.f32 %v2084_v32  ;;  %v5162_v2 = vld [vmem:[#allocation45_spill] sm:$0xff]  ;;  %v5164_v32 = vld [vmem:[#allocation4_spill] sm:$0xff] }
 0x1e3   :  { %5157 = vst [vmem:[#allocation20_spill] sm:$0xff] %v4709_v61  ;;  %v4717_v16 = vpop.eup %3251  ;;  %v2281_v24 = vmul.f32 %v4709_v61, %v4616_v58  ;;  %3271 = vpow2.f32 %v2079_v59  ;;  %v2155_v49 = vmul.f32 1.442695, %v2136_v28  ;;  %v4723_v36 = vadd.f32 %v1950_v22, %v5162_v2  ;;  %v5198_v61 = vld [vmem:[#allocation38_spill] sm:$0xff] }
 0x1e4   :  { %5159 = vst [vmem:[#allocation23_spill] sm:$0xff] %v4712_v13  ;;  %5161 = vst [vmem:[#allocation5_spill] sm:$0xff] %v4715_v53  ;;  %v3254_v15 = vpop.eup %3253  ;;  %v2135_v23 = vmul.f32 0.15, %v2100_v30  ;;  %3273 = vlog2.f32 %v2086_v54  ;;  %v1949_v63 = vmul.f32 %v4515_v44, %v4515_v44  ;;  %v5166_v53 = vld [vmem:[#allocation29_spill] sm:$0xff]  ;;  %v1933_v22 = vmul.f32 %v4501_v9, %v4501_v9 }
 0x1e5   :  { %v4727_v33 = vpop.eup %3255  ;;  %v4730_v1 = vmul.f32 %v2281_v24, %v5164_v32  ;;  %v4733_v58 = vmul.f32 %v2281_v24, %v5166_v53  ;;  %3275 = vpow2.f32 %v2155_v49  ;;  %v2104_v59 = vmul.f32 0.6931472, %v3254_v15  ;;  %v5169_v32 = vld [vmem:[#allocation26_spill] sm:$0xff]  ;;  %v5170_v49 = vld [vmem:[#allocation27_spill] sm:$0xff] }
 0x1e6   :  { %5163 = vst [vmem:[#allocation28_spill] sm:$0xff] %v4727_v33  ;;  %v4735_v50 = vpop.eup %3257  ;;  %v2283_v28 = vmul.f32 %v4727_v33, %v4640_v40  ;;  %v2153_v2 = vmul.f32 1.442695, %v2135_v23  ;;  %3277 = vrsqrt.f32 %v2086_v54  ;;  %v1951_v53 = vmul.f32 %v4517_v35, %v4517_v35  ;;  %v5172_v40 = vld [vmem:[#allocation30_spill] sm:$0xff]  ;;  %v5175_v35 = vld [vmem:[#allocation7_spill] sm:$0xff] }
 0x1e7   :  { %5165 = vst [vmem:[#allocation45_spill] sm:$0xff] %v4730_v1  ;;  %5167 = vst [vmem:[#allocation4_spill] sm:$0xff] %v4733_v58  ;;  %v4741_v30 = vpop.eup %3259  ;;  %v2137_v44 = vmul.f32 0.15, %v2104_v59  ;;  %3279 = vlog2.f32 %v2088_v11  ;;  %v4744_v1 = vadd.f32 %v1949_v63, %v5169_v32  ;;  %v2089_v63 = vmax.f32 %v4655_v43, 1e-24 }
 0x1e8   :  { %5168 = vst [vmem:[#allocation29_spill] sm:$0xff] %v4741_v30  ;;  %v3262_v24 = vpop.eup %3261  ;;  %v4749_v15 = vmul.f32 %v2283_v28, %v5170_v49  ;;  %v4752_v23 = vmul.f32 %v2283_v28, %v5172_v40  ;;  %v2285_v54 = vmul.f32 %v4741_v30, %v4657_v19  ;;  %3281 = vpow2.f32 %v2153_v2  ;;  %v5177_v49 = vld [vmem:[#allocation32_spill] sm:$0xff]  ;;  %v5179_v2 = vld [vmem:[#allocation19_spill] sm:$0xff]  ;;  %v5183_v30 = vld [vmem:[#allocation33_spill] sm:$0xff] }
 0x1e9   :  { %v4756_v33 = vpop.eup %3263  ;;  %v2157_v59 = vmul.f32 1.442695, %v2137_v44  ;;  %v2108_v9 = vmul.f32 0.6931472, %v3262_v24  ;;  %3283 = vrsqrt.f32 %v2088_v11  ;;  %v4767_v28 = vadd.f32 %v1951_v53, %v1933_v22  ;;  %v5181_v53 = vld [vmem:[#allocation6_spill] sm:$0xff] }
 0x1ea   :  { %5171 = vst [vmem:[#allocation26_spill] sm:$0xff] %v4749_v15  ;;  %5173 = vst [vmem:[#allocation27_spill] sm:$0xff] %v4752_v23  ;;  %v4759_v32 = vpop.eup %3265  ;;  %v4762_v58 = vmul.f32 %v2285_v54, %v5175_v35  ;;  %v4765_v15 = vmul.f32 %v2285_v54, %v5177_v49  ;;  %3285 = vlog2.f32 %v2087_v4  ;;  %v1935_v40 = vmul.f32 %v5179_v2, %v5179_v2 }
 0x1eb   :  { %5174 = vst [vmem:[#allocation30_spill] sm:$0xff] %v4759_v32  ;;  %v3268_v19 = vpop.eup %3267  ;;  %v2284_v44 = vmul.f32 %v4759_v32, %v4666_v62  ;;  %3287 = vpow2.f32 %v2157_v59  ;;  %v2139_v43 = vmul.f32 0.15, %v2108_v9  ;;  %v1953_v54 = vmul.f32 %v4539_v7, %v4539_v7  ;;  %v5194_v7 = vld [vmem:[#allocation37_spill] sm:$0xff] }
 0x1ec   :  { %5176 = vst [vmem:[#allocation7_spill] sm:$0xff] %v4762_v58  ;;  %5178 = vst [vmem:[#allocation32_spill] sm:$0xff] %v4765_v15  ;;  %v4773_v11 = vpop.eup %3269  ;;  %v2106_v24 = vmul.f32 0.6931472, %v3268_v19  ;;  %3289 = vrsqrt.f32 %v2087_v4 }
 0x1ed   :  { %v4778_v22 = vpop.eup %3271  ;;  %v4781_v49 = vmul.f32 %v2284_v44, %v5181_v53  ;;  %v4784_v15 = vmul.f32 %v2284_v44, %v5183_v30  ;;  %v2161_v62 = vmul.f32 1.442695, %v2139_v43  ;;  %3291 = vlog2.f32 %v2089_v63  ;;  %v5185_v30 = vld [vmem:[#allocation31_spill] sm:$0xff]  ;;  %v5187_v43 = vld [vmem:[#allocation34_spill] sm:$0xff] }
 0x1ee   :  { %5180 = vst [vmem:[#allocation67_spill] sm:$0xff] %v4778_v22  ;;  %v3274_v9 = vpop.eup %3273  ;;  %v2286_v59 = vmul.f32 %v4778_v22, %v4685_v20  ;;  %v2138_v4 = vmul.f32 0.15, %v2106_v24  ;;  %3293 = vrsqrt.f32 %v2089_v63  ;;  %v4788_v19 = vadd.f32 %v1953_v54, %v1935_v40  ;;  %v5189_v20 = vld [vmem:[#allocation44_spill] sm:$0xff] }
 0x1ef   :  { %5182 = vst [vmem:[#allocation6_spill] sm:$0xff] %v4781_v49  ;;  %5184 = vst [vmem:[#allocation33_spill] sm:$0xff] %v4784_v15  ;;  %v3276_v35 = vpop.eup %3275  ;;  %3295 = vpow2.f32 %v2161_v62  ;;  %v2110_v32 = vmul.f32 0.6931472, %v3274_v9  ;;  %v5190_v9 = vmax.f32 %v4677_v21, 1e-24  ;;  %v4806_v53 = vmul.f32 %v4537_v3, %v4537_v3 }
 0x1f0   :  { %v4792_v49 = vpop.eup %3277  ;;  %v4795_v44 = vmul.f32 %v2286_v59, %v5185_v30  ;;  %v4798_v15 = vmul.f32 %v2286_v59, %v5187_v43  ;;  %v2190_v24 = vsub.f32 %v5189_v20, %v3276_v35  ;;  %v2306_v63 = vmul.f32 %v3276_v35, %v4700_v10  ;;  %v5192_v59 = vld [vmem:[#allocation36_spill] sm:$0xff] }
 0x1f1   :  { %v3280_v40 = vpop.eup %3279  ;;  %v2159_v54 = vmul.f32 1.442695, %v2138_v4  ;;  %v2140_v62 = vmul.f32 0.15, %v2110_v32  ;;  %3297 = vlog2.f32 %v5190_v9 }
 0x1f2   :  { %5186 = vst [vmem:[#allocation31_spill] sm:$0xff] %v4795_v44  ;;  %5188 = vst [vmem:[#allocation34_spill] sm:$0xff] %v4798_v15  ;;  %v3282_v58 = vpop.eup %3281  ;;  %v2208_v30 = vmul.f32 %v2190_v24, %v2190_v24  ;;  %v5191_v44 = vld [vmem:[#allocation9_spill] sm:$0xff]  ;;  %v2396_v43 = vmul.f32 %v2306_v63, %v5192_v59  ;;  %v2114_v15 = vmul.f32 0.6931472, %v3280_v40  ;;  %v5193_v40 = vld [vmem:[#allocation8_spill] sm:$0xff] }
 0x1f3   :  { %v2342_v22 = vmul.f32 %v2306_v63, %v5191_v44  ;;  %v4810_v20 = vpop.eup %3283  ;;  %v2189_v10 = vsub.f32 %v4454_v5, %v3282_v58  ;;  %v2305_v32 = vmul.f32 %v3282_v58, %v4717_v16  ;;  %3299 = vpow2.f32 %v2159_v54 }
 0x1f4   :  { %v2163_v35 = vmul.f32 1.442695, %v2140_v62  ;;  %v3286_v4 = vpop.eup %3285  ;;  %v2414_v3 = vsub.f32 %v4468_v60, %v2396_v43  ;;  %v2142_v23 = vmul.f32 0.15, %v2114_v15  ;;  %v4818_v44 = vmul.f32 %v4548_v6, %v4548_v6  ;;  %v5195_v62 = vld [vmem:[#allocation49_spill] sm:$0xff]  ;;  %v5196_v6 = vld [vmem:[#allocation50_spill] sm:$0xff] }
 0x1f5   :  { %v2360_v9 = vsub.f32 %v4465_v18, %v2342_v22  ;;  %v3288_v24 = vpop.eup %3287  ;;  %v2207_v63 = vmul.f32 %v2189_v10, %v2189_v10  ;;  %v2341_v59 = vmul.f32 %v2305_v32, %v5193_v40  ;;  %v2395_v5 = vmul.f32 %v2305_v32, %v5194_v7  ;;  %v5197_v32 = vld [vmem:[#allocation35_spill] sm:$0xff] }
 0x1f6   :  { %3301 = vpow2.f32 %v2163_v35  ;;  %v4822_v16 = vpop.eup %3289  ;;  %v2450_v54 = vmul.f32 %v2414_v3, %v2414_v3  ;;  %v2191_v18 = vsub.f32 %v4478_v39, %v3288_v24  ;;  %v2307_v60 = vmul.f32 %v3288_v24, %v4735_v50 }
 0x1f7   :  { %v2432_v58 = vmul.f32 %v2360_v9, %v2360_v9  ;;  %v3292_v15 = vpop.eup %3291  ;;  %v2225_v22 = vadd.f32 %v2208_v30, %v2207_v63  ;;  %v2359_v43 = vsub.f32 %v5195_v62, %v2341_v59  ;;  %v2413_v2 = vsub.f32 %v5196_v6, %v2395_v5  ;;  %v5199_v6 = vld [vmem:[#allocation51_spill] sm:$0xff] }
 0x1f8   :  { %v2167_v10 = vmul.f32 1.442695, %v2142_v23  ;;  %v4828_v13 = vpop.eup %3293  ;;  %v2209_v7 = vmul.f32 %v2191_v18, %v2191_v18  ;;  %v2343_v35 = vmul.f32 %v2307_v60, %v5197_v32  ;;  %v2397_v9 = vmul.f32 %v2307_v60, %v5198_v61 }
 0x1f9   :  { %v2468_v40 = vadd.f32 %v2450_v54, %v2432_v58  ;;  %v3296_v3 = vpop.eup %3295  ;;  %v2431_v34 = vmul.f32 %v2359_v43, %v2359_v43  ;;  %v2449_v39 = vmul.f32 %v2413_v2, %v2413_v2  ;;  %v2112_v50 = vmul.f32 0.6931472, %v3286_v4 }
 0x1fa   :  { %3303 = vpow2.f32 %v2167_v10  ;;  %v2226_v24 = vadd.f32 %v2225_v22, %v2209_v7  ;;  %v2361_v30 = vsub.f32 %v4506_v29, %v2343_v35  ;;  %v2415_v63 = vsub.f32 %v4509_v27, %v2397_v9  ;;  %v5200_v29 = vld [vmem:[#allocation11_spill] sm:$0xff]  ;;  %v5201_v27 = vld [vmem:[#allocation40_spill] sm:$0xff] }
 0x1fb   :  { %v4835_v23 = vsub.f32 %v5199_v6, %v3296_v3  ;;  %v3298_v59 = vpop.eup %3297  ;;  %v2467_v5 = vadd.f32 %v2449_v39, %v2431_v34  ;;  %v2309_v58 = vmul.f32 %v3296_v3, %v4756_v33  ;;  %v2141_v54 = vmul.f32 0.15, %v2112_v50  ;;  %v5202_v35 = vld [vmem:[#allocation56_spill] sm:$0xff]  ;;  %v5203_v3 = vld [vmem:[#allocation57_spill] sm:$0xff]  ;;  %v5204_v50 = vld [vmem:[#allocation58_spill] sm:$0xff] }
 0x1fc   :  { %v2116_v18 = vmul.f32 0.6931472, %v3292_v15  ;;  %v2433_v61 = vmul.f32 %v2361_v30, %v2361_v30  ;;  %v2451_v60 = vmul.f32 %v2415_v63, %v2415_v63  ;;  %v2120_v62 = vmul.f32 0.6931472, %v3298_v59  ;;  %v5205_v59 = vld [vmem:[#allocation10_spill] sm:$0xff] }
 0x1fd   :  { %v1954_v2 = vmul.f32 %v4550_v48, %v4550_v48  ;;  %v3300_v4 = vpop.eup %3299  ;;  %v2485_v22 = vadd.f32 %v2468_v40, %v2467_v5  ;;  %v2345_v43 = vmul.f32 %v2309_v58, %v5200_v29  ;;  %v2399_v10 = vmul.f32 %v2309_v58, %v5201_v27  ;;  %v5206_v29 = vld [vmem:[#allocation41_spill] sm:$0xff] }
 0x1fe   :  { %v2165_v7 = vmul.f32 1.442695, %v2141_v54  ;;  %v2469_v32 = vadd.f32 %v2451_v60, %v2433_v61  ;;  %v2192_v34 = vsub.f32 %v5202_v35, %v3300_v4  ;;  %v2308_v33 = vmul.f32 %v3300_v4, %v4773_v11 }
 0x1ff   :  { %v2143_v9 = vmul.f32 0.15, %v2116_v18  ;;  %v2363_v39 = vsub.f32 %v5203_v3, %v2345_v43  ;;  %v2417_v30 = vsub.f32 %v5204_v50, %v2399_v10  ;;  %v2145_v63 = vmul.f32 0.15, %v2120_v62 }
 0x200   :  { %v3302_v15 = vpop.eup %3301  ;;  %3305 = vpow2.f32 %v2165_v7  ;;  %v2486_v6 = vadd.f32 %v2485_v22, %v2469_v32  ;;  %v2210_v40 = vmul.f32 %v2192_v34, %v2192_v34  ;;  %v2344_v5 = vmul.f32 %v2308_v33, %v5205_v59  ;;  %v5207_v22 = vld [vmem:[#allocation39_spill] sm:$0xff]  ;;  %v5208_v32 = vld [vmem:[#allocation42_spill] sm:$0xff] }
 0x201   :  { %v2398_v58 = vmul.f32 %v2308_v33, %v5206_v29  ;;  %v2435_v54 = vmul.f32 %v2363_v39, %v2363_v39  ;;  %v2453_v61 = vmul.f32 %v2417_v30, %v2417_v30  ;;  %v2194_v60 = vsub.f32 %v4541_v14, %v3302_v15 }
 0x202   :  { %v2310_v11 = vmul.f32 %v3302_v15, %v4792_v49  ;;  %v2227_v18 = vadd.f32 %v2226_v24, %v2210_v40  ;;  %v2362_v4 = vsub.f32 %v4553_v46, %v2344_v5  ;;  %v2169_v27 = vmul.f32 1.442695, %v2143_v9  ;;  %v5210_v15 = vld [vmem:[#allocation13_spill] sm:$0xff] }
 0x203   :  { %v2416_v43 = vsub.f32 %v4556_v17, %v2398_v58  ;;  %v2471_v62 = vadd.f32 %v2453_v61, %v2435_v54  ;;  %v5209_v34 = vmax.f32 %v4677_v21, 1e-24  ;;  %v2173_v24 = vmul.f32 1.442695, %v2145_v63 }
 0x204   :  { %v3304_v10 = vpop.eup %3303  ;;  %v2346_v7 = vmul.f32 %v2310_v11, %v5207_v22  ;;  %v2400_v35 = vmul.f32 %v2310_v11, %v5208_v32  ;;  %v2434_v33 = vmul.f32 %v2362_v4, %v2362_v4  ;;  %v5211_v21 = vmax.f32 %v4689_v8, 1e-24 }
 0x205   :  { %3307 = vrsqrt.f32 %v5209_v34  ;;  %v2452_v3 = vmul.f32 %v2416_v43, %v2416_v43  ;;  %v4857_v14 = vsub.f32 %v4562_v51, %v3304_v10  ;;  %v2312_v49 = vmul.f32 %v3304_v10, %v4810_v20  ;;  %v5213_v43 = vld [vmem:[#allocation12_spill] sm:$0xff] }
 0x206   :  { %v2364_v46 = vsub.f32 %v4570_v25, %v2346_v7  ;;  %v2418_v17 = vsub.f32 %v4573_v56, %v2400_v35  ;;  %3309 = vpow2.f32 %v2169_v27  ;;  %v4868_v51 = vadd.f32 %v4818_v44, %v4644_v37 }
 0x207   :  { %v2470_v9 = vadd.f32 %v2452_v3, %v2434_v33  ;;  %v2348_v39 = vmul.f32 %v2312_v49, %v5210_v15  ;;  %v2402_v50 = vmul.f32 %v2312_v49, %v4438_v0  ;;  %3311 = vlog2.f32 %v5211_v21  ;;  %v5215_v49 = vld [vmem:[#allocation43_spill] sm:$0xff] }
 0x208   :  { %v2436_v30 = vmul.f32 %v2364_v46, %v2364_v46  ;;  %v2454_v40 = vmul.f32 %v2418_v17, %v2418_v17  ;;  %3313 = vpow2.f32 %v2173_v24  ;;  %v2094_v63 = vmax.f32 %v4723_v36, 1e-24 }
 0x209   :  { %v2487_v25 = vadd.f32 %v2486_v6, %v2470_v9  ;;  %v2366_v56 = vsub.f32 %v4585_v42, %v2348_v39  ;;  %v2420_v20 = vsub.f32 %v4588_v26, %v2402_v50  ;;  %v5212_v0 = vmax.f32 %v4705_v41, 1e-24  ;;  %v5217_v39 = vld [vmem:[#allocation62_spill] sm:$0xff] }
 0x20a   :  { %v3306_v59 = vpop.eup %3305  ;;  %v2472_v5 = vadd.f32 %v2454_v40, %v2436_v30  ;;  %v2093_v29 = vmax.f32 %v4744_v1, 1e-24  ;;  %v4877_v58 = vadd.f32 %v1954_v2, %v4806_v53  ;;  %v2211_v42 = vmul.f32 %v4835_v23, %v4835_v23  ;;  %v5219_v40 = vld [vmem:[#allocation15_spill] sm:$0xff] }
 0x20b   :  { %3315 = vlog2.f32 %v5212_v0  ;;  %v2488_v54 = vadd.f32 %v2487_v25, %v2471_v62  ;;  %v2438_v37 = vmul.f32 %v2366_v56, %v2366_v56  ;;  %v2456_v44 = vmul.f32 %v2420_v20, %v2420_v20 }
 0x20c   :  { %v4880_v6 = vsub.f32 %v4579_v45, %v3306_v59  ;;  %v2311_v26 = vmul.f32 %v3306_v59, %v4822_v16  ;;  %3317 = vlog2.f32 %v2094_v63  ;;  %v2095_v4 = vmax.f32 %v4767_v28, 1e-24 }
 0x20d   :  { %v2489_v61 = vadd.f32 %v2488_v54, %v2472_v5  ;;  %v2474_v11 = vadd.f32 %v2456_v44, %v2438_v37  ;;  %v2212_v2 = vmul.f32 %v2194_v60, %v2194_v60  ;;  %v2228_v45 = vadd.f32 %v2227_v18, %v2211_v42  ;;  %v5220_v37 = vld [vmem:[#allocation3_spill] sm:$0xff]  ;;  %v5221_v42 = vld [vmem:[#allocation21_spill] sm:$0xff] }
 0x20e   :  { %v2347_v27 = vmul.f32 %v2311_v26, %v5213_v43  ;;  %v2401_v10 = vmul.f32 %v2311_v26, %v4450_v52  ;;  %3319 = vlog2.f32 %v2093_v29  ;;  %v2097_v23 = vmax.f32 %v4788_v19, 1e-24 }
 0x20f   :  { %v3308_v53 = vpop.eup %3307  ;;  %v5214_v7 = vmov %v5211_v21  ;;  %v2229_v32 = vadd.f32 %v2228_v45, %v2212_v2  ;;  %v2098_v9 = vmax.f32 %v4877_v58, 1e-24  ;;  %v5218_v21 = vld [vmem:[#allocation63_spill] sm:$0xff] }
 0x210   :  { %v3310_v16 = vpop.eup %3309  ;;  %v2365_v62 = vsub.f32 %v4603_v55, %v2347_v27  ;;  %v2419_v22 = vsub.f32 %v4606_v38, %v2401_v10  ;;  %3321 = vrsqrt.f32 %v5214_v7  ;;  %v2096_v55 = vmax.f32 %v4868_v51, 1e-24 }
 0x211   :  { %v3312_v60 = vpop.eup %3311  ;;  %v2313_v35 = vmul.f32 %v3310_v16, %v4828_v13  ;;  %3323 = vlog2.f32 %v2095_v4  ;;  %v2197_v52 = vsub.f32 %v4594_v57, %v3310_v16  ;;  %v5216_v57 = vld [vmem:[#allocation64_spill] sm:$0xff] }
 0x212   :  { %v3314_v18 = vpop.eup %3313  ;;  %v2437_v34 = vmul.f32 %v2365_v62, %v2365_v62  ;;  %v2455_v33 = vmul.f32 %v2419_v22, %v2419_v22  ;;  %v2118_v3 = vmul.f32 0.6931472, %v3312_v60  ;;  %3325 = vlog2.f32 %v2097_v23 }
 0x213   :  { %v2349_v38 = vmul.f32 %v2313_v35, %v5215_v49  ;;  %v2403_v8 = vmul.f32 %v2313_v35, %v4452_v47  ;;  %v2315_v46 = vmul.f32 %v3314_v18, %v3308_v53  ;;  %v4908_v15 = vsub.f32 %v5216_v57, %v3314_v18 }
 0x214   :  { %v2473_v17 = vadd.f32 %v2455_v33, %v2437_v34  ;;  %v2144_v24 = vmul.f32 0.15, %v2118_v3  ;;  %3327 = vlog2.f32 %v2096_v55  ;;  %v2213_v60 = vmul.f32 %v4880_v6, %v4880_v6 }
 0x215   :  { %v3316_v13 = vpop.eup %3315  ;;  %v2367_v50 = vsub.f32 %v5217_v39, %v2349_v38  ;;  %v2421_v30 = vsub.f32 %v5218_v21, %v2403_v8  ;;  %v2351_v25 = vmul.f32 %v2315_v46, %v5219_v40  ;;  %v2405_v47 = vmul.f32 %v2315_v46, %v4462_v31  ;;  %v5224_v40 = vld [vmem:[#allocation14_spill] sm:$0xff] }
 0x216   :  { %v2490_v56 = vadd.f32 %v2489_v61, %v2473_v17  ;;  %v2171_v20 = vmul.f32 1.442695, %v2144_v24  ;;  %v2122_v59 = vmul.f32 0.6931472, %v3316_v13  ;;  %v3318_v5 = vpop.eup %3317  ;;  %v5222_v18 = vmax.f32 %v4705_v41, 1e-24 }
 0x217   :  { %v2439_v0 = vmul.f32 %v2367_v50, %v2367_v50  ;;  %v2457_v54 = vmul.f32 %v2421_v30, %v2421_v30  ;;  %v2369_v44 = vsub.f32 %v5220_v37, %v2351_v25  ;;  %v2423_v26 = vsub.f32 %v5221_v42, %v2405_v47  ;;  %v5225_v47 = vld [vmem:[#allocation47_spill] sm:$0xff]  ;;  %v5227_v37 = vld [vmem:[#allocation22_spill] sm:$0xff] }
 0x218   :  { %v2491_v53 = vadd.f32 %v2490_v56, %v2474_v11  ;;  %3329 = vpow2.f32 %v2171_v20  ;;  %v2146_v2 = vmul.f32 0.15, %v2122_v59  ;;  %v2126_v43 = vmul.f32 0.6931472, %v3318_v5  ;;  %v3320_v27 = vpop.eup %3319 }
 0x219   :  { %v2475_v10 = vadd.f32 %v2457_v54, %v2439_v0  ;;  %v2441_v31 = vmul.f32 %v2369_v44, %v2369_v44  ;;  %v2459_v61 = vmul.f32 %v2423_v26, %v2423_v26  ;;  %v2124_v22 = vmul.f32 0.6931472, %v3320_v27  ;;  %v5226_v0 = vld [vmem:[#allocation2_spill] sm:$0xff] }
 0x21a   :  { %v3322_v45 = vpop.eup %3321  ;;  %v2175_v16 = vmul.f32 1.442695, %v2146_v2  ;;  %v2148_v62 = vmul.f32 0.15, %v2126_v43  ;;  %3331 = vlog2.f32 %v2098_v9  ;;  %v2214_v38 = vmul.f32 %v4857_v14, %v4857_v14  ;;  %v5228_v26 = vld [vmem:[#allocation66_spill] sm:$0xff] }
 0x21b   :  { %v3324_v7 = vpop.eup %3323  ;;  %v4922_v35 = vadd.f32 %v2491_v53, %v2475_v10  ;;  %v4924_v11 = vadd.f32 %v2459_v61, %v2441_v31  ;;  %3333 = vrsqrt.f32 %v5222_v18  ;;  %v2147_v33 = vmul.f32 0.15, %v2124_v22  ;;  %v5229_v31 = vld [vmem:[#allocation46_spill] sm:$0xff]  ;;  %v5231_v18 = vld [vmem:[#allocation25_spill] sm:$0xff] }
 0x21c   :  { %3335 = vpow2.f32 %v2175_v16  ;;  %v2179_v34 = vmul.f32 1.442695, %v2148_v62  ;;  %v2128_v3 = vmul.f32 0.6931472, %v3324_v7  ;;  %v3326_v49 = vpop.eup %3325  ;;  %v2230_v8 = vadd.f32 %v2229_v32, %v2213_v60 }
 0x21d   :  { %3337 = vrsqrt.f32 %v2094_v63  ;;  %v2177_v6 = vmul.f32 1.442695, %v2147_v33  ;;  %v2132_v13 = vmul.f32 0.6931472, %v3326_v49  ;;  %v2215_v41 = vmul.f32 %v2197_v52, %v2197_v52  ;;  %v5232_v33 = vld [vmem:[#allocation24_spill] sm:$0xff] }
 0x21e   :  { %3339 = vpow2.f32 %v2179_v34  ;;  %v2149_v46 = vmul.f32 0.15, %v2128_v3  ;;  %v2231_v17 = vadd.f32 %v2230_v8, %v2214_v38  ;;  %v3328_v24 = vpop.eup %3327  ;;  %v5233_v8 = vld [vmem:[#allocation17_spill] sm:$0xff] }
 0x21f   :  { %3341 = vrsqrt.f32 %v2093_v29  ;;  %v2151_v39 = vmul.f32 0.15, %v2132_v13  ;;  %v2130_v36 = vmul.f32 0.6931472, %v3328_v24  ;;  %v5223_v29 = vld [vmem:[#allocation65_spill] sm:$0xff] }
 0x220   :  { %3343 = vpow2.f32 %v2177_v6  ;;  %v2181_v57 = vmul.f32 1.442695, %v2149_v46  ;;  %v2232_v63 = vadd.f32 %v2231_v17, %v2215_v41  ;;  %v5234_v46 = vld [vmem:[#allocation53_spill] sm:$0xff]  ;;  %v5235_v41 = vld [vmem:[#allocation20_spill] sm:$0xff] }
 0x221   :  { %3345 = vrsqrt.f32 %v2095_v4  ;;  %v2185_v32 = vmul.f32 1.442695, %v2151_v39  ;;  %v2150_v1 = vmul.f32 0.15, %v2130_v36 }
 0x222   :  { %v3330_v14 = vpop.eup %3329  ;;  %3347 = vpow2.f32 %v2181_v57  ;;  %v5236_v57 = vld [vmem:[#allocation16_spill] sm:$0xff] }
 0x223   :  { %v2314_v50 = vmul.f32 %v3330_v14, %v3322_v45  ;;  %3349 = vrsqrt.f32 %v2097_v23  ;;  %v2198_v52 = vsub.f32 %v5223_v29, %v3330_v14  ;;  %v2183_v4 = vmul.f32 1.442695, %v2150_v1  ;;  %v5230_v45 = vld [vmem:[#allocation48_spill] sm:$0xff]  ;;  %v5239_v1 = vld [vmem:[#allocation54_spill] sm:$0xff] }
 0x224   :  { %v3332_v21 = vpop.eup %3331  ;;  %3351 = vpow2.f32 %v2185_v32  ;;  %v5238_v32 = vld [vmem:[#allocation5_spill] sm:$0xff] }
 0x225   :  { %v3334_v30 = vpop.eup %3333  ;;  %v2350_v25 = vmul.f32 %v2314_v50, %v5224_v40  ;;  %v2404_v28 = vmul.f32 %v2314_v50, %v5225_v47  ;;  %v2134_v56 = vmul.f32 0.6931472, %v3332_v21  ;;  %v2216_v59 = vmul.f32 %v2198_v52, %v2198_v52  ;;  %v5240_v40 = vld [vmem:[#allocation45_spill] sm:$0xff] }
 0x226   :  { %v3336_v20 = vpop.eup %3335  ;;  %3353 = vpow2.f32 %v2183_v4  ;;  %v5241_v4 = vld [vmem:[#allocation4_spill] sm:$0xff] }
 0x227   :  { %v3338_v5 = vpop.eup %3337  ;;  %v2368_v54 = vsub.f32 %v5226_v0, %v2350_v25  ;;  %v2422_v19 = vsub.f32 %v5227_v37, %v2404_v28  ;;  %v2316_v23 = vmul.f32 %v3336_v20, %v3334_v30  ;;  %3355 = vrsqrt.f32 %v2096_v55  ;;  %v5243_v37 = vld [vmem:[#allocation55_spill] sm:$0xff] }
 0x228   :  { %v3340_v44 = vpop.eup %3339  ;;  %v2152_v42 = vmul.f32 0.15, %v2134_v56  ;;  %v4946_v53 = vsub.f32 %v5228_v26, %v3336_v20  ;;  %v4948_v2 = vadd.f32 %v2232_v63, %v2216_v59  ;;  %3357 = vrsqrt.f32 %v2098_v9  ;;  %v5237_v63 = vld [vmem:[#allocation23_spill] sm:$0xff]  ;;  %v5242_v20 = vld [vmem:[#allocation52_spill] sm:$0xff] }
 0x229   :  { %v3342_v43 = vpop.eup %3341  ;;  %v2440_v27 = vmul.f32 %v2368_v54, %v2368_v54  ;;  %v2458_v10 = vmul.f32 %v2422_v19, %v2422_v19  ;;  %v2352_v61 = vmul.f32 %v2316_v23, %v5229_v31  ;;  %v2406_v16 = vmul.f32 %v2316_v23, %v5230_v45  ;;  %v5244_v23 = vld [vmem:[#allocation19_spill] sm:$0xff] }
 0x22a   :  { %v3344_v62 = vpop.eup %3343  ;;  %v2318_v22 = vmul.f32 %v3340_v44, %v3338_v5  ;;  %v2187_v7 = vmul.f32 1.442695, %v2152_v42  ;;  %v4955_v51 = vsub.f32 %v4697_v12, %v3340_v44 }
 0x22b   :  { %v3346_v55 = vpop.eup %3345  ;;  %v2476_v60 = vadd.f32 %v2458_v10, %v2440_v27  ;;  %v2370_v34 = vsub.f32 %v5231_v18, %v2352_v61  ;;  %v2424_v3 = vsub.f32 %v5232_v33, %v2406_v16  ;;  %v2317_v49 = vmul.f32 %v3344_v62, %v3342_v43  ;;  %v5246_v10 = vld [vmem:[#allocation60_spill] sm:$0xff]  ;;  %v5247_v61 = vld [vmem:[#allocation27_spill] sm:$0xff] }
 0x22c   :  { %v3348_v38 = vpop.eup %3347  ;;  %v2354_v6 = vmul.f32 %v2318_v22, %v5233_v8  ;;  %v2408_v13 = vmul.f32 %v2318_v22, %v5234_v46  ;;  %3359 = vpow2.f32 %v2187_v7  ;;  %v2201_v17 = vsub.f32 %v5235_v41, %v3344_v62  ;;  %v5248_v16 = vld [vmem:[#allocation7_spill] sm:$0xff]  ;;  %v5249_v7 = vld [vmem:[#allocation28_spill] sm:$0xff]  ;;  %v5252_v46 = vld [vmem:[#allocation18_spill] sm:$0xff] }
 0x22d   :  { %v3350_v58 = vpop.eup %3349  ;;  %v2493_v9 = vadd.f32 %v4922_v35, %v2476_v60  ;;  %v2442_v12 = vmul.f32 %v2370_v34, %v2370_v34  ;;  %v2460_v24 = vmul.f32 %v2424_v3, %v2424_v3  ;;  %v2353_v39 = vmul.f32 %v2317_v49, %v5236_v57  ;;  %v5250_v33 = vld [vmem:[#allocation32_spill] sm:$0xff]  ;;  %v5253_v41 = vld [vmem:[#allocation61_spill] sm:$0xff] }
 0x22e   :  { %v3352_v36 = vpop.eup %3351  ;;  %v2372_v14 = vsub.f32 %v5237_v63, %v2354_v6  ;;  %v2426_v50 = vsub.f32 %v5238_v32, %v2408_v13  ;;  %v2407_v29 = vmul.f32 %v2317_v49, %v5239_v1  ;;  %v2319_v52 = vmul.f32 %v3348_v38, %v3346_v55  ;;  %v5251_v49 = vld [vmem:[#allocation30_spill] sm:$0xff] }
 0x22f   :  { %v2478_v21 = vadd.f32 %v2460_v24, %v2442_v12  ;;  %v2494_v30 = vadd.f32 %v2493_v9, %v4924_v11  ;;  %v2371_v25 = vsub.f32 %v5240_v40, %v2353_v39  ;;  %v2321_v47 = vmul.f32 %v3352_v36, %v3350_v58  ;;  %v5245_v11 = vld [vmem:[#allocation26_spill] sm:$0xff]  ;;  %v5254_v9 = vld [vmem:[#allocation29_spill] sm:$0xff] }
 0x230   :  { %v2444_v28 = vmul.f32 %v2372_v14, %v2372_v14  ;;  %v2462_v35 = vmul.f32 %v2426_v50, %v2426_v50  ;;  %v2425_v56 = vsub.f32 %v5241_v4, %v2407_v29  ;;  %v2355_v59 = vmul.f32 %v2319_v52, %v5242_v20  ;;  %v3354_v5 = vpop.eup %3353  ;;  %v5255_v63 = vld [vmem:[#allocation6_spill] sm:$0xff]  ;;  %v5257_v29 = vld [vmem:[#allocation67_spill] sm:$0xff] }
 0x231   :  { %v2495_v0 = vadd.f32 %v2494_v30, %v2478_v21  ;;  %v2443_v54 = vmul.f32 %v2371_v25, %v2371_v25  ;;  %v2409_v19 = vmul.f32 %v2319_v52, %v5243_v37  ;;  %v2357_v44 = vmul.f32 %v2321_v47, %v5244_v23  ;;  %v3356_v42 = vpop.eup %3355  ;;  %v5258_v25 = vld [vmem:[#allocation59_spill] sm:$0xff] }
 0x232   :  { %v2480_v26 = vadd.f32 %v2462_v35, %v2444_v28  ;;  %v2461_v43 = vmul.f32 %v2425_v56, %v2425_v56  ;;  %v2373_v27 = vsub.f32 %v5245_v11, %v2355_v59  ;;  %v2411_v31 = vmul.f32 %v2321_v47, %v5246_v10  ;;  %v3358_v60 = vpop.eup %3357  ;;  %v5259_v59 = vld [vmem:[#allocation34_spill] sm:$0xff] }
 0x233   :  { %v2427_v45 = vsub.f32 %v5247_v61, %v2409_v19  ;;  %v2375_v62 = vsub.f32 %v5248_v16, %v2357_v44  ;;  %v2320_v22 = vmul.f32 %v3356_v42, %v3354_v5  ;;  %v2203_v55 = vsub.f32 %v5249_v7, %v3348_v38  ;;  %v5256_v38 = vld [vmem:[#allocation33_spill] sm:$0xff] }
 0x234   :  { %v2479_v18 = vadd.f32 %v2461_v43, %v2443_v54  ;;  %v2445_v34 = vmul.f32 %v2373_v27, %v2373_v27  ;;  %v2429_v3 = vsub.f32 %v5250_v33, %v2411_v31  ;;  %v2204_v8 = vsub.f32 %v5251_v49, %v3354_v5 }
 0x235   :  { %v2463_v6 = vmul.f32 %v2427_v45, %v2427_v45  ;;  %v2356_v13 = vmul.f32 %v2320_v22, %v5252_v46  ;;  %v2410_v58 = vmul.f32 %v2320_v22, %v5253_v41  ;;  %v2205_v12 = vsub.f32 %v5254_v9, %v3352_v36 }
 0x236   :  { %v3360_v24 = vpop.eup %3359  ;;  %v2496_v57 = vadd.f32 %v2495_v0, %v2479_v18  ;;  %v2465_v1 = vmul.f32 %v2429_v3, %v2429_v3  ;;  %v2217_v21 = vmul.f32 %v4908_v15, %v4908_v15  ;;  %v2218_v28 = vmul.f32 %v4946_v53, %v4946_v53  ;;  %v5260_v0 = vld [vmem:[#allocation31_spill] sm:$0xff] }
 0x237   :  { %v2481_v39 = vadd.f32 %v2463_v6, %v2445_v34  ;;  %v2374_v14 = vsub.f32 %v5255_v63, %v2356_v13  ;;  %v2428_v32 = vsub.f32 %v5256_v38, %v2410_v58  ;;  %v2322_v50 = vmul.f32 %v3360_v24, %v3358_v60 }
 0x238   :  { %v2206_v52 = vsub.f32 %v5257_v29, %v3360_v24  ;;  %v2234_v35 = vadd.f32 %v4948_v2, %v2217_v21  ;;  %v2447_v4 = vmul.f32 %v2375_v62, %v2375_v62  ;;  %v2497_v56 = vadd.f32 %v2496_v57, %v2480_v26 }
 0x239   :  { %v2446_v30 = vmul.f32 %v2374_v14, %v2374_v14  ;;  %v2464_v40 = vmul.f32 %v2428_v32, %v2428_v32  ;;  %v2358_v47 = vmul.f32 %v2322_v50, %v5258_v25  ;;  %v2412_v36 = vmul.f32 %v2322_v50, %v4550_v48 }
 0x23a   :  { %v2219_v37 = vmul.f32 %v2201_v17, %v2201_v17  ;;  %v2235_v15 = vadd.f32 %v2234_v35, %v2218_v28  ;;  %v2483_v19 = vadd.f32 %v2465_v1, %v2447_v4  ;;  %v2498_v23 = vadd.f32 %v2497_v56, %v2481_v39 }
 0x23b   :  { %v2482_v20 = vadd.f32 %v2464_v40, %v2446_v30  ;;  %v2430_v5 = vsub.f32 %v5259_v59, %v2412_v36  ;;  %v2376_v54 = vsub.f32 %v5260_v0, %v2358_v47  ;;  %v2220_v48 = vmul.f32 %v4955_v51, %v4955_v51 }
 0x23c   :  { %v2236_v43 = vadd.f32 %v2235_v15, %v2219_v37  ;;  %v2221_v2 = vmul.f32 %v2203_v55, %v2203_v55  ;;  %v2222_v10 = vmul.f32 %v2204_v8, %v2204_v8  ;;  %v2223_v45 = vmul.f32 %v2205_v12, %v2205_v12 }
 0x23d   :  { %v2466_v44 = vmul.f32 %v2430_v5, %v2430_v5  ;;  %v2448_v42 = vmul.f32 %v2376_v54, %v2376_v54  ;;  %v2499_v53 = vadd.f32 %v2498_v23, %v2482_v20  ;;  %v2224_v17 = vmul.f32 %v2206_v52, %v2206_v52 }
 0x23e   :  { %v2237_v27 = vadd.f32 %v2236_v43, %v2220_v48  ;;  %v2511_v58 = vlaneseq }
 0x23f   :  { %v2484_v11 = vadd.f32 %v2466_v44, %v2448_v42  ;;  %v2500_v26 = vadd.f32 %v2499_v53, %v2483_v19 }
 0x240   :  { %v2238_v31 = vadd.f32 %v2237_v27, %v2221_v2  ;;  %v2512_v9 = vshrl.u32 %v2511_v58, 7  ;;  %v2514_v12 = vand.u32 127, %v2511_v58 }
 0x241   :  { %v2501_v61 = vadd.f32 %v2500_v26, %v2484_v11 }
 0x242   :  { %v2239_v16 = vadd.f32 %v2238_v31, %v2222_v10  ;;  %vm2515_vm0 = vcmp.eq.s32.totalorder %v2512_v9, 0  ;;  %vm2518_vm1 = vcmp.eq.s32.totalorder %v2514_v12, 1  ;;  %vm2516_vm2 = vcmp.eq.s32.totalorder %v2514_v12, 0 }
 0x243   :  { %vm2519_vm3 = vmand %vm2515_vm0, %vm2518_vm1 }
 0x244   :  { %v2240_v62 = vadd.f32 %v2239_v16, %v2223_v45  ;;  %vm2517_vm4 = vmand %vm2515_vm0, %vm2516_vm2 }
 0x246   :  { %v2241_v22 = vadd.f32 %v2240_v62, %v2224_v17 }
 0x248   :  { %2242 = vadd.xlane.f32.xlu0 %v2241_v22 }
 0x24c   :  { %2502 = vadd.xlane.f32.xlu0 %v2501_v61 }
 0x2d5   :  { %v2243_v7 = vpop.xlane.xlu0 %2242 }
 0x2d6   :  { %v2244_v60 = vrot.slane %v2243_v7, 4 }
 0x2d8   :  { %v2245_v18 = vadd.f32 %v2244_v60, %v2243_v7 }
 0x2d9   :  { %v2503_v51 = vpop.xlane.xlu0 %2502 }
 0x2da   :  { %v2246_v34 = vrot.slane %v2245_v18, 2  ;;  %v2504_v33 = vrot.slane %v2503_v51, 4 }
 0x2dc   :  { %v2505_v3 = vadd.f32 %v2504_v33, %v2503_v51  ;;  %v2247_v55 = vadd.f32 %v2246_v34, %v2245_v18 }
 0x2de   :  { %v2506_v49 = vrot.slane %v2505_v3, 2  ;;  %v2248_v6 = vrot.slane %v2247_v55, 1 }
 0x2e0   :  { %v2507_v8 = vadd.f32 %v2506_v49, %v2505_v3  ;;  %v2249_v46 = vadd.f32 %v2248_v6, %v2247_v55 }
 0x2e2   :  { %2817 = vpush %v2249_v46  ;;  %v2508_v13 = vrot.slane %v2507_v8, 1 }
 0x2e4   :  { %v2509_v41 = vadd.f32 %v2508_v13, %v2507_v8 }
 0x2e6   :  { %2819 = vpush %v2509_v41 }
 0x313   :  { %s2818_s1 = spop %2817 }
 0x314   :  { %v2522_v57 = vstv %s2818_s1 }
 0x317   :  { %s2820_s15 = spop %2819 }
 0x318   :  { %v2520_v24 = vstv %s2820_s15 }
 0x319   :  { %v2521_v39 = vsel %vm2519_vm3, %v2520_v24, 0.0 }
 0x31a   :  { %v2523_v63 = vsel %vm2517_vm4, %v2522_v57, %v2521_v39 }
 0x31b   :  { %2524 = vst [vmem:[%s5002_s2] sm:$0xff] %v2523_v63 }

</bundles_post_ra>
